<compile_context>
chip_gen: v6e
topology: v6e:2x2x1
jax: 0.10.0
libtpu: 0.0.40
codegen_flags: <defaults>
</compile_context>

<pallas_src>
import math

import jax
import jax.numpy as jnp
from jax import lax
from jax.experimental import pallas as pl
from jax.experimental.pallas import tpu as pltpu


# ----------------------------------------------------------------------------
# Kernel: one (batch, H-band) tile per grid step.
# ----------------------------------------------------------------------------
def _gelu_tanh(x):
    c = math.sqrt(2.0 / math.pi)
    return 0.5 * x * (1.0 + jnp.tanh(c * (x + 0.044715 * x * x * x)))


def conv_block_kernel(x_ref, xt_ref, xb_ref, w1_ref, a1_ref, s1_ref,
                      w2_ref, a2_ref, s2_ref, out_ref, xpad_ref, ypad_ref):
    # x_ref    : (1, Hb, W, Cp)  bf16 main input band (NHWC, Cp-padded)
    # xt_ref   : (1, 2,  W, Cp)  bf16 last 2 rows of the band above (halo)
    # xb_ref   : (1, 2,  W, Cp)  bf16 first 2 rows of the band below (halo)
    # w*_ref   : (9*Cp, Cp)      bf16 weights, row = (ky*3+kx)*Cp + cin
    # a*,s*    : (1, Cp)         f32 folded BN scale / shift (bias+gamma folded)
    # out_ref  : (1, Hb, W, Cp)
    # xpad_ref : (Hb+4, W+2, Cp) bf16 scratch: zero-padded conv1 input band
    # ypad_ref : (Hb+2, W+2, Cp) bf16 scratch: zero-padded conv2 input band
    _, Hb, W, Cp = x_ref.shape
    H1 = Hb + 2                       # rows of y1 needed (1-row halo each side)
    bi = pl.program_id(1)
    nb = pl.num_programs(1)

    # ---- assemble zero-padded conv1 input band ------------------------------
    # Scratch is uninitialised and reused across parallel grid steps: the
    # border is (re)written every step — do NOT hoist to program_id == 0.
    zcol_x = jnp.zeros((Hb + 4, 1, Cp), jnp.bfloat16)
    xpad_ref[:, 0:1, :] = zcol_x
    xpad_ref[:, W + 1:W + 2, :] = zcol_x
    # Main band written straight from the input block (x is not kept live).
    xpad_ref[2:2 + Hb, 1:1 + W, :] = x_ref[0].astype(jnp.bfloat16)

    zrows2 = jnp.zeros((2, W, Cp), jnp.bfloat16)

    @pl.when(bi > 0)                  # real rows above this band
    def _():
        xpad_ref[0:2, 1:1 + W, :] = xt_ref[0].astype(jnp.bfloat16)

    @pl.when(bi == 0)                 # image top: zero padding
    def _():
        xpad_ref[0:2, 1:1 + W, :] = zrows2

    @pl.when(bi < nb - 1)             # real rows below this band
    def _():
        xpad_ref[2 + Hb:4 + Hb, 1:1 + W, :] = xb_ref[0].astype(jnp.bfloat16)

    @pl.when(bi == nb - 1)            # image bottom: zero padding
    def _():
        xpad_ref[2 + Hb:4 + Hb, 1:1 + W, :] = zrows2

    # ---- 3x3 conv = 9 accumulating bf16 MXU matmuls (no im2col scratch) -----
    def conv3x3(src_ref, w_ref, n_rows):
        acc = jnp.zeros((n_rows * W, Cp), jnp.float32)
        for ky in range(3):
            # One leading-dim (aligned) band read per ky; the sublane-shifted
            # kx windows are sliced from the in-register band value.
            band = src_ref[ky:ky + n_rows, :, :]            # (n_rows, W+2, Cp)
            for kx in range(3):
                t = ky * 3 + kx
                win = band[:, kx:kx + W, :].reshape(n_rows * W, Cp)
                acc = acc + jnp.dot(win, w_ref[t * Cp:(t + 1) * Cp, :],
                                    preferred_element_type=jnp.float32)
        return acc

    # conv1 + BN1 + GELU(tanh) over Hb+2 rows (f32 epilogue)
    y1 = _gelu_tanh(conv3x3(xpad_ref, w1_ref, H1) * a1_ref[...] + s1_ref[...])

    # ---- assemble zero-padded conv2 input band -------------------------------
    zcol_y = jnp.zeros((H1, 1, Cp), jnp.bfloat16)
    ypad_ref[:, 0:1, :] = zcol_y
    ypad_ref[:, W + 1:W + 2, :] = zcol_y
    ypad_ref[:, 1:1 + W, :] = y1.reshape(H1, W, Cp).astype(jnp.bfloat16)

    zrow_y = jnp.zeros((1, W + 2, Cp), jnp.bfloat16)

    @pl.when(bi == 0)                 # y1 row -1 does not exist -> zero pad
    def _():
        ypad_ref[0:1, :, :] = zrow_y

    @pl.when(bi == nb - 1)            # y1 row H does not exist -> zero pad
    def _():
        ypad_ref[H1 - 1:H1, :, :] = zrow_y

    # conv2 + BN2 (+ layer_scale gamma folded into a2/s2)
    y2 = conv3x3(ypad_ref, w2_ref, Hb) * a2_ref[...] + s2_ref[...]

    # residual add in f32 (input band re-read here, not kept live across convs)
    out = x_ref[0].astype(jnp.float32).reshape(Hb * W, Cp) + y2
    out_ref[...] = out.reshape(1, Hb, W, Cp).astype(out_ref.dtype)


# ----------------------------------------------------------------------------
# Wrapper: band selection, specs, pallas_call.
# ----------------------------------------------------------------------------
def _round_up(n, m):
    return ((n + m - 1) // m) * m


def _pick_h_band(H, max_band=32):
    """Largest even divisor of H that is <= min(max_band, H // 2); else H.

    Even band heights keep the 2-row halo blocks block-aligned; >=2 bands give
    v7x's second TensorCore work at batch=1 and shrink the VMEM working set.
    """
    target = min(max_band, H // 2)
    for d in range(target, 1, -1):
        if H % d == 0 and d % 2 == 0:
            return d
    return H


def _vmem_limit_bytes():
    # ~3/4 of physical VMEM, capped at 96 MiB: ~96 MiB on v5e/v6e (128 MiB
    # physical), ~48 MiB on v7x (64 MiB physical).
    try:
        cap = pltpu.get_tpu_info().vmem_capacity_bytes
    except Exception:
        cap = 128 * 1024 * 1024
    return int(min(96 * 1024 * 1024, (cap * 3) // 4))


def conv_block_apply_nhwc(x_nhwc, w1, a1, s1, w2, a2, s2, *, out_dtype=None,
                          h_band=None):
    """ConvBlock forward on NHWC activations with channels padded to 128*k."""
    B, H, W, Cp = x_nhwc.shape
    assert Cp % 128 == 0, "channel dim must be padded to a multiple of 128"
    out_dtype = out_dtype if out_dtype is not None else x_nhwc.dtype
    Hb = h_band if h_band is not None else _pick_h_band(H)
    assert H % Hb == 0
    nb = H // Hb
    hs = Hb // 2          # halo 2-row block stride; only meaningful when nb > 1

    band_spec = pl.BlockSpec((1, Hb, W, Cp), lambda b, bi: (b, bi, 0, 0))
    # Neighbouring-band edge rows as 2-row blocks (clamped indices are only
    # actually used when a real neighbour exists; image edges are zero-filled
    # inside the kernel).
    top_spec = pl.BlockSpec(
        (1, 2, W, Cp), lambda b, bi: (b, jnp.maximum(bi * hs - 1, 0), 0, 0))
    bot_spec = pl.BlockSpec(
        (1, 2, W, Cp),
        lambda b, bi: (b, jnp.minimum((bi + 1) * hs, H // 2 - 1), 0, 0))
    # Loop-invariant operands: single-buffered (pure VMEM headroom).
    w_spec = pl.BlockSpec((9 * Cp, Cp), lambda b, bi: (0, 0),
                          pipeline_mode=pl.Buffered(1))
    v_spec = pl.BlockSpec((1, Cp), lambda b, bi: (0, 0),
                          pipeline_mode=pl.Buffered(1))

    return pl.pallas_call(
        conv_block_kernel,
        out_shape=jax.ShapeDtypeStruct((B, H, W, Cp), out_dtype),
        grid=(B, nb),
        in_specs=[band_spec, top_spec, bot_spec,
                  w_spec, v_spec, v_spec, w_spec, v_spec, v_spec],
        out_specs=pl.BlockSpec((1, Hb, W, Cp), lambda b, bi: (b, bi, 0, 0)),
        scratch_shapes=[
            pltpu.VMEM((Hb + 4, W + 2, Cp), jnp.bfloat16),   # padded conv1 input
            pltpu.VMEM((Hb + 2, W + 2, Cp), jnp.bfloat16),   # padded conv2 input
        ],
        compiler_params=pltpu.CompilerParams(
            dimension_semantics=("parallel", "parallel"),
            vmem_limit_bytes=_vmem_limit_bytes()),
    )(x_nhwc, x_nhwc, x_nhwc, w1, a1, s1, w2, a2, s2)


# ----------------------------------------------------------------------------
# Parameter folding + NCHW convenience entry (mirrors the PyTorch interface).
# ----------------------------------------------------------------------------
def _fold_bn(conv_b, bn_w, bn_b, bn_mean, bn_var, eps, gamma=None):
    a = bn_w / jnp.sqrt(bn_var + eps)
    s = bn_b + a * (conv_b - bn_mean)
    if gamma is not None:
        a = a * gamma
        s = s * gamma
    return a, s


def _im2col_weight(w_oihw, Cp):
    # (Cout, Cin, 3, 3) -> (9*Cp, Cp) bf16, row index = (ky*3+kx)*Cp + cin
    Cout, Cin, kh, kw = w_oihw.shape
    wt = jnp.transpose(w_oihw, (2, 3, 1, 0))                  # (3,3,Cin,Cout)
    wt = jnp.pad(wt, ((0, 0), (0, 0), (0, Cp - Cin), (0, Cp - Cout)))
    return wt.reshape(kh * kw * Cp, Cp).astype(jnp.bfloat16)


def _pad_vec(v, Cp):
    return jnp.pad(v, (0, Cp - v.shape[0])).reshape(1, Cp).astype(jnp.float32)


def conv_block_forward(x_nchw, p, eps=1e-5):
    """NCHW entry point.  The NCHW->NHWC / channel-pad / bf16 conversion here is
    a one-time layout change; in a full model keep activations NHWC+bf16+padded
    across the stage so it is amortised over all blocks."""
    B, C, H, W = x_nchw.shape
    Cp = _round_up(C, 128)

    gamma = p.get("gamma", None)
    a1, s1 = _fold_bn(p["b1"], p["bn1_w"], p["bn1_b"], p["bn1_m"], p["bn1_v"], eps)
    a2, s2 = _fold_bn(p["b2"], p["bn2_w"], p["bn2_b"], p["bn2_m"], p["bn2_v"], eps,
                      gamma=gamma)
    w1 = _im2col_weight(p["w1"], Cp)
    w2 = _im2col_weight(p["w2"], Cp)
    a1, s1, a2, s2 = (_pad_vec(v, Cp) for v in (a1, s1, a2, s2))

    x_nhwc = jnp.transpose(x_nchw, (0, 2, 3, 1)).astype(jnp.bfloat16)
    if Cp != C:
        x_nhwc = jnp.pad(x_nhwc, ((0, 0), (0, 0), (0, 0), (0, Cp - C)))

    out_nhwc = conv_block_apply_nhwc(x_nhwc, w1, a1, s1, w2, a2, s2,
                                     out_dtype=x_nchw.dtype)
    out_nhwc = out_nhwc[..., :C]                    # drop channel padding
    return jnp.transpose(out_nhwc, (0, 3, 1, 2))    # back to NCHW


# ----------------------------------------------------------------------------
# Pure-JAX reference (mirrors the PyTorch forward in NCHW) for validation.
# ----------------------------------------------------------------------------
def conv_block_reference(x, p, eps=1e-5):
    def conv(x, w, b):
        y = lax.conv_general_dilated(
            x, w, window_strides=(1, 1), padding=((1, 1), (1, 1)),
            dimension_numbers=("NCHW", "OIHW", "NCHW"))
        return y + b[None, :, None, None]

    def bn(x, w, b, m, v):
        return (x - m[None, :, None, None]) / jnp.sqrt(v[None, :, None, None] + eps) \
               * w[None, :, None, None] + b[None, :, None, None]

    inp = x
    y = conv(x, p["w1"], p["b1"])
    y = bn(y, p["bn1_w"], p["bn1_b"], p["bn1_m"], p["bn1_v"])
    y = _gelu_tanh(y)
    y = conv(y, p["w2"], p["b2"])
    y = bn(y, p["bn2_w"], p["bn2_b"], p["bn2_m"], p["bn2_v"])
    if p.get("gamma", None) is not None:
        y = y * p["gamma"][None, :, None, None]
    return inp + y


# ----------------------------------------------------------------------------
def make_params(key, dim, layer_scale=None):
    ks = jax.random.split(key, 10)
    p = {
        "w1": 0.1 * jax.random.normal(ks[0], (dim, dim, 3, 3), jnp.float32),
        "b1": 0.1 * jax.random.normal(ks[1], (dim,), jnp.float32),
        "bn1_w": 1.0 + 0.1 * jax.random.normal(ks[2], (dim,), jnp.float32),
        "bn1_b": 0.1 * jax.random.normal(ks[3], (dim,), jnp.float32),
        "bn1_m": 0.1 * jax.random.normal(ks[4], (dim,), jnp.float32),
        "bn1_v": 0.5 + jnp.abs(jax.random.normal(ks[5], (dim,), jnp.float32)),
        "w2": 0.1 * jax.random.normal(ks[6], (dim, dim, 3, 3), jnp.float32),
        "b2": 0.1 * jax.random.normal(ks[7], (dim,), jnp.float32),
        "bn2_w": 1.0 + 0.1 * jax.random.normal(ks[8], (dim,), jnp.float32),
        "bn2_b": 0.1 * jax.random.normal(ks[9], (dim,), jnp.float32),
        "bn2_m": jnp.zeros((dim,), jnp.float32),
        "bn2_v": jnp.ones((dim,), jnp.float32),
    }
    if layer_scale is not None:
        p["gamma"] = layer_scale * jnp.ones((dim,), jnp.float32)
    return p


if __name__ == "__main__":
    B, dim, H, W = 2, 32, 16, 16          # -> Cp=128, 2 H-bands of 8 rows
    key = jax.random.PRNGKey(0)
    kx, kp = jax.random.split(key)
    x = jax.random.normal(kx, (B, dim, H, W), jnp.float32)   # NCHW like PyTorch
    params = make_params(kp, dim, layer_scale=1e-2)

    fwd = jax.jit(conv_block_forward)
    out = jax.block_until_ready(fwd(x, params))
    ref = jax.block_until_ready(conv_block_reference(x, params))

    assert out.shape == x.shape and out.dtype == x.dtype
    err = jnp.max(jnp.abs(out - ref))
    # tolerance sized for bf16 activation I/O + bf16 matmul operands (f32 accum)
    assert jnp.allclose(out, ref, atol=1e-2, rtol=1e-2), f"max err {err}"
    print("KERNEL_OK")
</pallas_src>

<mosaic_0001>
module attributes {stable_mosaic.version = 11 : i64} {
  func.func @conv_block_kernel(%arg0: i32, %arg1: i32, %arg2: memref<1x8x16x128xbf16, #tpu.memory_space<vmem>>, %arg3: memref<1x2x16x128xbf16, #tpu.memory_space<vmem>>, %arg4: memref<1x2x16x128xbf16, #tpu.memory_space<vmem>>, %arg5: memref<1152x128xbf16, #tpu.memory_space<vmem>>, %arg6: memref<1x128xf32, #tpu.memory_space<vmem>>, %arg7: memref<1x128xf32, #tpu.memory_space<vmem>>, %arg8: memref<1152x128xbf16, #tpu.memory_space<vmem>>, %arg9: memref<1x128xf32, #tpu.memory_space<vmem>>, %arg10: memref<1x128xf32, #tpu.memory_space<vmem>>, %arg11: memref<1x8x16x128xf32, #tpu.memory_space<vmem>>, %arg12: memref<12x18x128xbf16, #tpu.memory_space<vmem>>, %arg13: memref<10x18x128xbf16, #tpu.memory_space<vmem>>) attributes {dimension_semantics = [#tpu.dimension_semantics<parallel>, #tpu.dimension_semantics<parallel>], iteration_bounds = array<i64: 2, 2>, scalar_prefetch = 0 : i64, scratch_operands = 2 : i64, tpu.core_type = #tpu.core_type<tc>, window_params = [{transform_indices = @transform_0, window_bounds = array<i64: 1, 8, 16, 128>}, {transform_indices = @transform_1, window_bounds = array<i64: 1, 2, 16, 128>}, {transform_indices = @transform_2, window_bounds = array<i64: 1, 2, 16, 128>}, {pipeline_mode = #tpu.pipeline_mode<synchronous>, transform_indices = @transform_3, window_bounds = array<i64: 1152, 128>}, {pipeline_mode = #tpu.pipeline_mode<synchronous>, transform_indices = @transform_4, window_bounds = array<i64: 1, 128>}, {pipeline_mode = #tpu.pipeline_mode<synchronous>, transform_indices = @transform_5, window_bounds = array<i64: 1, 128>}, {pipeline_mode = #tpu.pipeline_mode<synchronous>, transform_indices = @transform_6, window_bounds = array<i64: 1152, 128>}, {pipeline_mode = #tpu.pipeline_mode<synchronous>, transform_indices = @transform_7, window_bounds = array<i64: 1, 128>}, {pipeline_mode = #tpu.pipeline_mode<synchronous>, transform_indices = @transform_8, window_bounds = array<i64: 1, 128>}, {transform_indices = @transform_9, window_bounds = array<i64: 1, 8, 16, 128>}]} {
    %cst = arith.constant 0.000000e+00 : bf16
    %0 = vector.broadcast %cst : bf16 to vector<12x1x128xbf16>
    %c0 = arith.constant 0 : index
    %c0_0 = arith.constant 0 : index
    %c0_1 = arith.constant 0 : index
    %1 = vector.load %arg12[%c0, %c0_0, %c0_1] : memref<12x18x128xbf16, #tpu.memory_space<vmem>>, vector<12x1x128xbf16>
    tpu.vector_store %arg12[%c0, %c0_0, %c0_1], %0 {strides = array<i32>} : memref<12x18x128xbf16, #tpu.memory_space<vmem>>, vector<12x1x128xbf16>,
    %c0_2 = arith.constant 0 : index
    %c17 = arith.constant 17 : index
    %c0_3 = arith.constant 0 : index
    %2 = vector.load %arg12[%c0_2, %c17, %c0_3] : memref<12x18x128xbf16, #tpu.memory_space<vmem>>, vector<12x1x128xbf16>
    tpu.vector_store %arg12[%c0_2, %c17, %c0_3], %0 {strides = array<i32>} : memref<12x18x128xbf16, #tpu.memory_space<vmem>>, vector<12x1x128xbf16>,
    %c0_4 = arith.constant 0 : index
    %c0_5 = arith.constant 0 : index
    %c0_6 = arith.constant 0 : index
    %c0_7 = arith.constant 0 : index
    %3 = vector.load %arg2[%c0_4, %c0_5, %c0_6, %c0_7] : memref<1x8x16x128xbf16, #tpu.memory_space<vmem>>, vector<1x8x16x128xbf16>
    %4 = vector.shape_cast %3 : vector<1x8x16x128xbf16> to vector<8x16x128xbf16>
    %c2 = arith.constant 2 : index
    %c1 = arith.constant 1 : index
    %c0_8 = arith.constant 0 : index
    %5 = vector.load %arg12[%c2, %c1, %c0_8] : memref<12x18x128xbf16, #tpu.memory_space<vmem>>, vector<8x16x128xbf16>
    tpu.vector_store %arg12[%c2, %c1, %c0_8], %4 {strides = array<i32>} : memref<12x18x128xbf16, #tpu.memory_space<vmem>>, vector<8x16x128xbf16>,
    %cst_9 = arith.constant 0.000000e+00 : bf16
    %6 = vector.broadcast %cst_9 : bf16 to vector<2x16x128xbf16>
    %c0_i32 = arith.constant 0 : i32
    %7 = arith.cmpi sgt, %arg1, %c0_i32 : i32
    %8 = arith.extui %7 : i1 to i32
    %c0_i32_10 = arith.constant 0 : i32
    %9 = arith.cmpi ne, %8, %c0_i32_10 : i32
    scf.if %9 {
      %c0_117 = arith.constant 0 : index
      %c0_118 = arith.constant 0 : index
      %c0_119 = arith.constant 0 : index
      %c0_120 = arith.constant 0 : index
      %162 = vector.load %arg3[%c0_117, %c0_118, %c0_119, %c0_120] : memref<1x2x16x128xbf16, #tpu.memory_space<vmem>>, vector<1x2x16x128xbf16>
      %163 = vector.shape_cast %162 : vector<1x2x16x128xbf16> to vector<2x16x128xbf16>
      %c0_121 = arith.constant 0 : index
      %c1_122 = arith.constant 1 : index
      %c0_123 = arith.constant 0 : index
      %164 = vector.load %arg12[%c0_121, %c1_122, %c0_123] : memref<12x18x128xbf16, #tpu.memory_space<vmem>>, vector<2x16x128xbf16>
      tpu.vector_store %arg12[%c0_121, %c1_122, %c0_123], %163 {strides = array<i32>} : memref<12x18x128xbf16, #tpu.memory_space<vmem>>, vector<2x16x128xbf16>,
    } else {
    }
    %c0_i32_11 = arith.constant 0 : i32
    %10 = arith.cmpi eq, %arg1, %c0_i32_11 : i32
    %11 = arith.extui %10 : i1 to i32
    %c0_i32_12 = arith.constant 0 : i32
    %12 = arith.cmpi ne, %11, %c0_i32_12 : i32
    scf.if %12 {
      %c0_117 = arith.constant 0 : index
      %c1_118 = arith.constant 1 : index
      %c0_119 = arith.constant 0 : index
      %162 = vector.load %arg12[%c0_117, %c1_118, %c0_119] : memref<12x18x128xbf16, #tpu.memory_space<vmem>>, vector<2x16x128xbf16>
      tpu.vector_store %arg12[%c0_117, %c1_118, %c0_119], %6 {strides = array<i32>} : memref<12x18x128xbf16, #tpu.memory_space<vmem>>, vector<2x16x128xbf16>,
    } else {
    }
    %c1_i32 = arith.constant 1 : i32
    %13 = arith.cmpi slt, %arg1, %c1_i32 : i32
    %14 = arith.extui %13 : i1 to i32
    %c0_i32_13 = arith.constant 0 : i32
    %15 = arith.cmpi ne, %14, %c0_i32_13 : i32
    scf.if %15 {
      %c0_117 = arith.constant 0 : index
      %c0_118 = arith.constant 0 : index
      %c0_119 = arith.constant 0 : index
      %c0_120 = arith.constant 0 : index
      %162 = vector.load %arg4[%c0_117, %c0_118, %c0_119, %c0_120] : memref<1x2x16x128xbf16, #tpu.memory_space<vmem>>, vector<1x2x16x128xbf16>
      %163 = vector.shape_cast %162 : vector<1x2x16x128xbf16> to vector<2x16x128xbf16>
      %c10 = arith.constant 10 : index
      %c1_121 = arith.constant 1 : index
      %c0_122 = arith.constant 0 : index
      %164 = vector.load %arg12[%c10, %c1_121, %c0_122] : memref<12x18x128xbf16, #tpu.memory_space<vmem>>, vector<2x16x128xbf16>
      tpu.vector_store %arg12[%c10, %c1_121, %c0_122], %163 {strides = array<i32>} : memref<12x18x128xbf16, #tpu.memory_space<vmem>>, vector<2x16x128xbf16>,
    } else {
    }
    %c1_i32_14 = arith.constant 1 : i32
    %16 = arith.cmpi eq, %arg1, %c1_i32_14 : i32
    %17 = arith.extui %16 : i1 to i32
    %c0_i32_15 = arith.constant 0 : i32
    %18 = arith.cmpi ne, %17, %c0_i32_15 : i32
    scf.if %18 {
      %c10 = arith.constant 10 : index
      %c1_117 = arith.constant 1 : index
      %c0_118 = arith.constant 0 : index
      %162 = vector.load %arg12[%c10, %c1_117, %c0_118] : memref<12x18x128xbf16, #tpu.memory_space<vmem>>, vector<2x16x128xbf16>
      tpu.vector_store %arg12[%c10, %c1_117, %c0_118], %6 {strides = array<i32>} : memref<12x18x128xbf16, #tpu.memory_space<vmem>>, vector<2x16x128xbf16>,
    } else {
    }
    %cst_16 = arith.constant 0.000000e+00 : f32
    %19 = vector.broadcast %cst_16 : f32 to vector<160x128xf32>
    %c0_17 = arith.constant 0 : index
    %c0_18 = arith.constant 0 : index
    %c0_19 = arith.constant 0 : index
    %20 = vector.load %arg12[%c0_17, %c0_18, %c0_19] : memref<12x18x128xbf16, #tpu.memory_space<vmem>>, vector<10x18x128xbf16>
    %21 = vector.extract_strided_slice %20 {offsets = [0, 0, 0], sizes = [10, 16, 128], strides = [1, 1, 1]} : vector<10x18x128xbf16> to vector<10x16x128xbf16>
    %22 = vector.shape_cast %21 : vector<10x16x128xbf16> to vector<160x128xbf16>
    %c0_20 = arith.constant 0 : index
    %c0_21 = arith.constant 0 : index
    %23 = vector.load %arg5[%c0_20, %c0_21] : memref<1152x128xbf16, #tpu.memory_space<vmem>>, vector<128x128xbf16>
    %cst_22 = arith.constant dense<0.000000e+00> : vector<160x128xf32>
    %24 = tpu.matmul %22, %23, %cst_22 {dimension_numbers = #tpu.dot_dimension_numbers<[1], [0], [0], [1], [0, 0, 1, 1], [], []>} : vector<160x128xbf16>, vector<128x128xbf16>, vector<160x128xf32> -> vector<160x128xf32>
    %25 = arith.addf %19, %24 : vector<160x128xf32>
    %26 = vector.extract_strided_slice %20 {offsets = [0, 1, 0], sizes = [10, 16, 128], strides = [1, 1, 1]} : vector<10x18x128xbf16> to vector<10x16x128xbf16>
    %27 = vector.shape_cast %26 : vector<10x16x128xbf16> to vector<160x128xbf16>
    %c128 = arith.constant 128 : index
    %c0_23 = arith.constant 0 : index
    %28 = vector.load %arg5[%c128, %c0_23] : memref<1152x128xbf16, #tpu.memory_space<vmem>>, vector<128x128xbf16>
    %cst_24 = arith.constant dense<0.000000e+00> : vector<160x128xf32>
    %29 = tpu.matmul %27, %28, %cst_24 {dimension_numbers = #tpu.dot_dimension_numbers<[1], [0], [0], [1], [0, 0, 1, 1], [], []>} : vector<160x128xbf16>, vector<128x128xbf16>, vector<160x128xf32> -> vector<160x128xf32>
    %30 = arith.addf %25, %29 : vector<160x128xf32>
    %31 = vector.extract_strided_slice %20 {offsets = [0, 2, 0], sizes = [10, 16, 128], strides = [1, 1, 1]} : vector<10x18x128xbf16> to vector<10x16x128xbf16>
    %32 = vector.shape_cast %31 : vector<10x16x128xbf16> to vector<160x128xbf16>
    %c256 = arith.constant 256 : index
    %c0_25 = arith.constant 0 : index
    %33 = vector.load %arg5[%c256, %c0_25] : memref<1152x128xbf16, #tpu.memory_space<vmem>>, vector<128x128xbf16>
    %cst_26 = arith.constant dense<0.000000e+00> : vector<160x128xf32>
    %34 = tpu.matmul %32, %33, %cst_26 {dimension_numbers = #tpu.dot_dimension_numbers<[1], [0], [0], [1], [0, 0, 1, 1], [], []>} : vector<160x128xbf16>, vector<128x128xbf16>, vector<160x128xf32> -> vector<160x128xf32>
    %35 = arith.addf %30, %34 : vector<160x128xf32>
    %c1_27 = arith.constant 1 : index
    %c0_28 = arith.constant 0 : index
    %c0_29 = arith.constant 0 : index
    %36 = vector.load %arg12[%c1_27, %c0_28, %c0_29] : memref<12x18x128xbf16, #tpu.memory_space<vmem>>, vector<10x18x128xbf16>
    %37 = vector.extract_strided_slice %36 {offsets = [0, 0, 0], sizes = [10, 16, 128], strides = [1, 1, 1]} : vector<10x18x128xbf16> to vector<10x16x128xbf16>
    %38 = vector.shape_cast %37 : vector<10x16x128xbf16> to vector<160x128xbf16>
    %c384 = arith.constant 384 : index
    %c0_30 = arith.constant 0 : index
    %39 = vector.load %arg5[%c384, %c0_30] : memref<1152x128xbf16, #tpu.memory_space<vmem>>, vector<128x128xbf16>
    %cst_31 = arith.constant dense<0.000000e+00> : vector<160x128xf32>
    %40 = tpu.matmul %38, %39, %cst_31 {dimension_numbers = #tpu.dot_dimension_numbers<[1], [0], [0], [1], [0, 0, 1, 1], [], []>} : vector<160x128xbf16>, vector<128x128xbf16>, vector<160x128xf32> -> vector<160x128xf32>
    %41 = arith.addf %35, %40 : vector<160x128xf32>
    %42 = vector.extract_strided_slice %36 {offsets = [0, 1, 0], sizes = [10, 16, 128], strides = [1, 1, 1]} : vector<10x18x128xbf16> to vector<10x16x128xbf16>
    %43 = vector.shape_cast %42 : vector<10x16x128xbf16> to vector<160x128xbf16>
    %c512 = arith.constant 512 : index
    %c0_32 = arith.constant 0 : index
    %44 = vector.load %arg5[%c512, %c0_32] : memref<1152x128xbf16, #tpu.memory_space<vmem>>, vector<128x128xbf16>
    %cst_33 = arith.constant dense<0.000000e+00> : vector<160x128xf32>
    %45 = tpu.matmul %43, %44, %cst_33 {dimension_numbers = #tpu.dot_dimension_numbers<[1], [0], [0], [1], [0, 0, 1, 1], [], []>} : vector<160x128xbf16>, vector<128x128xbf16>, vector<160x128xf32> -> vector<160x128xf32>
    %46 = arith.addf %41, %45 : vector<160x128xf32>
    %47 = vector.extract_strided_slice %36 {offsets = [0, 2, 0], sizes = [10, 16, 128], strides = [1, 1, 1]} : vector<10x18x128xbf16> to vector<10x16x128xbf16>
    %48 = vector.shape_cast %47 : vector<10x16x128xbf16> to vector<160x128xbf16>
    %c640 = arith.constant 640 : index
    %c0_34 = arith.constant 0 : index
    %49 = vector.load %arg5[%c640, %c0_34] : memref<1152x128xbf16, #tpu.memory_space<vmem>>, vector<128x128xbf16>
    %cst_35 = arith.constant dense<0.000000e+00> : vector<160x128xf32>
    %50 = tpu.matmul %48, %49, %cst_35 {dimension_numbers = #tpu.dot_dimension_numbers<[1], [0], [0], [1], [0, 0, 1, 1], [], []>} : vector<160x128xbf16>, vector<128x128xbf16>, vector<160x128xf32> -> vector<160x128xf32>
    %51 = arith.addf %46, %50 : vector<160x128xf32>
    %c2_36 = arith.constant 2 : index
    %c0_37 = arith.constant 0 : index
    %c0_38 = arith.constant 0 : index
    %52 = vector.load %arg12[%c2_36, %c0_37, %c0_38] : memref<12x18x128xbf16, #tpu.memory_space<vmem>>, vector<10x18x128xbf16>
    %53 = vector.extract_strided_slice %52 {offsets = [0, 0, 0], sizes = [10, 16, 128], strides = [1, 1, 1]} : vector<10x18x128xbf16> to vector<10x16x128xbf16>
    %54 = vector.shape_cast %53 : vector<10x16x128xbf16> to vector<160x128xbf16>
    %c768 = arith.constant 768 : index
    %c0_39 = arith.constant 0 : index
    %55 = vector.load %arg5[%c768, %c0_39] : memref<1152x128xbf16, #tpu.memory_space<vmem>>, vector<128x128xbf16>
    %cst_40 = arith.constant dense<0.000000e+00> : vector<160x128xf32>
    %56 = tpu.matmul %54, %55, %cst_40 {dimension_numbers = #tpu.dot_dimension_numbers<[1], [0], [0], [1], [0, 0, 1, 1], [], []>} : vector<160x128xbf16>, vector<128x128xbf16>, vector<160x128xf32> -> vector<160x128xf32>
    %57 = arith.addf %51, %56 : vector<160x128xf32>
    %58 = vector.extract_strided_slice %52 {offsets = [0, 1, 0], sizes = [10, 16, 128], strides = [1, 1, 1]} : vector<10x18x128xbf16> to vector<10x16x128xbf16>
    %59 = vector.shape_cast %58 : vector<10x16x128xbf16> to vector<160x128xbf16>
    %c896 = arith.constant 896 : index
    %c0_41 = arith.constant 0 : index
    %60 = vector.load %arg5[%c896, %c0_41] : memref<1152x128xbf16, #tpu.memory_space<vmem>>, vector<128x128xbf16>
    %cst_42 = arith.constant dense<0.000000e+00> : vector<160x128xf32>
    %61 = tpu.matmul %59, %60, %cst_42 {dimension_numbers = #tpu.dot_dimension_numbers<[1], [0], [0], [1], [0, 0, 1, 1], [], []>} : vector<160x128xbf16>, vector<128x128xbf16>, vector<160x128xf32> -> vector<160x128xf32>
    %62 = arith.addf %57, %61 : vector<160x128xf32>
    %63 = vector.extract_strided_slice %52 {offsets = [0, 2, 0], sizes = [10, 16, 128], strides = [1, 1, 1]} : vector<10x18x128xbf16> to vector<10x16x128xbf16>
    %64 = vector.shape_cast %63 : vector<10x16x128xbf16> to vector<160x128xbf16>
    %c1024 = arith.constant 1024 : index
    %c0_43 = arith.constant 0 : index
    %65 = vector.load %arg5[%c1024, %c0_43] : memref<1152x128xbf16, #tpu.memory_space<vmem>>, vector<128x128xbf16>
    %cst_44 = arith.constant dense<0.000000e+00> : vector<160x128xf32>
    %66 = tpu.matmul %64, %65, %cst_44 {dimension_numbers = #tpu.dot_dimension_numbers<[1], [0], [0], [1], [0, 0, 1, 1], [], []>} : vector<160x128xbf16>, vector<128x128xbf16>, vector<160x128xf32> -> vector<160x128xf32>
    %67 = arith.addf %62, %66 : vector<160x128xf32>
    %c0_45 = arith.constant 0 : index
    %c0_46 = arith.constant 0 : index
    %68 = vector.load %arg6[%c0_45, %c0_46] : memref<1x128xf32, #tpu.memory_space<vmem>>, vector<1x128xf32>
    %69 = vector.broadcast %68 : vector<1x128xf32> to vector<160x128xf32>
    %70 = arith.mulf %67, %69 : vector<160x128xf32>
    %c0_47 = arith.constant 0 : index
    %c0_48 = arith.constant 0 : index
    %71 = vector.load %arg7[%c0_47, %c0_48] : memref<1x128xf32, #tpu.memory_space<vmem>>, vector<1x128xf32>
    %72 = vector.broadcast %71 : vector<1x128xf32> to vector<160x128xf32>
    %73 = arith.addf %70, %72 : vector<160x128xf32>
    %cst_49 = arith.constant 5.000000e-01 : f32
    %74 = vector.broadcast %cst_49 : f32 to vector<160x128xf32>
    %75 = arith.mulf %74, %73 : vector<160x128xf32>
    %cst_50 = arith.constant 4.471500e-02 : f32
    %76 = vector.broadcast %cst_50 : f32 to vector<160x128xf32>
    %77 = arith.mulf %76, %73 : vector<160x128xf32>
    %78 = arith.mulf %77, %73 : vector<160x128xf32>
    %79 = arith.mulf %78, %73 : vector<160x128xf32>
    %80 = arith.addf %73, %79 : vector<160x128xf32>
    %cst_51 = arith.constant 0.797884583 : f32
    %81 = vector.broadcast %cst_51 : f32 to vector<160x128xf32>
    %82 = arith.mulf %81, %80 : vector<160x128xf32>
    %83 = math.tanh %82 : vector<160x128xf32>
    %cst_52 = arith.constant 1.000000e+00 : f32
    %84 = vector.broadcast %cst_52 : f32 to vector<160x128xf32>
    %85 = arith.addf %84, %83 : vector<160x128xf32>
    %86 = arith.mulf %75, %85 : vector<160x128xf32>
    %cst_53 = arith.constant 0.000000e+00 : bf16
    %87 = vector.broadcast %cst_53 : bf16 to vector<10x1x128xbf16>
    %c0_54 = arith.constant 0 : index
    %c0_55 = arith.constant 0 : index
    %c0_56 = arith.constant 0 : index
    %88 = vector.load %arg13[%c0_54, %c0_55, %c0_56] : memref<10x18x128xbf16, #tpu.memory_space<vmem>>, vector<10x1x128xbf16>
    tpu.vector_store %arg13[%c0_54, %c0_55, %c0_56], %87 {strides = array<i32>} : memref<10x18x128xbf16, #tpu.memory_space<vmem>>, vector<10x1x128xbf16>,
    %c0_57 = arith.constant 0 : index
    %c17_58 = arith.constant 17 : index
    %c0_59 = arith.constant 0 : index
    %89 = vector.load %arg13[%c0_57, %c17_58, %c0_59] : memref<10x18x128xbf16, #tpu.memory_space<vmem>>, vector<10x1x128xbf16>
    tpu.vector_store %arg13[%c0_57, %c17_58, %c0_59], %87 {strides = array<i32>} : memref<10x18x128xbf16, #tpu.memory_space<vmem>>, vector<10x1x128xbf16>,
    %90 = vector.shape_cast %86 : vector<160x128xf32> to vector<10x16x128xf32>
    %91 = arith.truncf %90 : vector<10x16x128xf32> to vector<10x16x128xbf16>
    %c0_60 = arith.constant 0 : index
    %c1_61 = arith.constant 1 : index
    %c0_62 = arith.constant 0 : index
    %92 = vector.load %arg13[%c0_60, %c1_61, %c0_62] : memref<10x18x128xbf16, #tpu.memory_space<vmem>>, vector<10x16x128xbf16>
    tpu.vector_store %arg13[%c0_60, %c1_61, %c0_62], %91 {strides = array<i32>} : memref<10x18x128xbf16, #tpu.memory_space<vmem>>, vector<10x16x128xbf16>,
    %cst_63 = arith.constant 0.000000e+00 : bf16
    %93 = vector.broadcast %cst_63 : bf16 to vector<1x18x128xbf16>
    %c0_i32_64 = arith.constant 0 : i32
    %94 = arith.cmpi eq, %arg1, %c0_i32_64 : i32
    %95 = arith.extui %94 : i1 to i32
    %c0_i32_65 = arith.constant 0 : i32
    %96 = arith.cmpi ne, %95, %c0_i32_65 : i32
    scf.if %96 {
      %c0_117 = arith.constant 0 : index
      %c0_118 = arith.constant 0 : index
      %c0_119 = arith.constant 0 : index
      %162 = vector.load %arg13[%c0_117, %c0_118, %c0_119] : memref<10x18x128xbf16, #tpu.memory_space<vmem>>, vector<1x18x128xbf16>
      tpu.vector_store %arg13[%c0_117, %c0_118, %c0_119], %93 {strides = array<i32>} : memref<10x18x128xbf16, #tpu.memory_space<vmem>>, vector<1x18x128xbf16>,
    } else {
    }
    %c1_i32_66 = arith.constant 1 : i32
    %97 = arith.cmpi eq, %arg1, %c1_i32_66 : i32
    %98 = arith.extui %97 : i1 to i32
    %c0_i32_67 = arith.constant 0 : i32
    %99 = arith.cmpi ne, %98, %c0_i32_67 : i32
    scf.if %99 {
      %c9 = arith.constant 9 : index
      %c0_117 = arith.constant 0 : index
      %c0_118 = arith.constant 0 : index
      %162 = vector.load %arg13[%c9, %c0_117, %c0_118] : memref<10x18x128xbf16, #tpu.memory_space<vmem>>, vector<1x18x128xbf16>
      tpu.vector_store %arg13[%c9, %c0_117, %c0_118], %93 {strides = array<i32>} : memref<10x18x128xbf16, #tpu.memory_space<vmem>>, vector<1x18x128xbf16>,
    } else {
    }
    %cst_68 = arith.constant 0.000000e+00 : f32
    %100 = vector.broadcast %cst_68 : f32 to vector<128x128xf32>
    %c0_69 = arith.constant 0 : index
    %c0_70 = arith.constant 0 : index
    %c0_71 = arith.constant 0 : index
    %101 = vector.load %arg13[%c0_69, %c0_70, %c0_71] : memref<10x18x128xbf16, #tpu.memory_space<vmem>>, vector<8x18x128xbf16>
    %102 = vector.extract_strided_slice %101 {offsets = [0, 0, 0], sizes = [8, 16, 128], strides = [1, 1, 1]} : vector<8x18x128xbf16> to vector<8x16x128xbf16>
    %103 = vector.shape_cast %102 : vector<8x16x128xbf16> to vector<128x128xbf16>
    %c0_72 = arith.constant 0 : index
    %c0_73 = arith.constant 0 : index
    %104 = vector.load %arg8[%c0_72, %c0_73] : memref<1152x128xbf16, #tpu.memory_space<vmem>>, vector<128x128xbf16>
    %cst_74 = arith.constant dense<0.000000e+00> : vector<128x128xf32>
    %105 = tpu.matmul %103, %104, %cst_74 {dimension_numbers = #tpu.dot_dimension_numbers<[1], [0], [0], [1], [0, 0, 1, 1], [], []>} : vector<128x128xbf16>, vector<128x128xbf16>, vector<128x128xf32> -> vector<128x128xf32>
    %106 = arith.addf %100, %105 : vector<128x128xf32>
    %107 = vector.extract_strided_slice %101 {offsets = [0, 1, 0], sizes = [8, 16, 128], strides = [1, 1, 1]} : vector<8x18x128xbf16> to vector<8x16x128xbf16>
    %108 = vector.shape_cast %107 : vector<8x16x128xbf16> to vector<128x128xbf16>
    %c128_75 = arith.constant 128 : index
    %c0_76 = arith.constant 0 : index
    %109 = vector.load %arg8[%c128_75, %c0_76] : memref<1152x128xbf16, #tpu.memory_space<vmem>>, vector<128x128xbf16>
    %cst_77 = arith.constant dense<0.000000e+00> : vector<128x128xf32>
    %110 = tpu.matmul %108, %109, %cst_77 {dimension_numbers = #tpu.dot_dimension_numbers<[1], [0], [0], [1], [0, 0, 1, 1], [], []>} : vector<128x128xbf16>, vector<128x128xbf16>, vector<128x128xf32> -> vector<128x128xf32>
    %111 = arith.addf %106, %110 : vector<128x128xf32>
    %112 = vector.extract_strided_slice %101 {offsets = [0, 2, 0], sizes = [8, 16, 128], strides = [1, 1, 1]} : vector<8x18x128xbf16> to vector<8x16x128xbf16>
    %113 = vector.shape_cast %112 : vector<8x16x128xbf16> to vector<128x128xbf16>
    %c256_78 = arith.constant 256 : index
    %c0_79 = arith.constant 0 : index
    %114 = vector.load %arg8[%c256_78, %c0_79] : memref<1152x128xbf16, #tpu.memory_space<vmem>>, vector<128x128xbf16>
    %cst_80 = arith.constant dense<0.000000e+00> : vector<128x128xf32>
    %115 = tpu.matmul %113, %114, %cst_80 {dimension_numbers = #tpu.dot_dimension_numbers<[1], [0], [0], [1], [0, 0, 1, 1], [], []>} : vector<128x128xbf16>, vector<128x128xbf16>, vector<128x128xf32> -> vector<128x128xf32>
    %116 = arith.addf %111, %115 : vector<128x128xf32>
    %c1_81 = arith.constant 1 : index
    %c0_82 = arith.constant 0 : index
    %c0_83 = arith.constant 0 : index
    %117 = vector.load %arg13[%c1_81, %c0_82, %c0_83] : memref<10x18x128xbf16, #tpu.memory_space<vmem>>, vector<8x18x128xbf16>
    %118 = vector.extract_strided_slice %117 {offsets = [0, 0, 0], sizes = [8, 16, 128], strides = [1, 1, 1]} : vector<8x18x128xbf16> to vector<8x16x128xbf16>
    %119 = vector.shape_cast %118 : vector<8x16x128xbf16> to vector<128x128xbf16>
    %c384_84 = arith.constant 384 : index
    %c0_85 = arith.constant 0 : index
    %120 = vector.load %arg8[%c384_84, %c0_85] : memref<1152x128xbf16, #tpu.memory_space<vmem>>, vector<128x128xbf16>
    %cst_86 = arith.constant dense<0.000000e+00> : vector<128x128xf32>
    %121 = tpu.matmul %119, %120, %cst_86 {dimension_numbers = #tpu.dot_dimension_numbers<[1], [0], [0], [1], [0, 0, 1, 1], [], []>} : vector<128x128xbf16>, vector<128x128xbf16>, vector<128x128xf32> -> vector<128x128xf32>
    %122 = arith.addf %116, %121 : vector<128x128xf32>
    %123 = vector.extract_strided_slice %117 {offsets = [0, 1, 0], sizes = [8, 16, 128], strides = [1, 1, 1]} : vector<8x18x128xbf16> to vector<8x16x128xbf16>
    %124 = vector.shape_cast %123 : vector<8x16x128xbf16> to vector<128x128xbf16>
    %c512_87 = arith.constant 512 : index
    %c0_88 = arith.constant 0 : index
    %125 = vector.load %arg8[%c512_87, %c0_88] : memref<1152x128xbf16, #tpu.memory_space<vmem>>, vector<128x128xbf16>
    %cst_89 = arith.constant dense<0.000000e+00> : vector<128x128xf32>
    %126 = tpu.matmul %124, %125, %cst_89 {dimension_numbers = #tpu.dot_dimension_numbers<[1], [0], [0], [1], [0, 0, 1, 1], [], []>} : vector<128x128xbf16>, vector<128x128xbf16>, vector<128x128xf32> -> vector<128x128xf32>
    %127 = arith.addf %122, %126 : vector<128x128xf32>
    %128 = vector.extract_strided_slice %117 {offsets = [0, 2, 0], sizes = [8, 16, 128], strides = [1, 1, 1]} : vector<8x18x128xbf16> to vector<8x16x128xbf16>
    %129 = vector.shape_cast %128 : vector<8x16x128xbf16> to vector<128x128xbf16>
    %c640_90 = arith.constant 640 : index
    %c0_91 = arith.constant 0 : index
    %130 = vector.load %arg8[%c640_90, %c0_91] : memref<1152x128xbf16, #tpu.memory_space<vmem>>, vector<128x128xbf16>
    %cst_92 = arith.constant dense<0.000000e+00> : vector<128x128xf32>
    %131 = tpu.matmul %129, %130, %cst_92 {dimension_numbers = #tpu.dot_dimension_numbers<[1], [0], [0], [1], [0, 0, 1, 1], [], []>} : vector<128x128xbf16>, vector<128x128xbf16>, vector<128x128xf32> -> vector<128x128xf32>
    %132 = arith.addf %127, %131 : vector<128x128xf32>
    %c2_93 = arith.constant 2 : index
    %c0_94 = arith.constant 0 : index
    %c0_95 = arith.constant 0 : index
    %133 = vector.load %arg13[%c2_93, %c0_94, %c0_95] : memref<10x18x128xbf16, #tpu.memory_space<vmem>>, vector<8x18x128xbf16>
    %134 = vector.extract_strided_slice %133 {offsets = [0, 0, 0], sizes = [8, 16, 128], strides = [1, 1, 1]} : vector<8x18x128xbf16> to vector<8x16x128xbf16>
    %135 = vector.shape_cast %134 : vector<8x16x128xbf16> to vector<128x128xbf16>
    %c768_96 = arith.constant 768 : index
    %c0_97 = arith.constant 0 : index
    %136 = vector.load %arg8[%c768_96, %c0_97] : memref<1152x128xbf16, #tpu.memory_space<vmem>>, vector<128x128xbf16>
    %cst_98 = arith.constant dense<0.000000e+00> : vector<128x128xf32>
    %137 = tpu.matmul %135, %136, %cst_98 {dimension_numbers = #tpu.dot_dimension_numbers<[1], [0], [0], [1], [0, 0, 1, 1], [], []>} : vector<128x128xbf16>, vector<128x128xbf16>, vector<128x128xf32> -> vector<128x128xf32>
    %138 = arith.addf %132, %137 : vector<128x128xf32>
    %139 = vector.extract_strided_slice %133 {offsets = [0, 1, 0], sizes = [8, 16, 128], strides = [1, 1, 1]} : vector<8x18x128xbf16> to vector<8x16x128xbf16>
    %140 = vector.shape_cast %139 : vector<8x16x128xbf16> to vector<128x128xbf16>
    %c896_99 = arith.constant 896 : index
    %c0_100 = arith.constant 0 : index
    %141 = vector.load %arg8[%c896_99, %c0_100] : memref<1152x128xbf16, #tpu.memory_space<vmem>>, vector<128x128xbf16>
    %cst_101 = arith.constant dense<0.000000e+00> : vector<128x128xf32>
    %142 = tpu.matmul %140, %141, %cst_101 {dimension_numbers = #tpu.dot_dimension_numbers<[1], [0], [0], [1], [0, 0, 1, 1], [], []>} : vector<128x128xbf16>, vector<128x128xbf16>, vector<128x128xf32> -> vector<128x128xf32>
    %143 = arith.addf %138, %142 : vector<128x128xf32>
    %144 = vector.extract_strided_slice %133 {offsets = [0, 2, 0], sizes = [8, 16, 128], strides = [1, 1, 1]} : vector<8x18x128xbf16> to vector<8x16x128xbf16>
    %145 = vector.shape_cast %144 : vector<8x16x128xbf16> to vector<128x128xbf16>
    %c1024_102 = arith.constant 1024 : index
    %c0_103 = arith.constant 0 : index
    %146 = vector.load %arg8[%c1024_102, %c0_103] : memref<1152x128xbf16, #tpu.memory_space<vmem>>, vector<128x128xbf16>
    %cst_104 = arith.constant dense<0.000000e+00> : vector<128x128xf32>
    %147 = tpu.matmul %145, %146, %cst_104 {dimension_numbers = #tpu.dot_dimension_numbers<[1], [0], [0], [1], [0, 0, 1, 1], [], []>} : vector<128x128xbf16>, vector<128x128xbf16>, vector<128x128xf32> -> vector<128x128xf32>
    %148 = arith.addf %143, %147 : vector<128x128xf32>
    %c0_105 = arith.constant 0 : index
    %c0_106 = arith.constant 0 : index
    %149 = vector.load %arg9[%c0_105, %c0_106] : memref<1x128xf32, #tpu.memory_space<vmem>>, vector<1x128xf32>
    %150 = vector.broadcast %149 : vector<1x128xf32> to vector<128x128xf32>
    %151 = arith.mulf %148, %150 : vector<128x128xf32>
    %c0_107 = arith.constant 0 : index
    %c0_108 = arith.constant 0 : index
    %152 = vector.load %arg10[%c0_107, %c0_108] : memref<1x128xf32, #tpu.memory_space<vmem>>, vector<1x128xf32>
    %153 = vector.broadcast %152 : vector<1x128xf32> to vector<128x128xf32>
    %154 = arith.addf %151, %153 : vector<128x128xf32>
    %c0_109 = arith.constant 0 : index
    %c0_110 = arith.constant 0 : index
    %c0_111 = arith.constant 0 : index
    %c0_112 = arith.constant 0 : index
    %155 = vector.load %arg2[%c0_109, %c0_110, %c0_111, %c0_112] : memref<1x8x16x128xbf16, #tpu.memory_space<vmem>>, vector<1x8x16x128xbf16>
    %156 = vector.shape_cast %155 : vector<1x8x16x128xbf16> to vector<8x16x128xbf16>
    %157 = arith.extf %156 : vector<8x16x128xbf16> to vector<8x16x128xf32>
    %158 = vector.shape_cast %157 : vector<8x16x128xf32> to vector<128x128xf32>
    %159 = arith.addf %158, %154 : vector<128x128xf32>
    %160 = vector.shape_cast %159 : vector<128x128xf32> to vector<1x8x16x128xf32>
    %c0_113 = arith.constant 0 : index
    %c0_114 = arith.constant 0 : index
    %c0_115 = arith.constant 0 : index
    %c0_116 = arith.constant 0 : index
    %161 = vector.load %arg11[%c0_113, %c0_114, %c0_115, %c0_116] : memref<1x8x16x128xf32, #tpu.memory_space<vmem>>, vector<1x8x16x128xf32>
    tpu.vector_store %arg11[%c0_113, %c0_114, %c0_115, %c0_116], %160 {strides = array<i32>} : memref<1x8x16x128xf32, #tpu.memory_space<vmem>>, vector<1x8x16x128xf32>,
    return
  }
  func.func @transform_0(%arg0: i32, %arg1: i32) -> (i32, i32, i32, i32) {
    %c0_i32 = arith.constant 0 : i32
    %c0_i32_0 = arith.constant 0 : i32
    %c0_i32_1 = arith.constant 0 : i32
    return %arg0, %arg1, %c0_i32, %c0_i32_0 : i32, i32, i32, i32
  }
  func.func @transform_1(%arg0: i32, %arg1: i32) -> (i32, i32, i32, i32) {
    %c4_i32 = arith.constant 4 : i32
    %0 = arith.muli %arg1, %c4_i32 : i32
    %c1_i32 = arith.constant 1 : i32
    %1 = arith.subi %0, %c1_i32 : i32
    %c0_i32 = arith.constant 0 : i32
    %2 = arith.maxsi %1, %c0_i32 : i32
    %c0_i32_0 = arith.constant 0 : i32
    %c0_i32_1 = arith.constant 0 : i32
    %c0_i32_2 = arith.constant 0 : i32
    return %arg0, %2, %c0_i32_0, %c0_i32_1 : i32, i32, i32, i32
  }
  func.func @transform_2(%arg0: i32, %arg1: i32) -> (i32, i32, i32, i32) {
    %c1_i32 = arith.constant 1 : i32
    %0 = arith.addi %arg1, %c1_i32 : i32
    %c4_i32 = arith.constant 4 : i32
    %1 = arith.muli %0, %c4_i32 : i32
    %c7_i32 = arith.constant 7 : i32
    %2 = arith.minsi %1, %c7_i32 : i32
    %c0_i32 = arith.constant 0 : i32
    %c0_i32_0 = arith.constant 0 : i32
    %c0_i32_1 = arith.constant 0 : i32
    return %arg0, %2, %c0_i32, %c0_i32_0 : i32, i32, i32, i32
  }
  func.func @transform_3(%arg0: i32, %arg1: i32) -> (i32, i32) {
    %c0_i32 = arith.constant 0 : i32
    %c0_i32_0 = arith.constant 0 : i32
    %c0_i32_1 = arith.constant 0 : i32
    return %c0_i32, %c0_i32_0 : i32, i32
  }
  func.func @transform_4(%arg0: i32, %arg1: i32) -> (i32, i32) {
    %c0_i32 = arith.constant 0 : i32
    %c0_i32_0 = arith.constant 0 : i32
    %c0_i32_1 = arith.constant 0 : i32
    return %c0_i32, %c0_i32_0 : i32, i32
  }
  func.func @transform_5(%arg0: i32, %arg1: i32) -> (i32, i32) {
    %c0_i32 = arith.constant 0 : i32
    %c0_i32_0 = arith.constant 0 : i32
    %c0_i32_1 = arith.constant 0 : i32
    return %c0_i32, %c0_i32_0 : i32, i32
  }
  func.func @transform_6(%arg0: i32, %arg1: i32) -> (i32, i32) {
    %c0_i32 = arith.constant 0 : i32
    %c0_i32_0 = arith.constant 0 : i32
    %c0_i32_1 = arith.constant 0 : i32
    return %c0_i32, %c0_i32_0 : i32, i32
  }
  func.func @transform_7(%arg0: i32, %arg1: i32) -> (i32, i32) {
    %c0_i32 = arith.constant 0 : i32
    %c0_i32_0 = arith.constant 0 : i32
    %c0_i32_1 = arith.constant 0 : i32
    return %c0_i32, %c0_i32_0 : i32, i32
  }
  func.func @transform_8(%arg0: i32, %arg1: i32) -> (i32, i32) {
    %c0_i32 = arith.constant 0 : i32
    %c0_i32_0 = arith.constant 0 : i32
    %c0_i32_1 = arith.constant 0 : i32
    return %c0_i32, %c0_i32_0 : i32, i32
  }
  func.func @transform_9(%arg0: i32, %arg1: i32) -> (i32, i32, i32, i32) {
    %c0_i32 = arith.constant 0 : i32
    %c0_i32_0 = arith.constant 0 : i32
    %c0_i32_1 = arith.constant 0 : i32
    return %arg0, %arg1, %c0_i32, %c0_i32_0 : i32, i32, i32, i32
  }
}

</mosaic_0001>

<bundles_post_ra>
// kernel: conv_block_forward.1
= control target key start
LH: loop header
LB: loop body
LE: loop exit
PB: predicated region body
PF: predicated region fallthrough
CT: control target
= control target key end

     0   :  { %s9606_s30 = smov 0   ;;  %s9608_s10 = smov 0   ;;  %s12884_s0 = inlined_call_operand.vmem [shape: bf16[2,16,16,128], index: 0, kind: input, shape index: {}, may-alias: {0,1,2}]   ;;  %s12885_s1 = inlined_call_operand.vmem [shape: bf16[2,16,16,128], index: 1, kind: input, shape index: {}, may-alias: {0,1,2}]   ;;  %s12886_s2 = inlined_call_operand.vmem [shape: bf16[2,16,16,128], index: 2, kind: input, shape index: {}, may-alias: {0,1,2}]   ;;  %s12887_s3 = inlined_call_operand.vmem [shape: bf16[1152,128], index: 3, kind: input, shape index: {}]   ;;  %s12888_s4 = inlined_call_operand.vmem [shape: f32[1,128], index: 4, kind: input, shape index: {}]   ;;  %s12889_s5 = inlined_call_operand.vmem [shape: f32[1,128], index: 5, kind: input, shape index: {}]   ;;  %s12890_s6 = inlined_call_operand.vmem [shape: bf16[1152,128], index: 6, kind: input, shape index: {}]   ;;  %s12891_s7 = inlined_call_operand.vmem [shape: f32[1,128], index: 7, kind: input, shape index: {}]   ;;  %s12892_s8 = inlined_call_operand.vmem [shape: f32[1,128], index: 8, kind: input, shape index: {}]   ;;  %s12893_s9 = inlined_call_operand.vmem [shape: f32[2,16,16,128], index: 9, kind: output, shape index: {}]  }
   0x1   :  { %s9610_s11 = smov 0   ;;  %s9612_s12 = smov 0  }
   0x2   :  { %s9614_s13 = smov 0  }
   0x3 LB: > { %s28_s14 = sadd.s32 1, %s9542_s11  ;;  %s31_s15 = sadd.s32 1, %s9546_s12  ;;  %s9550_s13 = sphi %s9614_s13, %s19_s13   ;;  %s9546_s12 = sphi %s9612_s12, %s13026_s12   ;;  %s9542_s11 = sphi %s9610_s11, %s13025_s11   ;;  %s9538_s10 = sphi %s9608_s10, %s13024_s10   ;;  %s9534_s30 = sphi %s9606_s30, %s13023_s30  }
   0x4   : > { %p29_p0 = scmp.ge.s32.totalorder %s28_s14, 2  ;;  %p7835_p1 = scmp.ge.s32.totalorder %s9550_s13, 1 }
   0x5   : > { %p377_p2 = scmp.lt.s32.totalorder %s9550_s13, 5 }
   0x6   : > { %s13028_s14 = smov (%p29_p0, %s28_s14), 0  ;;  %s13030_s15 = smov (!%p29_p0, %s31_s15), %s9546_s12 }
   0x7   : > { %p378_p3 = pnand %p7835_p1, %p377_p2  ;;  %p33_p4 = scmp.ge.s32.totalorder %s13030_s15, 2 }
   0x9   : > { %s13032_s15 = smov (%p33_p4, %s13030_s15), 0  ;;  %381 = sbr.rel (%p378_p3) target bundleno = 1050 (0x41a), region = 56 }
   0xe   : > { %vm512_vm0 = vcmask 1040384   ;;  %vm513_vm1 = vsmask.f32 256  ;;  %v521_v0 = vld [vmem:[#allocation2 + $0x18] sm:$0x1]  ;;  %s7836_s16 = sshll.u32 %s9534_s30, 3 }
   0xf   : > { %vm9643_vm2 = vmand %vm512_vm0, %vm513_vm1  ;;  %v12904_v1 = vmov 0  ;;  %v524_v2 = vld [vmem:[#allocation2 + $0x24] sm:$0x1]  ;;  %v527_v3 = vld [vmem:[#allocation2 + $0x30] sm:$0x1]  ;;  %p452_p5 = scmp.lt.s32.totalorder %s9538_s10, 1 }
  0x10   : > { %v12905_v1 = vsel %vm9643_vm2, 4294967295, %v12904_v1  ;;  %vm551_vm3 = vsmask.f32 7938  ;;  %v522_v4 = vsel %vm9643_vm2, 0, %v521_v0  ;;  %v525_v5 = vsel %vm9643_vm2, 0, %v524_v2  ;;  %p9664_p6 = scmp.lt.s32.totalorder %s7836_s16, 15 }
  0x11   : > { %12906 = vst [vmem:[#allocation4_spill] sm:$0xff] %v12905_v1  ;;  %v528_v6 = vsel %vm9643_vm2, 0, %v527_v3  ;;  %v530_v7 = vld [vmem:[#allocation2 + $0x3c] sm:$0x1]  ;;  %523 = vst [vmem:[#allocation2 + $0x18] sm:$0x1] %v522_v4 }
  0x12   : > { %526 = vst [vmem:[#allocation2 + $0x24] sm:$0x1] %v525_v5  ;;  %529 = vst [vmem:[#allocation2 + $0x30] sm:$0x1] %v528_v6  ;;  %v531_v8 = vsel %vm9643_vm2, 0, %v530_v7  ;;  %s13034_s10 = smov (!%p452_p5, %s9538_s10), 1 }
  0x13   : > { %v533_v9 = vld [vmem:[#allocation2 + $0x48] sm:$0x1]  ;;  %v536_v10 = vld [vmem:[#allocation2 + $0x54] sm:$0x1]  ;;  %vm9658_vm4 = vmand %vm512_vm0, %vm551_vm3  ;;  %532 = vst [vmem:[#allocation2 + $0x3c] sm:$0x1] %v531_v8 }
  0x14   : > { %v534_v12 = vsel %vm9643_vm2, 0, %v533_v9  ;;  %v537_v13 = vsel %vm9643_vm2, 0, %v536_v10  ;;  %v539_v14 = vld [vmem:[#allocation2 + $0x60] sm:$0x1]  ;;  %v542_v15 = vld [vmem:[#allocation2 + $0x6c] sm:$0x1] }
  0x15   : > { %535 = vst [vmem:[#allocation2 + $0x48] sm:$0x1] %v534_v12  ;;  %538 = vst [vmem:[#allocation2 + $0x54] sm:$0x1] %v537_v13  ;;  %v540_v16 = vsel %vm9643_vm2, 0, %v539_v14  ;;  %v543_v17 = vsel %vm9643_vm2, 0, %v542_v15 }
  0x16   : > { %v559_v18 = vld [vmem:[#allocation2 + $0x20] sm:$0x1]  ;;  %v562_v19 = vld [vmem:[#allocation2 + $0x2c] sm:$0x1]  ;;  %541 = vst [vmem:[#allocation2 + $0x60] sm:$0x1] %v540_v16 }
  0x17   : > { %544 = vst [vmem:[#allocation2 + $0x6c] sm:$0x1] %v543_v17  ;;  %v560_v20 = vsel %vm9658_vm4, 0, %v559_v18  ;;  %v563_v21 = vsel %vm9658_vm4, 0, %v562_v19  ;;  %v565_v22 = vld [vmem:[#allocation2 + $0x38] sm:$0x1] }
  0x18   : > { %v568_v23 = vld [vmem:[#allocation2 + $0x44] sm:$0x1]  ;;  %561 = vst [vmem:[#allocation2 + $0x20] sm:$0x1] %v560_v20  ;;  %564 = vst [vmem:[#allocation2 + $0x2c] sm:$0x1] %v563_v21 }
  0x19   : > { %v566_v24 = vsel %vm9658_vm4, 0, %v565_v22  ;;  %v569_v25 = vsel %vm9658_vm4, 0, %v568_v23  ;;  %v571_v26 = vld [vmem:[#allocation2 + $0x50] sm:$0x1]  ;;  %v574_v27 = vld [vmem:[#allocation2 + $0x5c] sm:$0x1] }
  0x1a   : > { %567 = vst [vmem:[#allocation2 + $0x38] sm:$0x1] %v566_v24  ;;  %570 = vst [vmem:[#allocation2 + $0x44] sm:$0x1] %v569_v25  ;;  %v572_v28 = vsel %vm9658_vm4, 0, %v571_v26  ;;  %v575_v29 = vsel %vm9658_vm4, 0, %v574_v27 }
  0x1b   : > { %v577_v30 = vld [vmem:[#allocation2 + $0x68] sm:$0x1]  ;;  %v580_v31 = vld [vmem:[#allocation2 + $0x74] sm:$0x1]  ;;  %573 = vst [vmem:[#allocation2 + $0x50] sm:$0x1] %v572_v28 }
  0x1c   : > { %576 = vst [vmem:[#allocation2 + $0x5c] sm:$0x1] %v575_v29  ;;  %v578_v32 = vsel %vm9658_vm4, 0, %v577_v30  ;;  %v581_v33 = vsel %vm9658_vm4, 0, %v580_v31  ;;  %v515_v34 = vld [vmem:[#allocation2] sm:$0x1] }
  0x1d   : > { %v518_v35 = vld [vmem:[#allocation2 + $0xc] sm:$0x1]  ;;  %579 = vst [vmem:[#allocation2 + $0x68] sm:$0x1] %v578_v32  ;;  %582 = vst [vmem:[#allocation2 + $0x74] sm:$0x1] %v581_v33 }
  0x1e   : > { %v516_v36 = vsel %vm9643_vm2, 0, %v515_v34  ;;  %v519_v37 = vsel %vm9643_vm2, 0, %v518_v35  ;;  %v545_v38 = vld [vmem:[#allocation2 + $0x78] sm:$0x1]  ;;  %v548_v39 = vld [vmem:[#allocation2 + $0x84] sm:$0x1] }
  0x1f   : > { %517 = vst [vmem:[#allocation2] sm:$0x1] %v516_v36  ;;  %520 = vst [vmem:[#allocation2 + $0xc] sm:$0x1] %v519_v37  ;;  %v546_v40 = vsel %vm9643_vm2, 0, %v545_v38  ;;  %v549_v41 = vsel %vm9643_vm2, 0, %v548_v39 }
  0x20   : > { %v553_v42 = vld [vmem:[#allocation2 + $0x8] sm:$0x1]  ;;  %v556_v43 = vld [vmem:[#allocation2 + $0x14] sm:$0x1]  ;;  %547 = vst [vmem:[#allocation2 + $0x78] sm:$0x1] %v546_v40 }
  0x21   : > { %550 = vst [vmem:[#allocation2 + $0x84] sm:$0x1] %v549_v41  ;;  %v554_v44 = vsel %vm9658_vm4, 0, %v553_v42  ;;  %v557_v45 = vsel %vm9658_vm4, 0, %v556_v43  ;;  %v583_v46 = vld [vmem:[#allocation2 + $0x80] sm:$0x1] }
  0x22   : > { %v586_v47 = vld [vmem:[#allocation2 + $0x8c] sm:$0x1]  ;;  %555 = vst [vmem:[#allocation2 + $0x8] sm:$0x1] %v554_v44  ;;  %558 = vst [vmem:[#allocation2 + $0x14] sm:$0x1] %v557_v45 }
  0x23   : > { %v584_v48 = vsel %vm9658_vm4, 0, %v583_v46  ;;  %v587_v49 = vsel %vm9658_vm4, 0, %v586_v47  ;;  %s13036_s16 = smov (!%p9664_p6, %s7836_s16), 15  ;;  %s9715_s18 = sshll.u32 %s13034_s10, 5  ;;  %vm605_vm5 = vsmask.f32 4368 }
  0x24   : > { %585 = vst [vmem:[#allocation2 + $0x80] sm:$0x1] %v584_v48  ;;  %588 = vst [vmem:[#allocation2 + $0x8c] sm:$0x1] %v587_v49  ;;  %s7840_s19 = sshll.u32 %s9534_s30, 2  ;;  %s7837_s20 = sshll.u32 %s13036_s16, 1 }
  0x25   : > { %s7841_s21 = sadd.s32 4294967295, %s7840_s19  ;;  %s9719_s22 = sadd.s32 %s9715_s18, %s7837_s20  ;;  %vm768_vm6 = vcmask 1043456   ;;  %v770_v56 = vld [vmem:[#allocation2 + $0x18] sm:$0xf]  ;;  %v774_v57 = vld [vmem:[#allocation2 + $0x20] sm:$0x1]  ;;  %vm9752_vm8 = vmor %vm513_vm1, %vm605_vm5 }
  0x26   : > { %p464_p7 = scmp.gt.s32.totalorder %s7841_s21, 0  ;;  %s7839_s23 = sshll.u32 %s9719_s22, 2  ;;  %vm9737_vm7 = vmand %vm768_vm6, %vm551_vm3  ;;  %v12910_v61 = vmov 0  ;;  %v12914_v0 = vmov 0  ;;  %v777_v10 = vld [vmem:[#allocation2 + $0x24] sm:$0xf] }
  0x27   : > { %s8252_s24 = sadd.s32 4, %s7840_s19  ;;  %s9725_s27 = scalar_lea.vmem %s12884_s0, %s7839_s23  ;;  %v12911_v61 = vsel %vm9737_vm7, 4294967295, %v12910_v61  ;;  %v12915_v0 = vsel %vm9752_vm8, 4294967295, %v12914_v0  ;;  %v781_v12 = vld [vmem:[#allocation2 + $0x2c] sm:$0x1] }
  0x28   : > { %p483_p8 = scmp.lt.s32.totalorder %s8252_s24, 7  ;;  %s13038_s21 = smov (!%p464_p7, %s7841_s21), 0  ;;  %v589_v50 = vld [vmem:[%s9725_s27] sm:$0xf]  ;;  %v590_v51 = vld [vmem:[%s9725_s27 + $0x4] sm:$0xf] }
  0x29   : > { %v608_v52 = vshrl.u32 %v589_v50, 16  ;;  %v611_v53 = vshll.u32 %v589_v50, 16  ;;  %v616_v54 = vshrl.u32 %v590_v51, 16  ;;  %v619_v55 = vshll.u32 %v590_v51, 16  ;;  %s7842_s28 = sshll.u32 %s13038_s21, 1  ;;  %s7854_s29 = sshll.u32 %s9719_s22, 3 }
  0x2a   : > { %s13040_s24 = smov (!%p483_p8, %s8252_s24), 7  ;;  %v591_v58 = vld [vmem:[%s9725_s27 + $0x8] sm:$0xf]  ;;  %v592_v59 = vld [vmem:[%s9725_s27 + $0xc] sm:$0xf]  ;;  %p469_p9 = scmp.lt.s32.totalorder %s7842_s28, 15 }
  0x2b   : > { %s7847_s10 = sshll.u32 %s13040_s24, 1  ;;  %v610_v60 = vrot.slane %v608_v52, 7  ;;  %12912 = vst [vmem:[#allocation5_spill] sm:$0xff] %v12911_v61  ;;  %v618_v62 = vrot.slane %v616_v54, 7  ;;  %v625_v63 = vshrl.u32 %v591_v58, 16  ;;  %s9748_s20 = scalar_lea.vmem %s12893_s9, %s7854_s29  ;;  %12916 = vst [vmem:[#allocation6_spill] sm:$0xff] %v12915_v0 }
  0x2c   : > { %p9741_p10 = scmp.lt.s32.totalorder %s7847_s10, 15  ;;  %v628_v2 = vshll.u32 %v591_v58, 16  ;;  %v633_v3 = vshrl.u32 %v592_v59, 16  ;;  %v636_v4 = vshll.u32 %v592_v59, 16  ;;  %v593_v5 = vld [vmem:[%s9725_s27 + $0x10] sm:$0xf] }
  0x2d   : > { %s13042_s28 = smov (!%p469_p9, %s7842_s28), 15  ;;  %v613_v6 = vor.u32 %v611_v53, %v610_v60  ;;  %v614_v7 = vrot.slane %v610_v60, 4  ;;  %v621_v8 = vor.u32 %v619_v55, %v618_v62  ;;  %v623_v9 = vrot.slane %v618_v62, 4  ;;  %v594_v13 = vld [vmem:[%s9725_s27 + $0x14] sm:$0xf]  ;;  %p7855_p11 = scmp.le.s32.totalorder %s9534_s30, 0 }
  0x2e   : > { %s13044_s10 = smov (!%p9741_p10, %s7847_s10), 15  ;;  %v627_v14 = vrot.slane %v625_v63, 7  ;;  %v635_v15 = vrot.slane %v633_v3, 7  ;;  %v642_v16 = vshrl.u32 %v593_v5, 16  ;;  %v645_v17 = vshll.u32 %v593_v5, 16  ;;  %s7843_s21 = sshll.u32 %s13042_s28, 1 }
  0x2f   : > { %v771_v18 = vsel %vm9737_vm7, %v613_v6, %v770_v56  ;;  %v622_v19 = vsel %vm9752_vm8, %v614_v7, %v621_v8  ;;  %v775_v20 = vsel %vm9643_vm2, %v623_v9, %v774_v57  ;;  %v650_v21 = vshrl.u32 %v594_v13, 16  ;;  %v595_v22 = vld [vmem:[%s9725_s27 + $0x18] sm:$0xf]  ;;  %v596_v23 = vld [vmem:[%s9725_s27 + $0x1c] sm:$0xf]  ;;  %s473_s22 = sadd.s32 %s7843_s21, %s9715_s18  ;;  %s7848_s23 = sshll.u32 %s13044_s10, 1 }
  0x30   : > { %772 = vst [vmem:[#allocation2 + $0x18] sm:$0xf] %v771_v18  ;;  %773 = vst [vmem:[#allocation2 + $0x1c] sm:$0xf] %v622_v19  ;;  %v630_v24 = vor.u32 %v628_v2, %v627_v14  ;;  %v631_v25 = vrot.slane %v627_v14, 4  ;;  %v638_v26 = vor.u32 %v636_v4, %v635_v15  ;;  %v640_v27 = vrot.slane %v635_v15, 4  ;;  %s492_s25 = sadd.s32 %s7848_s23, %s9715_s18 }
  0x31   : > { %776 = vst [vmem:[#allocation2 + $0x20] sm:$0x1] %v775_v20  ;;  %v597_v28 = vld [vmem:[%s9725_s27 + $0x20] sm:$0xf]  ;;  %s7845_s24 = sshll.u32 %s473_s22, 2  ;;  %v644_v29 = vrot.slane %v642_v16, 7 }
  0x32   : > { %v652_v30 = vrot.slane %v650_v21, 7  ;;  %v653_v31 = vshll.u32 %v594_v13, 16  ;;  %v659_v32 = vshrl.u32 %v595_v22, 16  ;;  %s9774_s29 = scalar_lea.vmem %s12885_s1, %s7845_s24  ;;  %s7850_s10 = sshll.u32 %s492_s25, 2  ;;  %v778_v33 = vsel %vm9737_vm7, %v630_v24, %v777_v10  ;;  %v784_v36 = vld [vmem:[#allocation2 + $0x30] sm:$0xf] }
  0x33   : > { %v639_v34 = vsel %vm9752_vm8, %v631_v25, %v638_v26  ;;  %v782_v35 = vsel %vm9643_vm2, %v640_v27, %v781_v12  ;;  %v788_v37 = vld [vmem:[#allocation2 + $0x38] sm:$0x1]  ;;  %v662_v38 = vshll.u32 %v595_v22, 16  ;;  %s9785_s17 = scalar_lea.vmem %s12886_s2, %s7850_s10  ;;  %779 = vst [vmem:[#allocation2 + $0x24] sm:$0xf] %v778_v33  ;;  %v647_v39 = vor.u32 %v645_v17, %v644_v29 }
  0x34   : > { %780 = vst [vmem:[#allocation2 + $0x28] sm:$0xf] %v639_v34  ;;  %783 = vst [vmem:[#allocation2 + $0x2c] sm:$0x1] %v782_v35  ;;  %v648_v40 = vrot.slane %v644_v29, 4  ;;  %v655_v41 = vor.u32 %v653_v31, %v652_v30  ;;  %v657_v42 = vrot.slane %v652_v30, 4 }
  0x35   : > { %v598_v43 = vld [vmem:[%s9725_s27 + $0x24] sm:$0xf]  ;;  %v661_v44 = vrot.slane %v659_v32, 7  ;;  %v667_v45 = vshrl.u32 %v596_v23, 16  ;;  %v670_v46 = vshll.u32 %v596_v23, 16  ;;  %v676_v47 = vshrl.u32 %v597_v28, 16 }
  0x36   : > { %v599_v48 = vld [vmem:[%s9725_s27 + $0x28] sm:$0xf]  ;;  %v785_v49 = vsel %vm9737_vm7, %v647_v39, %v784_v36  ;;  %v656_v50 = vsel %vm9752_vm8, %v648_v40, %v655_v41  ;;  %v789_v51 = vsel %vm9643_vm2, %v657_v42, %v788_v37  ;;  %v791_v52 = vld [vmem:[#allocation2 + $0x3c] sm:$0xf]  ;;  %v795_v53 = vld [vmem:[#allocation2 + $0x44] sm:$0x1] }
  0x37   : > { %v679_v54 = vshll.u32 %v597_v28, 16  ;;  %786 = vst [vmem:[#allocation2 + $0x30] sm:$0xf] %v785_v49  ;;  %787 = vst [vmem:[#allocation2 + $0x34] sm:$0xf] %v656_v50  ;;  %v664_v55 = vor.u32 %v662_v38, %v661_v44  ;;  %v665_v56 = vrot.slane %v661_v44, 4 }
  0x38   : > { %790 = vst [vmem:[#allocation2 + $0x38] sm:$0x1] %v789_v51  ;;  %v669_v57 = vrot.slane %v667_v45, 7  ;;  %v678_v58 = vrot.slane %v676_v47, 7  ;;  %v600_v59 = vld [vmem:[%s9725_s27 + $0x2c] sm:$0xf] }
  0x39   : > { %v798_v60 = vld [vmem:[#allocation2 + $0x48] sm:$0xf]  ;;  %v684_v62 = vshrl.u32 %v598_v43, 16  ;;  %v687_v63 = vshll.u32 %v598_v43, 16  ;;  %v693_v2 = vshrl.u32 %v599_v48, 16  ;;  %v696_v3 = vshll.u32 %v599_v48, 16 }
  0x3a   : > { %v792_v4 = vsel %vm9737_vm7, %v664_v55, %v791_v52  ;;  %v672_v5 = vor.u32 %v670_v46, %v669_v57  ;;  %v674_v6 = vrot.slane %v669_v57, 4  ;;  %v681_v7 = vor.u32 %v679_v54, %v678_v58  ;;  %v601_v8 = vld [vmem:[%s9725_s27 + $0x30] sm:$0xf]  ;;  %v602_v14 = vld [vmem:[%s9725_s27 + $0x34] sm:$0xf] }
  0x3b   : > { %793 = vst [vmem:[#allocation2 + $0x3c] sm:$0xf] %v792_v4  ;;  %v682_v9 = vrot.slane %v678_v58, 4  ;;  %v686_v10 = vrot.slane %v684_v62, 7  ;;  %v695_v12 = vrot.slane %v693_v2, 7  ;;  %v701_v13 = vshrl.u32 %v600_v59, 16 }
  0x3c   : > { %v673_v15 = vsel %vm9752_vm8, %v665_v56, %v672_v5  ;;  %v796_v16 = vsel %vm9643_vm2, %v674_v6, %v795_v53  ;;  %v799_v17 = vsel %vm9737_vm7, %v681_v7, %v798_v60  ;;  %v802_v18 = vld [vmem:[#allocation2 + $0x50] sm:$0x1]  ;;  %v805_v19 = vld [vmem:[#allocation2 + $0x54] sm:$0xf]  ;;  %v704_v20 = vshll.u32 %v600_v59, 16 }
  0x3d   : > { %794 = vst [vmem:[#allocation2 + $0x40] sm:$0xf] %v673_v15  ;;  %797 = vst [vmem:[#allocation2 + $0x44] sm:$0x1] %v796_v16  ;;  %v689_v21 = vor.u32 %v687_v63, %v686_v10  ;;  %v691_v22 = vrot.slane %v686_v10, 4  ;;  %v698_v23 = vor.u32 %v696_v3, %v695_v12  ;;  %v699_v24 = vrot.slane %v695_v12, 4 }
  0x3e   : > { %800 = vst [vmem:[#allocation2 + $0x48] sm:$0xf] %v799_v17  ;;  %v603_v25 = vld [vmem:[%s9725_s27 + $0x38] sm:$0xf]  ;;  %v703_v26 = vrot.slane %v701_v13, 7  ;;  %v710_v27 = vshrl.u32 %v601_v8, 16 }
  0x3f   : > { %v713_v28 = vshll.u32 %v601_v8, 16  ;;  %v718_v29 = vshrl.u32 %v602_v14, 16  ;;  %v604_v30 = vld [vmem:[%s9725_s27 + $0x3c] sm:$0xf]  ;;  %v690_v31 = vsel %vm9752_vm8, %v682_v9, %v689_v21  ;;  %v803_v32 = vsel %vm9643_vm2, %v691_v22, %v802_v18  ;;  %v812_v40 = vld [vmem:[#allocation2 + $0x60] sm:$0xf] }
  0x40   : > { %v806_v33 = vsel %vm9737_vm7, %v698_v23, %v805_v19  ;;  %v809_v34 = vld [vmem:[#allocation2 + $0x5c] sm:$0x1]  ;;  %v721_v35 = vshll.u32 %v602_v14, 16  ;;  %801 = vst [vmem:[#allocation2 + $0x4c] sm:$0xf] %v690_v31  ;;  %v706_v36 = vor.u32 %v704_v20, %v703_v26  ;;  %v708_v37 = vrot.slane %v703_v26, 4 }
  0x41   : > { %804 = vst [vmem:[#allocation2 + $0x50] sm:$0x1] %v803_v32  ;;  %807 = vst [vmem:[#allocation2 + $0x54] sm:$0xf] %v806_v33  ;;  %v712_v38 = vrot.slane %v710_v27, 7  ;;  %v720_v39 = vrot.slane %v718_v29, 7 }
  0x42   : > { %v727_v41 = vshrl.u32 %v603_v25, 16  ;;  %v730_v42 = vshll.u32 %v603_v25, 16  ;;  %v735_v43 = vshrl.u32 %v604_v30, 16  ;;  %v738_v44 = vshll.u32 %v604_v30, 16  ;;  %v816_v49 = vld [vmem:[#allocation2 + $0x68] sm:$0x1] }
  0x43   : > { %v707_v45 = vsel %vm9752_vm8, %v699_v24, %v706_v36  ;;  %v810_v46 = vsel %vm9643_vm2, %v708_v37, %v809_v34  ;;  %v715_v47 = vor.u32 %v713_v28, %v712_v38  ;;  %v716_v48 = vrot.slane %v712_v38, 4  ;;  %v819_v55 = vld [vmem:[#allocation2 + $0x6c] sm:$0xf]  ;;  %v823_v60 = vld [vmem:[#allocation2 + $0x74] sm:$0x1] }
  0x44   : > { %808 = vst [vmem:[#allocation2 + $0x58] sm:$0xf] %v707_v45  ;;  %811 = vst [vmem:[#allocation2 + $0x5c] sm:$0x1] %v810_v46  ;;  %v723_v50 = vor.u32 %v721_v35, %v720_v39  ;;  %v725_v51 = vrot.slane %v720_v39, 4  ;;  %v729_v52 = vrot.slane %v727_v41, 7 }
  0x45   : > { %v737_v53 = vrot.slane %v735_v43, 7  ;;  %v813_v54 = vsel %vm9737_vm7, %v715_v47, %v812_v40 }
  0x46   : > { %814 = vst [vmem:[#allocation2 + $0x60] sm:$0xf] %v813_v54  ;;  %v724_v56 = vsel %vm9752_vm8, %v716_v48, %v723_v50  ;;  %v817_v57 = vsel %vm9643_vm2, %v725_v51, %v816_v49  ;;  %v732_v58 = vor.u32 %v730_v42, %v729_v52  ;;  %v733_v59 = vrot.slane %v729_v52, 4  ;;  %829 = sbr.rel (%p7855_p11) target bundleno = 87 (0x57), region = 60 }
  0x47   : > { %815 = vst [vmem:[#allocation2 + $0x64] sm:$0xf] %v724_v56  ;;  %818 = vst [vmem:[#allocation2 + $0x68] sm:$0x1] %v817_v57  ;;  %v740_v62 = vor.u32 %v738_v44, %v737_v53  ;;  %v742_v63 = vrot.slane %v737_v53, 4 }
  0x48   : > { %v820_v2 = vsel %vm9737_vm7, %v732_v58, %v819_v55 }
  0x49   : > { %821 = vst [vmem:[#allocation2 + $0x6c] sm:$0xf] %v820_v2  ;;  %v741_v3 = vsel %vm9752_vm8, %v733_v59, %v740_v62  ;;  %v824_v4 = vsel %vm9643_vm2, %v742_v63, %v823_v60 }
  0x4a   : > { %822 = vst [vmem:[#allocation2 + $0x70] sm:$0xf] %v741_v3  ;;  %825 = vst [vmem:[#allocation2 + $0x74] sm:$0x1] %v824_v4 }
  0x4b   : > { %v830_v5 = vld [vmem:[%s9774_s29] sm:$0xf]  ;;  %v831_v6 = vld [vmem:[%s9774_s29 + $0x4] sm:$0xf]  ;;  %v832_v12 = vld [vmem:[%s9774_s29 + $0x8] sm:$0xf] }
  0x4c   : > { %v835_v7 = vshrl.u32 %v830_v5, 16  ;;  %v838_v8 = vshll.u32 %v830_v5, 16  ;;  %v843_v9 = vshrl.u32 %v831_v6, 16  ;;  %v846_v10 = vshll.u32 %v831_v6, 16  ;;  %v833_v13 = vld [vmem:[%s9774_s29 + $0xc] sm:$0xf] }
  0x4d   : > { %v874_v15 = vld [vmem:[#allocation2] sm:$0xf]  ;;  %v852_v17 = vshrl.u32 %v832_v12, 16  ;;  %v878_v18 = vld [vmem:[#allocation2 + $0x8] sm:$0x1]  ;;  %v855_v19 = vshll.u32 %v832_v12, 16 }
  0x4e   : > { %v837_v14 = vrot.slane %v835_v7, 7  ;;  %v845_v16 = vrot.slane %v843_v9, 7  ;;  %v860_v20 = vshrl.u32 %v833_v13, 16  ;;  %v863_v21 = vshll.u32 %v833_v13, 16  ;;  %v881_v31 = vld [vmem:[#allocation2 + $0xc] sm:$0xf] }
  0x4f   : > { %v854_v26 = vrot.slane %v852_v17, 7  ;;  %v885_v32 = vld [vmem:[#allocation2 + $0x14] sm:$0x1] }
  0x50   : > { %v840_v22 = vor.u32 %v838_v8, %v837_v14  ;;  %v841_v23 = vrot.slane %v837_v14, 4  ;;  %v848_v24 = vor.u32 %v846_v10, %v845_v16  ;;  %v850_v25 = vrot.slane %v845_v16, 4 }
  0x51   : > { %v862_v27 = vrot.slane %v860_v20, 7  ;;  %v857_v33 = vor.u32 %v855_v19, %v854_v26  ;;  %v858_v34 = vrot.slane %v854_v26, 4 }
  0x52   : > { %v875_v28 = vsel %vm9737_vm7, %v840_v22, %v874_v15  ;;  %v849_v29 = vsel %vm9752_vm8, %v841_v23, %v848_v24  ;;  %v879_v30 = vsel %vm9643_vm2, %v850_v25, %v878_v18 }
  0x53   : > { %876 = vst [vmem:[#allocation2] sm:$0xf] %v875_v28  ;;  %877 = vst [vmem:[#allocation2 + $0x4] sm:$0xf] %v849_v29  ;;  %v865_v35 = vor.u32 %v863_v21, %v862_v27  ;;  %v867_v36 = vrot.slane %v862_v27, 4  ;;  %v882_v37 = vsel %vm9737_vm7, %v857_v33, %v881_v31 }
  0x54   : > { %880 = vst [vmem:[#allocation2 + $0x8] sm:$0x1] %v879_v30  ;;  %883 = vst [vmem:[#allocation2 + $0xc] sm:$0xf] %v882_v37 }
  0x55   : > { %v866_v38 = vsel %vm9752_vm8, %v858_v34, %v865_v35  ;;  %v886_v39 = vsel %vm9643_vm2, %v867_v36, %v885_v32 }
  0x56   : > { %884 = vst [vmem:[#allocation2 + $0x10] sm:$0xf] %v866_v38  ;;  %887 = vst [vmem:[#allocation2 + $0x14] sm:$0x1] %v886_v39 }
  0x57 PF: > { %p7856_p12 = scmp.ne.s32.totalorder %s9534_s30, 0 }
  0x59   : > { %891 = sbr.rel (%p7856_p12) target bundleno = 99 (0x63), region = 64 }
  0x5e   : > { %v892_v40 = vld [vmem:[#allocation2] sm:$0xf]  ;;  %v896_v41 = vld [vmem:[#allocation2 + $0x8] sm:$0x1]  ;;  %v9552_v43 = vmov 0  }
  0x5f   : > { %v893_v42 = vsel %vm9737_vm7, 0, %v892_v40  ;;  %895 = vst [vmem:[#allocation2 + $0x4] sm:$0xf] %v9552_v43  ;;  %902 = vst [vmem:[#allocation2 + $0x10] sm:$0xf] %v9552_v43  ;;  %v897_v44 = vsel %vm9643_vm2, 0, %v896_v41 }
  0x60   : > { %v899_v45 = vld [vmem:[#allocation2 + $0xc] sm:$0xf]  ;;  %v903_v46 = vld [vmem:[#allocation2 + $0x14] sm:$0x1]  ;;  %894 = vst [vmem:[#allocation2] sm:$0xf] %v893_v42 }
  0x61   : > { %898 = vst [vmem:[#allocation2 + $0x8] sm:$0x1] %v897_v44  ;;  %v900_v47 = vsel %vm9737_vm7, 0, %v899_v45  ;;  %v904_v48 = vsel %vm9643_vm2, 0, %v903_v46 }
  0x62   : > { %901 = vst [vmem:[#allocation2 + $0xc] sm:$0xf] %v900_v47  ;;  %905 = vst [vmem:[#allocation2 + $0x14] sm:$0x1] %v904_v48 }
  0x63 PF: > { %p7857_p13 = scmp.ge.s32.totalorder %s9534_s30, 1 }
  0x65   : > { %909 = sbr.rel (%p7857_p13) target bundleno = 118 (0x76), region = 68 }
  0x6a   : > { %v910_v49 = vld [vmem:[%s9785_s17] sm:$0xf]  ;;  %v911_v50 = vld [vmem:[%s9785_s17 + $0x4] sm:$0xf]  ;;  %v912_v55 = vld [vmem:[%s9785_s17 + $0x8] sm:$0xf] }
  0x6b   : > { %v915_v51 = vshrl.u32 %v910_v49, 16  ;;  %v918_v52 = vshll.u32 %v910_v49, 16  ;;  %v923_v53 = vshrl.u32 %v911_v50, 16  ;;  %v926_v54 = vshll.u32 %v911_v50, 16  ;;  %v913_v56 = vld [vmem:[%s9785_s17 + $0xc] sm:$0xf] }
  0x6c   : > { %v955_v58 = vld [vmem:[#allocation2 + $0x78] sm:$0xf]  ;;  %v932_v60 = vshrl.u32 %v912_v55, 16  ;;  %v959_v62 = vld [vmem:[#allocation2 + $0x80] sm:$0x1]  ;;  %v935_v63 = vshll.u32 %v912_v55, 16 }
  0x6d   : > { %v917_v57 = vrot.slane %v915_v51, 7  ;;  %v925_v59 = vrot.slane %v923_v53, 7  ;;  %v940_v2 = vshrl.u32 %v913_v56, 16  ;;  %v943_v3 = vshll.u32 %v913_v56, 16  ;;  %v962_v14 = vld [vmem:[#allocation2 + $0x84] sm:$0xf] }
  0x6e   : > { %v934_v8 = vrot.slane %v932_v60, 7  ;;  %v966_v15 = vld [vmem:[#allocation2 + $0x8c] sm:$0x1] }
  0x6f   : > { %v920_v4 = vor.u32 %v918_v52, %v917_v57  ;;  %v921_v5 = vrot.slane %v917_v57, 4  ;;  %v928_v6 = vor.u32 %v926_v54, %v925_v59  ;;  %v930_v7 = vrot.slane %v925_v59, 4 }
  0x70   : > { %v942_v9 = vrot.slane %v940_v2, 7  ;;  %v937_v16 = vor.u32 %v935_v63, %v934_v8  ;;  %v938_v17 = vrot.slane %v934_v8, 4 }
  0x71   : > { %v956_v10 = vsel %vm9737_vm7, %v920_v4, %v955_v58  ;;  %v929_v12 = vsel %vm9752_vm8, %v921_v5, %v928_v6  ;;  %v960_v13 = vsel %vm9643_vm2, %v930_v7, %v959_v62 }
  0x72   : > { %957 = vst [vmem:[#allocation2 + $0x78] sm:$0xf] %v956_v10  ;;  %958 = vst [vmem:[#allocation2 + $0x7c] sm:$0xf] %v929_v12  ;;  %v945_v18 = vor.u32 %v943_v3, %v942_v9  ;;  %v947_v19 = vrot.slane %v942_v9, 4  ;;  %v963_v20 = vsel %vm9737_vm7, %v937_v16, %v962_v14 }
  0x73   : > { %961 = vst [vmem:[#allocation2 + $0x80] sm:$0x1] %v960_v13  ;;  %964 = vst [vmem:[#allocation2 + $0x84] sm:$0xf] %v963_v20 }
  0x74   : > { %v946_v21 = vsel %vm9752_vm8, %v938_v17, %v945_v18  ;;  %v967_v22 = vsel %vm9643_vm2, %v947_v19, %v966_v15 }
  0x75   : > { %965 = vst [vmem:[#allocation2 + $0x88] sm:$0xf] %v946_v21  ;;  %968 = vst [vmem:[#allocation2 + $0x8c] sm:$0x1] %v967_v22 }
  0x76 PF: > { %p7858_p0 = scmp.ne.s32.totalorder %s9534_s30, 1 }
  0x78   : > { %972 = sbr.rel (%p7858_p0) target bundleno = 130 (0x82), region = 72 }
  0x7d   : > { %v974_v23 = vld [vmem:[#allocation2 + $0x78] sm:$0xf]  ;;  %v978_v24 = vld [vmem:[#allocation2 + $0x80] sm:$0x1]  ;;  %v9553_v26 = vmov 0  }
  0x7e   : > { %v975_v25 = vsel %vm9737_vm7, 0, %v974_v23  ;;  %977 = vst [vmem:[#allocation2 + $0x7c] sm:$0xf] %v9553_v26  ;;  %984 = vst [vmem:[#allocation2 + $0x88] sm:$0xf] %v9553_v26  ;;  %v979_v27 = vsel %vm9643_vm2, 0, %v978_v24 }
  0x7f   : > { %v981_v28 = vld [vmem:[#allocation2 + $0x84] sm:$0xf]  ;;  %v985_v29 = vld [vmem:[#allocation2 + $0x8c] sm:$0x1]  ;;  %976 = vst [vmem:[#allocation2 + $0x78] sm:$0xf] %v975_v25 }
  0x80   : > { %980 = vst [vmem:[#allocation2 + $0x80] sm:$0x1] %v979_v27  ;;  %v982_v30 = vsel %vm9737_vm7, 0, %v981_v28  ;;  %v986_v31 = vsel %vm9643_vm2, 0, %v985_v29 }
  0x81   : > { %983 = vst [vmem:[#allocation2 + $0x84] sm:$0xf] %v982_v30  ;;  %987 = vst [vmem:[#allocation2 + $0x8c] sm:$0x1] %v986_v31 }
  0x82 PF: > { %v9274_v32 = vld [vmem:[%s12887_s3 + $0x78] sm:$0xff]   ;;  %v9276_v34 = vld [vmem:[%s12887_s3 + $0x70] sm:$0xff]   ;;  %v9278_v36 = vld [vmem:[%s12887_s3 + $0x68] sm:$0xff]   ;;  %vm1034_vm9 = vsmask.f32 3328  ;;  %v12917_v9 = vmov 0 }
  0x83   : > { %v9275_v33 = vld [vmem:[%s12887_s3 + $0x38] sm:$0xff]   ;;  %8618 = vmatprep.subr.bf16.mxu0 %v9274_v32  ;;  %v9277_v35 = vld [vmem:[%s12887_s3 + $0x30] sm:$0xff]   ;;  %v9279_v37 = vld [vmem:[%s12887_s3 + $0x28] sm:$0xff]   ;;  %vm1035_vm10 = vsmask.f32 7440  ;;  %vm1725_vm12 = vcmask 1042432  }
  0x84   : > { %8654 = vmatprep.subr.bf16.mxu1 %v9275_v33  ;;  %8619 = vmatpush3.bf16.msra.mxu0 %v9274_v32  ;;  %v9280_v38 = vld [vmem:[%s12887_s3 + $0x60] sm:$0xff]   ;;  %v9282_v40 = vld [vmem:[%s12887_s3 + $0x58] sm:$0xff]   ;;  %v9284_v42 = vld [vmem:[%s12887_s3 + $0x50] sm:$0xff]   ;;  %vm1726_vm13 = vcmask 1046532  }
  0x85   : > { %8655 = vmatpush3.bf16.msra.mxu1 %v9275_v33  ;;  %8620 = vmatprep.subr.bf16.mxu0 %v9276_v34  ;;  %v9281_v39 = vld [vmem:[%s12887_s3 + $0x20] sm:$0xff]   ;;  %v9283_v41 = vld [vmem:[%s12887_s3 + $0x18] sm:$0xff]   ;;  %v9285_v43 = vld [vmem:[%s12887_s3 + $0x10] sm:$0xff]  }
  0x86   : > { %8656 = vmatprep.subr.bf16.mxu1 %v9277_v35  ;;  %v9922_v44 = vld [vmem:[#allocation2] sm:$0xf]  ;;  %v9924_v45 = vld [vmem:[#allocation2 + $0x4] sm:$0xf]  ;;  %v9926_v46 = vld [vmem:[#allocation2 + $0x8] sm:$0x1] }
  0x87   : > { %v1038_v47 = vshrl.u32 %v9922_v44, 16  ;;  %v1041_v48 = vshll.u32 %v9922_v44, 16  ;;  %v9286_v49 = vld [vmem:[%s12887_s3 + $0x48] sm:$0xff]   ;;  %v1047_v50 = vshll.u32 %v9924_v45, 16  ;;  %v1051_v51 = vshrl.u32 %v9924_v45, 16  ;;  %v9288_v8 = vld [vmem:[%s12887_s3 + $0x40] sm:$0xff]   ;;  %vm9957_vm11 = vmor %vm1034_vm9, %vm1035_vm10 }
  0x88   : > { %8621 = vmatpush3.bf16.msra.mxu0 %v9276_v34  ;;  %v1057_v52 = vshll.u32 %v9926_v46, 16  ;;  %v1733_v53 = vrot.slane %v9926_v46, 5  ;;  %v9937_v54 = vld [vmem:[#allocation2 + $0xc] sm:$0xf]  ;;  %v7877_v57 = vcombine.low %v9922_v44, %v9924_v45  ;;  %v9941_v58 = vld [vmem:[#allocation2 + $0x10] sm:$0xf]  ;;  %vm10165_vm14 = vmor %vm1725_vm12, %vm1726_vm13 }
  0x89   : > { %8657 = vmatpush3.bf16.msra.mxu1 %v9277_v35  ;;  %8622 = vmatprep.subr.bf16.mxu0 %v9278_v36  ;;  %v1040_v55 = vrot.slane %v1038_v47, 4  ;;  %v1043_v56 = vrot.slane %v1041_v48, 5  ;;  %v9943_v59 = vld [vmem:[#allocation2 + $0x14] sm:$0x1]  ;;  %v1049_v60 = vrot.slane %v1047_v50, 5  ;;  %v1053_v62 = vrot.slane %v1051_v51, 4 }
  0x8a   : > { %8658 = vmatprep.subr.bf16.mxu1 %v9279_v37  ;;  %v1059_v63 = vrot.slane %v1057_v52, 5  ;;  %v1062_v2 = vshrl.u32 %v9937_v54, 16  ;;  %v9287_v3 = vld [vmem:[%s12887_s3 + $0x8] sm:$0xff]   ;;  %8670 = vmatprep.mubr.bf16.mxu1 %v7877_v57  ;;  %v1065_v5 = vshll.u32 %v9937_v54, 16  ;;  %v1071_v6 = vshll.u32 %v9941_v58, 16  ;;  %v9289_v24 = vld [vmem:[%s12887_s3] sm:$0xff]  }
  0x8b   : > { %v1044_v4 = vor.u32 %v1043_v56, %v1040_v55  ;;  %v1075_v7 = vshrl.u32 %v9941_v58, 16  ;;  %v12918_v9 = vsel %vm9957_vm11, 4294967295, %v12917_v9  ;;  %v1054_v10 = vor.u32 %v1053_v62, %v1049_v60  ;;  %v9965_v22 = vld [vmem:[#allocation2 + $0x18] sm:$0xf]  ;;  %v9967_v23 = vld [vmem:[#allocation2 + $0x1c] sm:$0xf] }
  0x8c   : > { %8623 = vmatpush3.bf16.msra.mxu0 %v9278_v36  ;;  %12919 = vst [vmem:[#allocation7_spill] sm:$0xff] %v12918_v9  ;;  %v1064_v12 = vrot.slane %v1062_v2, 4  ;;  %v1081_v13 = vshll.u32 %v9943_v59, 16  ;;  %v1740_v14 = vrot.slane %v9943_v59, 5  ;;  %v1067_v16 = vrot.slane %v1065_v5, 5  ;;  %v9297_v55 = vld [vmem:[%s12887_s3 + $0xf8] sm:$0xff]  }
  0x8d   : > { %8659 = vmatpush3.bf16.msra.mxu1 %v9279_v37  ;;  %8624 = vmatprep.subr.bf16.mxu0 %v9280_v38  ;;  %v1045_v15 = vrot.slane %v1044_v4, 4  ;;  %v1073_v17 = vrot.slane %v1071_v6, 5  ;;  %v1077_v18 = vrot.slane %v1075_v7, 4  ;;  %v1055_v19 = vrot.slane %v1054_v10, 4  ;;  %v9974_v28 = vld [vmem:[#allocation2 + $0x20] sm:$0x1] }
  0x8e   : > { %8660 = vmatprep.subr.bf16.mxu1 %v9281_v39  ;;  %v1083_v20 = vrot.slane %v1081_v13, 5  ;;  %v7878_v21 = vcombine.low %v9937_v54, %v9941_v58  ;;  %v1068_v26 = vor.u32 %v1067_v16, %v1064_v12  ;;  %v1086_v29 = vshrl.u32 %v9965_v22, 16  ;;  %v9977_v30 = vld [vmem:[#allocation2 + $0x24] sm:$0xf]  ;;  %v9984_v35 = vld [vmem:[#allocation2 + $0x28] sm:$0xf] }
  0x8f   : > { %v1050_v25 = vsel %vm9957_vm11, %v1045_v15, %v1049_v60  ;;  %v1078_v27 = vor.u32 %v1077_v18, %v1073_v17  ;;  %v1060_v31 = vsel %vm9957_vm11, %v1055_v19, %v1059_v63  ;;  %v1089_v32 = vshll.u32 %v9965_v22, 16  ;;  %v9293_v57 = vld [vmem:[%s12887_s3 + $0xb0] sm:$0xff]  }
  0x90   : > { %8625 = vmatpush3.bf16.msra.mxu0 %v9280_v38  ;;  %v1095_v33 = vshll.u32 %v9967_v23, 16  ;;  %v1099_v34 = vshrl.u32 %v9967_v23, 16  ;;  %v7859_v36 = vcombine.low %v1050_v25, %v1060_v31  ;;  %v1069_v37 = vrot.slane %v1068_v26, 4  ;;  %v10014_v13 = vld [vmem:[#allocation2 + $0x30] sm:$0xf] }
  0x91   : > { %8661 = vmatpush3.bf16.msra.mxu1 %v9281_v39  ;;  %8626 = vmatprep.subr.bf16.mxu0 %v9282_v40  ;;  %v1079_v38 = vrot.slane %v1078_v27, 4  ;;  %v9292_v39 = vld [vmem:[%s12887_s3 + $0xb8] sm:$0xff]   ;;  %v1105_v48 = vshll.u32 %v9974_v28, 16  ;;  %v7879_v51 = vcombine.low %v9965_v22, %v9967_v23  ;;  %v1110_v52 = vshrl.u32 %v9977_v30, 16  ;;  %v10016_v18 = vld [vmem:[#allocation2 + $0x34] sm:$0xf] }
  0x92   : > { %8662 = vmatprep.subr.bf16.mxu1 %v9283_v41  ;;  %v1101_v47 = vrot.slane %v1099_v34, 4  ;;  %8634 = vmatprep.mubr.bf16.mxu0 %v7859_v36  ;;  %v1119_v4 = vshll.u32 %v9984_v35, 16  ;;  %v1123_v5 = vshrl.u32 %v9984_v35, 16  ;;  %v7880_v12 = vcombine.low %v9977_v30, %v9984_v35  ;;  %v10023_v26 = vld [vmem:[#allocation2 + $0x38] sm:$0x1] }
  0x93   : > { %v1084_v50 = vsel %vm9957_vm11, %v1079_v38, %v1083_v20  ;;  %v1107_v63 = vrot.slane %v1105_v48, 5  ;;  %v1112_v2 = vrot.slane %v1110_v52, 4  ;;  %v1134_v19 = vshrl.u32 %v10014_v13, 16  ;;  %v10032_v36 = vld [vmem:[#allocation2 + $0x3c] sm:$0xf] }
  0x94   : > { %8627 = vmatpush3.bf16.msra.mxu0 %v9282_v40  ;;  %v1088_v40 = vrot.slane %v1086_v29, 4  ;;  %v1121_v16 = vrot.slane %v1119_v4, 5  ;;  %v1137_v27 = vshll.u32 %v10014_v13, 16  ;;  %v1143_v38 = vshll.u32 %v10016_v18, 16  ;;  %v10041_v48 = vld [vmem:[#allocation2 + $0x44] sm:$0x1] }
  0x95   : > { %8663 = vmatpush3.bf16.msra.mxu1 %v9283_v41  ;;  %8628 = vmatprep.subr.bf16.mxu0 %v9284_v42  ;;  %v9989_v41 = vld [vmem:[#allocation2 + $0x2c] sm:$0x1]  ;;  %v1136_v34 = vrot.slane %v1134_v19, 4  ;;  %v1747_v59 = vrot.slane %v9974_v28, 5 }
  0x96   : > { %8664 = vmatprep.subr.bf16.mxu1 %v9285_v43  ;;  %v1129_v10 = vshll.u32 %v9989_v41, 16 }
  0x98   : > { %8629 = vmatpush3.bf16.msra.mxu0 %v9284_v42  ;;  %v1091_v42 = vrot.slane %v1089_v32, 5  ;;  %v1131_v25 = vrot.slane %v1129_v10, 5 }
  0x99   : > { %8665 = vmatpush3.bf16.msra.mxu1 %v9285_v43  ;;  %8630 = vmatprep.subr.bf16.mxu0 %v9286_v49  ;;  %v1097_v43 = vrot.slane %v1095_v33, 5  ;;  %v9296_v33 = vld [vmem:[%s12887_s3 + $0xa8] sm:$0xff]  }
  0x9a   : > { %8666 = vmatprep.subr.bf16.mxu1 %v9287_v3  ;;  %v1092_v60 = vor.u32 %v1091_v42, %v1088_v40  ;;  %v1147_v40 = vshrl.u32 %v10016_v18, 16 }
  0x9b   : > { %v1102_v62 = vor.u32 %v1101_v47, %v1097_v43  ;;  %v7881_v47 = vcombine.low %v10014_v13, %v10016_v18 }
  0x9c   : > { %8631 = vmatpush3.bf16.msra.mxu0 %v9286_v49  ;;  %v1074_v49 = vsel %vm9957_vm11, %v1069_v37, %v1073_v17  ;;  %v1093_v6 = vrot.slane %v1092_v60, 4  ;;  %v1125_v17 = vrot.slane %v1123_v5, 4  ;;  %v1139_v37 = vrot.slane %v1137_v27, 5  ;;  %v9300_v60 = vld [vmem:[%s12887_s3 + $0xa0] sm:$0xff]  }
  0x9d   : > { %8667 = vmatpush3.bf16.msra.mxu1 %v9287_v3  ;;  %8632 = vmatprep.subr.bf16.mxu0 %v9288_v8  ;;  %v7860_v56 = vcombine.low %v1074_v49, %v1084_v50  ;;  %v1113_v3 = vshll.u32 %v9977_v30, 16  ;;  %v1103_v7 = vrot.slane %v1102_v62, 4  ;;  %v1158_v49 = vshrl.u32 %v10032_v36, 16 }
  0x9e   : > { %8668 = vmatprep.subr.bf16.mxu1 %v9289_v24  ;;  %v1098_v20 = vsel %vm9957_vm11, %v1093_v6, %v1097_v43  ;;  %v1126_v32 = vor.u32 %v1125_v17, %v1121_v16  ;;  %v1140_v50 = vor.u32 %v1139_v37, %v1136_v34  ;;  %v1149_v52 = vrot.slane %v1147_v40, 4 }
  0x9f   : > { %v1115_v15 = vrot.slane %v1113_v3, 5  ;;  %v1161_v3 = vshll.u32 %v10032_v36, 16 }
  0xa0   : > { %8633 = vmatpush3.bf16.msra.mxu0 %v9288_v8  ;;  %v9298_v8 = vld [vmem:[%s12887_s3 + $0xf0] sm:$0xff]   ;;  %v1127_v43 = vrot.slane %v1126_v32, 4  ;;  %v1141_v5 = vrot.slane %v1140_v50, 4 }
  0xa1   : > { %8669 = vmatpush3.bf16.msra.mxu1 %v9289_v24  ;;  %8690 = vmatprep.subr.bf16.mxu0 %v9292_v39  ;;  %v1108_v24 = vsel %vm9957_vm11, %v1103_v7, %v1107_v63  ;;  %v1116_v31 = vor.u32 %v1115_v15, %v1112_v2  ;;  %v1160_v2 = vrot.slane %v1158_v49, 4  ;;  %v1163_v10 = vrot.slane %v1161_v3, 5  ;;  %v10072_v32 = vld [vmem:[#allocation2 + $0x50] sm:$0x1] }
  0xa2   : > { %8726 = vmatprep.subr.bf16.mxu1 %v9297_v55  ;;  %v7861_v29 = vcombine.low %v1098_v20, %v1108_v24  ;;  %v1132_v63 = vsel %vm9957_vm11, %v1127_v43, %v1131_v25  ;;  %v10067_v25 = vld [vmem:[#allocation2 + $0x4c] sm:$0xf] }
  0xa3   : > { %8635 = vmatmul.mubr.bf16.vlgmr.msra.gmra.mxu0 %v7860_v56  ;;  %v1117_v42 = vrot.slane %v1116_v31, 4  ;;  %v1164_v27 = vor.u32 %v1163_v10, %v1160_v2  ;;  %v10091_v2 = vld [vmem:[#allocation2 + $0x5c] sm:$0x1] }
  0xa4   : > { %8671 = vmatmul.mubr.bf16.vlgmr.msra.gmra.mxu1 %v7878_v21  ;;  %8691 = vmatpush3.bf16.msra.mxu0 %v9292_v39  ;;  %v1153_v21 = vshll.u32 %v10023_v26, 16  ;;  %v10037_v39 = vld [vmem:[#allocation2 + $0x40] sm:$0xf] }
  0xa5   : > { %8692 = vmatprep.subr.bf16.mxu0 %v9293_v57  ;;  %8674 = vmatprep.mubr.bf16.mxu1 %v7879_v51  ;;  %v1145_v51 = vrot.slane %v1143_v38, 5  ;;  %v1122_v62 = vsel %vm9957_vm11, %v1117_v42, %v1121_v16  ;;  %v1167_v7 = vshll.u32 %v10037_v39, 16  ;;  %v1171_v15 = vshrl.u32 %v10037_v39, 16  ;;  %v9304_v16 = vld [vmem:[%s12887_s3 + $0xe0] sm:$0xff]   ;;  %v9303_v38 = vld [vmem:[%s12887_s3 + $0x98] sm:$0xff]  }
  0xa6   : > { %8638 = vmatprep.mubr.bf16.mxu0 %v7861_v29  ;;  %8727 = vmatpush3.bf16.msra.mxu1 %v9297_v55  ;;  %v1155_v56 = vrot.slane %v1153_v21, 5  ;;  %v9302_v55 = vld [vmem:[%s12887_s3 + $0xe8] sm:$0xff]   ;;  %v7862_v4 = vcombine.low %v1122_v62, %v1132_v63  ;;  %v7882_v24 = vcombine.low %v10032_v36, %v10037_v39  ;;  %v10083_v21 = vld [vmem:[#allocation2 + $0x54] sm:$0xf]  ;;  %v1165_v43 = vrot.slane %v1164_v27, 4 }
  0xa7   : > { %8728 = vmatprep.subr.bf16.mxu1 %v9298_v8  ;;  %v1150_v6 = vor.u32 %v1149_v52, %v1145_v51  ;;  %v1146_v17 = vsel %vm9957_vm11, %v1141_v5, %v1145_v51  ;;  %v1169_v20 = vrot.slane %v1167_v7, 5  ;;  %v1173_v29 = vrot.slane %v1171_v15, 4  ;;  %v10085_v51 = vld [vmem:[#allocation2 + $0x58] sm:$0xf] }
  0xa8   : > { %8693 = vmatpush3.bf16.msra.mxu0 %v9293_v57  ;;  %v1177_v57 = vshll.u32 %v10041_v48, 16  ;;  %v1201_v63 = vshll.u32 %v10072_v32, 16  ;;  %v1206_v5 = vshrl.u32 %v10083_v21, 16  ;;  %v1209_v15 = vshll.u32 %v10083_v21, 16 }
  0xa9   : > { %8694 = vmatprep.subr.bf16.mxu0 %v9296_v33  ;;  %v1151_v19 = vrot.slane %v1150_v6, 4  ;;  %v1174_v49 = vor.u32 %v1173_v29, %v1169_v20  ;;  %v1170_v3 = vsel %vm9957_vm11, %v1165_v43, %v1169_v20  ;;  %v9307_v20 = vld [vmem:[%s12887_s3 + $0x90] sm:$0xff]  }
  0xaa   : > { %8729 = vmatpush3.bf16.msra.mxu1 %v9298_v8  ;;  %v10065_v8 = vld [vmem:[#allocation2 + $0x48] sm:$0xf]  ;;  %v1179_v31 = vrot.slane %v1177_v57, 5  ;;  %v1203_v10 = vrot.slane %v1201_v63, 5 }
  0xab   : > { %8639 = vmatmul.mubr.bf16.gmra.mxu0 %v7862_v4  ;;  %8730 = vmatprep.subr.bf16.mxu1 %v9302_v55  ;;  %v1182_v34 = vshrl.u32 %v10065_v8, 16  ;;  %v1156_v37 = vsel %vm9957_vm11, %v1151_v19, %v1155_v56  ;;  %v1185_v40 = vshll.u32 %v10065_v8, 16  ;;  %v7883_v4 = vcombine.low %v10065_v8, %v10067_v25 }
  0xac   : > { %8675 = vmatmul.mubr.bf16.gmra.mxu1 %v7880_v12  ;;  %8695 = vmatpush3.bf16.msra.mxu0 %v9296_v33  ;;  %v1191_v12 = vshll.u32 %v10067_v25, 16  ;;  %v1195_v33 = vshrl.u32 %v10067_v25, 16  ;;  %v7863_v42 = vcombine.low %v1146_v17, %v1156_v37  ;;  %v1208_v17 = vrot.slane %v1206_v5, 4  ;;  %v10129_v5 = vld [vmem:[#allocation2 + $0x6c] sm:$0xf] }
  0xad   : > { %8678 = vmatprep.mubr.bf16.mxu1 %v7881_v47  ;;  %8696 = vmatprep.subr.bf16.mxu0 %v9300_v60  ;;  %v1184_v50 = vrot.slane %v1182_v34, 4  ;;  %v9308_v47 = vld [vmem:[%s12887_s3 + $0xd8] sm:$0xff]   ;;  %v1187_v52 = vrot.slane %v1185_v40, 5  ;;  %v1215_v19 = vshll.u32 %v10085_v51, 16  ;;  %v1211_v37 = vrot.slane %v1209_v15, 5  ;;  %v9310_v40 = vld [vmem:[%s12887_s3 + $0xd0] sm:$0xff]  }
  0xae   : > { %8731 = vmatpush3.bf16.msra.mxu1 %v9302_v55  ;;  %v1193_v56 = vrot.slane %v1191_v12, 5  ;;  %v1197_v62 = vrot.slane %v1195_v33, 4  ;;  %8642 = vmatprep.mubr.bf16.mxu0 %v7863_v42  ;;  %v1175_v55 = vrot.slane %v1174_v49, 4  ;;  %v1225_v12 = vshll.u32 %v10091_v2, 16  ;;  %v9309_v42 = vld [vmem:[%s12887_s3 + $0x88] sm:$0xff]  }
  0xaf   : > { %8732 = vmatprep.subr.bf16.mxu1 %v9304_v16  ;;  %v1188_v6 = vor.u32 %v1187_v52, %v1184_v50  ;;  %v7884_v33 = vcombine.low %v10083_v21, %v10085_v51  ;;  %v10121_v50 = vld [vmem:[#allocation2 + $0x64] sm:$0xf]  ;;  %v10123_v52 = vld [vmem:[#allocation2 + $0x68] sm:$0x1] }
  0xb0   : > { %8697 = vmatpush3.bf16.msra.mxu0 %v9300_v60  ;;  %v1198_v7 = vor.u32 %v1197_v62, %v1193_v56  ;;  %v1180_v57 = vsel %vm9957_vm11, %v1175_v55, %v1179_v31  ;;  %v1219_v60 = vshrl.u32 %v10085_v51, 16  ;;  %v9313_v62 = vld [vmem:[%s12887_s3 + $0xc8] sm:$0xff]   ;;  %v1227_v55 = vrot.slane %v1225_v12, 5 }
  0xb1   : > { %8698 = vmatprep.subr.bf16.mxu0 %v9303_v38  ;;  %v7864_v27 = vcombine.low %v1170_v3, %v1180_v57  ;;  %v1189_v29 = vrot.slane %v1188_v6, 4  ;;  %v1243_v15 = vshrl.u32 %v10121_v50, 16  ;;  %v10136_v57 = vld [vmem:[#allocation2 + $0x74] sm:$0x1] }
  0xb2   : > { %8733 = vmatpush3.bf16.msra.mxu1 %v9304_v16  ;;  %v1199_v34 = vrot.slane %v1198_v7, 4  ;;  %v1217_v16 = vrot.slane %v1215_v19, 5  ;;  %v1221_v31 = vrot.slane %v1219_v60, 4  ;;  %v1249_v19 = vshll.u32 %v10123_v52, 16 }
  0xb3   : > { %8734 = vmatprep.subr.bf16.mxu1 %v9308_v47  ;;  %8643 = vmatmul.mubr.bf16.gmra.mxu0 %v7864_v27  ;;  %v1194_v43 = vsel %vm9957_vm11, %v1189_v29, %v1193_v56 }
  0xb4   : > { %8679 = vmatmul.mubr.bf16.gmra.mxu1 %v7882_v24  ;;  %8699 = vmatpush3.bf16.msra.mxu0 %v9303_v38  ;;  %v1204_v49 = vsel %vm9957_vm11, %v1199_v34, %v1203_v10  ;;  %v1212_v24 = vor.u32 %v1211_v37, %v1208_v17  ;;  %v10119_v38 = vld [vmem:[#allocation2 + $0x60] sm:$0xf]  ;;  %v1222_v3 = vor.u32 %v1221_v31, %v1217_v16  ;;  %v1239_v10 = vshll.u32 %v10121_v50, 16 }
  0xb5   : > { %8682 = vmatprep.mubr.bf16.mxu1 %v7883_v4  ;;  %v7865_v63 = vcombine.low %v1194_v43, %v1204_v49  ;;  %8700 = vmatprep.subr.bf16.mxu0 %v9307_v20  ;;  %v1230_v56 = vshrl.u32 %v10119_v38, 16  ;;  %v10131_v4 = vld [vmem:[#allocation2 + $0x70] sm:$0xf]  ;;  %v1233_v7 = vshll.u32 %v10119_v38, 16  ;;  %v7885_v60 = vcombine.low %v10119_v38, %v10121_v50  ;;  %v9314_v49 = vld [vmem:[%s12887_s3 + $0x80] sm:$0xff]  }
  0xb6   : > { %8735 = vmatpush3.bf16.msra.mxu1 %v9308_v47  ;;  %v1213_v6 = vrot.slane %v1212_v24, 4  ;;  %v1223_v17 = vrot.slane %v1222_v3, 4  ;;  %v1241_v34 = vrot.slane %v1239_v10, 5  ;;  %v1245_v37 = vrot.slane %v1243_v15, 4 }
  0xb7   : > { %8736 = vmatprep.subr.bf16.mxu1 %v9310_v40  ;;  %8646 = vmatprep.mubr.bf16.mxu0 %v7865_v63  ;;  %v1232_v47 = vrot.slane %v1230_v56, 4  ;;  %v1235_v29 = vrot.slane %v1233_v7, 5  ;;  %v1251_v12 = vrot.slane %v1249_v19, 5  ;;  %v1257_v43 = vshll.u32 %v10129_v5, 16  ;;  %v10161_v19 = vld [vmem:[%s12887_s3 + $0x138] sm:$0xff]  }
  0xb8   : > { %8701 = vmatpush3.bf16.msra.mxu0 %v9307_v20  ;;  %v1218_v27 = vsel %vm9957_vm11, %v1213_v6, %v1217_v16  ;;  %v1228_v31 = vsel %vm9957_vm11, %v1223_v17, %v1227_v55  ;;  %v1254_v20 = vshrl.u32 %v10129_v5, 16  ;;  %v1246_v16 = vor.u32 %v1245_v37, %v1241_v34  ;;  %v9315_v55 = vld [vmem:[%s12887_s3 + $0xc0] sm:$0xff]   ;;  %v10173_v37 = vld [vmem:[%s12887_s3 + $0x178] sm:$0xff]  }
  0xb9   : > { %8702 = vmatprep.subr.bf16.mxu0 %v9309_v42  ;;  %v7866_v24 = vcombine.low %v1218_v27, %v1228_v31  ;;  %v1236_v63 = vor.u32 %v1235_v29, %v1232_v47  ;;  %v1263_v3 = vshll.u32 %v10131_v4, 16  ;;  %v1259_v56 = vrot.slane %v1257_v43, 5 }
  0xba   : > { %8737 = vmatpush3.bf16.msra.mxu1 %v9310_v40  ;;  %v1256_v40 = vrot.slane %v1254_v20, 4  ;;  %v1267_v6 = vshrl.u32 %v10131_v4, 16  ;;  %v1273_v7 = vshll.u32 %v10136_v57, 16  ;;  %v1247_v15 = vrot.slane %v1246_v16, 4 }
  0xbb   : > { %8738 = vmatprep.subr.bf16.mxu1 %v9313_v62  ;;  %8647 = vmatmul.mubr.bf16.gmra.mxu0 %v7866_v24  ;;  %v1237_v10 = vrot.slane %v1236_v63, 4  ;;  %v1265_v17 = vrot.slane %v1263_v3, 5  ;;  %v7886_v47 = vcombine.low %v10129_v5, %v10131_v4  ;;  %v12920_v29 = vmov 0  ;;  %v10181_v24 = vld [vmem:[#allocation2 + $0xc] sm:$0xf] }
  0xbc   : > { %8683 = vmatmul.mubr.bf16.gmra.mxu1 %v7884_v33  ;;  %8703 = vmatpush3.bf16.msra.mxu0 %v9309_v42  ;;  %v1260_v33 = vor.u32 %v1259_v56, %v1256_v40  ;;  %v1269_v42 = vrot.slane %v1267_v6, 4  ;;  %v1275_v27 = vrot.slane %v1273_v7, 5  ;;  %v12921_v29 = vsel %vm10165_vm14, 4294967295, %v12920_v29  ;;  %v10183_v63 = vld [vmem:[#allocation2 + $0x10] sm:$0xf] }
  0xbd   : > { %8686 = vmatprep.mubr.bf16.mxu1 %v7885_v60  ;;  %8704 = vmatprep.subr.bf16.mxu0 %v9314_v49  ;;  %12922 = vst [vmem:[#allocation8_spill] sm:$0xff] %v12921_v29  ;;  %v7895_v60 = vrot.slane %v9922_v44, 9  ;;  %v1242_v31 = vsel %vm9957_vm11, %v1237_v10, %v1241_v34  ;;  %v1252_v20 = vsel %vm9957_vm11, %v1247_v15, %v1251_v12  ;;  %v7896_v43 = vrot.slane %v9937_v54, 9  ;;  %v10193_v7 = vld [vmem:[#allocation2 + $0x18] sm:$0xf] }
  0xbe   : > { %8739 = vmatpush3.bf16.msra.mxu1 %v9313_v62  ;;  %v1730_v62 = vrot.slane %v9924_v45, 5  ;;  %v7867_v44 = vcombine.low %v1242_v31, %v1252_v20  ;;  %v1261_v16 = vrot.slane %v1260_v33, 4  ;;  %v1270_v3 = vor.u32 %v1269_v42, %v1265_v17  ;;  %v10206_v33 = vld [vmem:[#allocation2 + $0x24] sm:$0xf] }
  0xbf   : > { %8740 = vmatprep.subr.bf16.mxu1 %v9315_v55  ;;  %v1737_v40 = vrot.slane %v9941_v58, 5  ;;  %v7923_v45 = vcombine.low %v10181_v24, %v10183_v63  ;;  %v2324_v15 = vshrl.u32 %v10181_v24, 16  ;;  %v2327_v42 = vshll.u32 %v10181_v24, 16 }
  0xc0   : > { %8705 = vmatpush3.bf16.msra.mxu0 %v9314_v49  ;;  %v1731_v34 = vsel %vm10165_vm14, %v7895_v60, %v1730_v62  ;;  %v1732_v56 = vrot.slane %v1730_v62, 4  ;;  %8650 = vmatprep.mubr.bf16.mxu0 %v7867_v44  ;;  %v1266_v54 = vsel %vm9957_vm11, %v1261_v16, %v1265_v17  ;;  %v1271_v12 = vrot.slane %v1270_v3, 4  ;;  %v10195_v49 = vld [vmem:[#allocation2 + $0x1c] sm:$0xf]  ;;  %v10208_v17 = vld [vmem:[#allocation2 + $0x28] sm:$0xf] }
  0xc1   : > { %8762 = vmatprep.subr.bf16.mxu0 %v10161_v19  ;;  %v1739_v6 = vrot.slane %v1737_v40, 4  ;;  %v10203_v10 = vsel %vm10165_vm14, %v7896_v43, %v1737_v40  ;;  %v2337_v31 = vshrl.u32 %v10183_v63, 16  ;;  %v7924_v20 = vcombine.low %v10193_v7, %v10195_v49  ;;  %v10230_v40 = vld [vmem:[#allocation2 + $0x30] sm:$0xf] }
  0xc2   : > { %8741 = vmatpush3.bf16.msra.mxu1 %v9315_v55  ;;  %v1734_v58 = vsel %vm10165_vm14, %v1732_v56, %v1733_v53  ;;  %v1276_v55 = vsel %vm9957_vm11, %v1271_v12, %v1275_v27  ;;  %v2348_v62 = vshrl.u32 %v10193_v7, 16  ;;  %v7897_v27 = vrot.slane %v9965_v22, 9 }
  0xc3   : > { %8798 = vmatprep.subr.bf16.mxu1 %v10173_v37  ;;  %v7905_v46 = vcombine.low %v1731_v34, %v1734_v58  ;;  %v1741_v53 = vsel %vm10165_vm14, %v1739_v6, %v1740_v14  ;;  %v7868_v60 = vcombine.low %v1266_v54, %v1276_v55  ;;  %v7898_v43 = vrot.slane %v9977_v30, 9  ;;  %v10249_v6 = vld [vmem:[#allocation2 + $0x34] sm:$0xf]  ;;  %v10253_v55 = vld [vmem:[#allocation2 + $0x3c] sm:$0xf] }
  0xc4   : > { %8687 = vmatmul.mubr.bf16.gmra.mxu1 %v7886_v47  ;;  %v1744_v47 = vrot.slane %v9967_v23, 5  ;;  %v7906_v14 = vcombine.low %v10203_v10, %v1741_v53  ;;  %v2351_v44 = vshll.u32 %v10193_v7, 16  ;;  %v1751_v16 = vrot.slane %v9984_v35, 5  ;;  %v10269_v10 = vld [vmem:[#allocation2 + $0x48] sm:$0xf] }
  0xc5   : > { %8742 = vmatprep.mubr.bf16.mxu1 %v7923_v45  ;;  %8651 = vmatmul.mubr.bf16.gmra.mxu0 %v7868_v60  ;;  %v1754_v3 = vrot.slane %v9989_v41, 5  ;;  %v2361_v22 = vshrl.u32 %v10195_v49, 16  ;;  %v7925_v23 = vcombine.low %v10206_v33, %v10208_v17  ;;  %v2372_v28 = vshrl.u32 %v10206_v33, 16  ;;  %v9324_v41 = vld [vmem:[%s12887_s3 + $0x170] sm:$0xff]   ;;  %v10271_v58 = vld [vmem:[#allocation2 + $0x4c] sm:$0xf] }
  0xc6   : > { %8706 = vmatprep.mubr.bf16.mxu0 %v7905_v46  ;;  %v1746_v34 = vrot.slane %v1744_v47, 4  ;;  %v1745_v30 = vsel %vm10165_vm14, %v7897_v27, %v1744_v47  ;;  %v1753_v56 = vrot.slane %v1751_v16, 4  ;;  %v2375_v45 = vshll.u32 %v10206_v33, 16  ;;  %v9319_v46 = vld [vmem:[%s12887_s3 + $0x130] sm:$0xff]  }
  0xc7   : > { %v2385_v35 = vshrl.u32 %v10208_v17, 16  ;;  %v10247_v12 = vsel %vm10165_vm14, %v7898_v43, %v1751_v16  ;;  %v7899_v27 = vrot.slane %v10014_v13, 9  ;;  %v1758_v47 = vrot.slane %v10016_v18, 5 }
  0xc8   : > { %v1748_v54 = vsel %vm10165_vm14, %v1746_v34, %v1747_v59  ;;  %v10260_v53 = vsel %vm10165_vm14, %v1753_v56, %v1754_v3  ;;  %v10265_v59 = vld [vmem:[#allocation2 + $0x40] sm:$0xf]  ;;  %v1761_v16 = vrot.slane %v10023_v26, 5  ;;  %v1765_v34 = vrot.slane %v10037_v39, 5  ;;  %v10323_v56 = vld [vmem:[#allocation2 + $0x58] sm:$0xf] }
  0xc9   : > { %v7907_v43 = vcombine.low %v1745_v30, %v1748_v54  ;;  %v7926_v3 = vcombine.low %v10230_v40, %v10249_v6  ;;  %v1760_v13 = vrot.slane %v1758_v47, 4  ;;  %v7900_v18 = vrot.slane %v10032_v36, 9  ;;  %v9325_v54 = vld [vmem:[%s12887_s3 + $0x120] sm:$0xff]  }
  0xca   : > { %v1767_v26 = vrot.slane %v1765_v34, 4  ;;  %v1768_v39 = vrot.slane %v10041_v48, 5  ;;  %v7927_v36 = vcombine.low %v10253_v55, %v10265_v59  ;;  %v9322_v48 = vld [vmem:[%s12887_s3 + $0x128] sm:$0xff]   ;;  %v10326_v30 = vld [vmem:[#allocation2 + $0x60] sm:$0xf]  ;;  %v2812_v60 = vrot.slane %v10183_v63, 5 }
  0xcc   : > { %8743 = vmatmul.mubr.bf16.vlgmr.msra.gmra.mxu1 %v7924_v20  ;;  %v7908_v20 = vcombine.low %v10247_v12, %v10260_v53  ;;  %v10310_v53 = vld [vmem:[#allocation2 + $0x54] sm:$0xf] }
  0xcd   : > { %8746 = vmatprep.mubr.bf16.mxu1 %v7925_v23  ;;  %8799 = vmatpush3.bf16.msra.mxu1 %v10173_v37  ;;  %v9328_v23 = vld [vmem:[%s12887_s3 + $0x168] sm:$0xff]   ;;  %v1759_v37 = vsel %vm10165_vm14, %v7899_v27, %v1758_v47  ;;  %v7901_v27 = vrot.slane %v10065_v8, 9  ;;  %v10301_v47 = vsel %vm10165_vm14, %v7900_v18, %v1765_v34  ;;  %v1779_v34 = vrot.slane %v10085_v51, 5 }
  0xce   : > { %8800 = vmatprep.subr.bf16.mxu1 %v9324_v41  ;;  %8707 = vmatmul.mubr.bf16.vlgmr.msra.gmra.mxu0 %v7906_v14  ;;  %v1762_v14 = vsel %vm10165_vm14, %v1760_v13, %v1761_v16  ;;  %v1772_v16 = vrot.slane %v10067_v25, 5  ;;  %v1775_v13 = vrot.slane %v10072_v32, 5  ;;  %v1782_v18 = vrot.slane %v10091_v2, 5 }
  0xcf   : > { %8763 = vmatpush3.bf16.msra.mxu0 %v10161_v19  ;;  %8710 = vmatprep.mubr.bf16.mxu0 %v7907_v43  ;;  %v7928_v19 = vcombine.low %v10269_v10, %v10271_v58  ;;  %v9330_v43 = vld [vmem:[%s12887_s3 + $0x160] sm:$0xff]   ;;  %v7909_v12 = vcombine.low %v1759_v37, %v1762_v14  ;;  %v10321_v25 = vsel %vm10165_vm14, %v1767_v26, %v1768_v39  ;;  %v7903_v2 = vrot.slane %v10119_v38, 9  ;;  %v9329_v38 = vld [vmem:[%s12887_s3 + $0x118] sm:$0xff]  }
  0xd0   : > { %8764 = vmatprep.subr.bf16.mxu0 %v9319_v46  ;;  %v1774_v32 = vrot.slane %v1772_v16, 4  ;;  %v10330_v37 = vld [vmem:[#allocation2 + $0x64] sm:$0xf]  ;;  %v10335_v26 = vsel %vm10165_vm14, %v7901_v27, %v1772_v16  ;;  %v7910_v14 = vcombine.low %v10301_v47, %v10321_v25  ;;  %v7929_v16 = vcombine.low %v10310_v53, %v10323_v56 }
  0xd1   : > { %8801 = vmatpush3.bf16.msra.mxu1 %v9324_v41  ;;  %v7902_v41 = vrot.slane %v10083_v21, 9  ;;  %v1781_v21 = vrot.slane %v1779_v34, 4  ;;  %v1796_v25 = vrot.slane %v10136_v57, 5  ;;  %v9336_v57 = vld [vmem:[%s12887_s3 + $0x150] sm:$0xff]   ;;  %v2357_v8 = vshll.u32 %v10195_v49, 16 }
  0xd2   : > { %8802 = vmatprep.subr.bf16.mxu1 %v9328_v23  ;;  %v10339_v39 = vsel %vm10165_vm14, %v1774_v32, %v1775_v13  ;;  %v1789_v13 = vrot.slane %v10123_v52, 5  ;;  %v10371_v32 = vld [vmem:[#allocation2 + $0x6c] sm:$0xf] }
  0xd3   : > { %8765 = vmatpush3.bf16.msra.mxu0 %v9319_v46  ;;  %v10354_v27 = vsel %vm10165_vm14, %v1781_v21, %v1782_v18  ;;  %v1793_v18 = vrot.slane %v10131_v4, 5  ;;  %v10373_v21 = vld [vmem:[#allocation2 + $0x70] sm:$0xf]  ;;  %v10384_v4 = vld [vmem:[#allocation2 + $0x7c] sm:$0xf]  ;;  %v2353_v46 = vrot.slane %v2351_v44, 5 }
  0xd4   : > { %8747 = vmatmul.mubr.bf16.gmra.mxu1 %v7926_v3  ;;  %8766 = vmatprep.subr.bf16.mxu0 %v9322_v48  ;;  %v9334_v3 = vld [vmem:[%s12887_s3 + $0x158] sm:$0xff]   ;;  %v7931_v47 = vcombine.low %v10371_v32, %v10373_v21  ;;  %v7959_v44 = vrot.slane %v10181_v24, 9  ;;  %v9341_v24 = vld [vmem:[%s12887_s3 + $0x140] sm:$0xff]  }
  0xd5   : > { %8750 = vmatprep.mubr.bf16.mxu1 %v7927_v36  ;;  %8803 = vmatpush3.bf16.msra.mxu1 %v9328_v23  ;;  %v10350_v36 = vsel %vm10165_vm14, %v7902_v41, %v1779_v34  ;;  %v1786_v23 = vrot.slane %v10121_v50, 5  ;;  %v7904_v41 = vrot.slane %v10129_v5, 9  ;;  %v7911_v34 = vcombine.low %v10335_v26, %v10339_v39 }
  0xd6   : > { %8711 = vmatmul.mubr.bf16.gmra.mxu0 %v7908_v20  ;;  %8804 = vmatprep.subr.bf16.mxu1 %v9330_v43  ;;  %v7930_v20 = vcombine.low %v10326_v30, %v10330_v37  ;;  %v7912_v50 = vcombine.low %v10350_v36, %v10354_v27  ;;  %v1795_v39 = vrot.slane %v1793_v18, 4 }
  0xd7   : > { %8767 = vmatpush3.bf16.msra.mxu0 %v9322_v48  ;;  %8714 = vmatprep.mubr.bf16.mxu0 %v7909_v12  ;;  %v10379_v52 = vsel %vm10165_vm14, %v7903_v2, %v1786_v23  ;;  %v1788_v5 = vrot.slane %v1786_v23, 4  ;;  %v10382_v12 = vld [vmem:[#allocation2 + $0x78] sm:$0xf]  ;;  %v10391_v26 = vsel %vm10165_vm14, %v7904_v41, %v1793_v18  ;;  %v9332_v48 = vld [vmem:[%s12887_s3 + $0x110] sm:$0xff]   ;;  %v2326_v2 = vrot.slane %v2324_v15, 4 }
  0xd8   : > { %8768 = vmatprep.subr.bf16.mxu0 %v9325_v54  ;;  %v10411_v23 = vsel %vm10165_vm14, %v1795_v39, %v1796_v25  ;;  %v2038_v18 = vld [vmem:[#allocation2 + $0x14] sm:$0x1]  ;;  %v2329_v25 = vrot.slane %v2327_v42, 5  ;;  %v2333_v39 = vshll.u32 %v10183_v63, 16  ;;  %v10427_v15 = vld [vmem:[#allocation2 + $0x20] sm:$0x1] }
  0xd9   : > { %8805 = vmatpush3.bf16.msra.mxu1 %v9330_v43  ;;  %v10400_v43 = vsel %vm10165_vm14, %v1788_v5, %v1789_v13  ;;  %v2339_v5 = vrot.slane %v2337_v31, 4  ;;  %v2343_v41 = vshll.u32 %v2038_v18, 16  ;;  %v9339_v42 = vld [vmem:[%s12887_s3 + $0x148] sm:$0xff]   ;;  %v2363_v31 = vrot.slane %v2361_v22, 4 }
  0xda   : > { %8806 = vmatprep.subr.bf16.mxu1 %v9334_v3  ;;  %v2330_v51 = vor.u32 %v2329_v25, %v2326_v2  ;;  %v2367_v13 = vshll.u32 %v10427_v15, 16  ;;  %v10453_v63 = vld [vmem:[#allocation2 + $0x2c] sm:$0x1] }
  0xdb   : > { %8769 = vmatpush3.bf16.msra.mxu0 %v9325_v54  ;;  %v7913_v54 = vcombine.low %v10379_v52, %v10400_v43 }
  0xdc   : > { %8751 = vmatmul.mubr.bf16.gmra.mxu1 %v7928_v19  ;;  %8770 = vmatprep.subr.bf16.mxu0 %v9329_v38  ;;  %v2345_v19 = vrot.slane %v2343_v41, 5  ;;  %v2331_v2 = vrot.slane %v2330_v51, 4 }
  0xdd   : > { %8754 = vmatprep.mubr.bf16.mxu1 %v7929_v16  ;;  %8807 = vmatpush3.bf16.msra.mxu1 %v9334_v3  ;;  %v2350_v16 = vrot.slane %v2348_v62, 4  ;;  %v2335_v3 = vrot.slane %v2333_v39, 5  ;;  %v2359_v39 = vrot.slane %v2357_v8, 5  ;;  %v2813_v8 = vsel %vm10165_vm14, %v7959_v44, %v2812_v60 }
  0xde   : > { %8715 = vmatmul.mubr.bf16.gmra.mxu0 %v7910_v14  ;;  %8808 = vmatprep.subr.bf16.mxu1 %v9336_v57  ;;  %v9335_v14 = vld [vmem:[%s12887_s3 + $0x108] sm:$0xff]   ;;  %v2391_v44 = vshll.u32 %v10453_v63, 16 }
  0xdf   : > { %8771 = vmatpush3.bf16.msra.mxu0 %v9329_v38  ;;  %8718 = vmatprep.mubr.bf16.mxu0 %v7911_v34  ;;  %v2354_v62 = vor.u32 %v2353_v46, %v2350_v16  ;;  %v2340_v25 = vor.u32 %v2339_v5, %v2335_v3  ;;  %v2369_v38 = vrot.slane %v2367_v13, 5  ;;  %v2815_v34 = vrot.slane %v2038_v18, 5  ;;  %v9340_v5 = vld [vmem:[%s12887_s3 + $0x100] sm:$0xff]  }
  0xe0   : > { %8772 = vmatprep.subr.bf16.mxu0 %v9332_v48  ;;  %v7960_v46 = vrot.slane %v10193_v7, 9  ;;  %v2336_v41 = vsel %vm9957_vm11, %v2331_v2, %v2335_v3  ;;  %v2364_v51 = vor.u32 %v2363_v31, %v2359_v39  ;;  %v2819_v18 = vrot.slane %v10195_v49, 5  ;;  %v2047_v2 = vld [vmem:[#allocation2 + $0x38] sm:$0x1] }
  0xe1   : > { %8809 = vmatpush3.bf16.msra.mxu1 %v9336_v57  ;;  %v2355_v22 = vrot.slane %v2354_v62, 4  ;;  %v2341_v16 = vrot.slane %v2340_v25, 4  ;;  %v2814_v57 = vrot.slane %v2812_v60, 4  ;;  %v2822_v13 = vrot.slane %v10427_v15, 5  ;;  %v10486_v62 = vld [vmem:[%s12887_s3 + $0x1f8] sm:$0xff]  }
  0xe2   : > { %8810 = vmatprep.subr.bf16.mxu1 %v9339_v42  ;;  %v2365_v31 = vrot.slane %v2364_v51, 4  ;;  %v2377_v60 = vrot.slane %v2375_v45, 5  ;;  %v2821_v15 = vrot.slane %v2819_v18, 4  ;;  %v10501_v25 = vld [vmem:[%s12887_s3 + $0x1b8] sm:$0xff]  }
  0xe3   : > { %8773 = vmatpush3.bf16.msra.mxu0 %v9332_v48  ;;  %v2360_v7 = vsel %vm9957_vm11, %v2355_v22, %v2359_v39  ;;  %v2346_v3 = vsel %vm9957_vm11, %v2341_v16, %v2345_v19  ;;  %v2816_v48 = vsel %vm10165_vm14, %v2814_v57, %v2815_v34  ;;  %v2393_v22 = vrot.slane %v2391_v44, 5 }
  0xe4   : > { %8755 = vmatmul.mubr.bf16.gmra.mxu1 %v7930_v20  ;;  %8774 = vmatprep.subr.bf16.mxu0 %v9335_v14  ;;  %v2374_v20 = vrot.slane %v2372_v28, 4  ;;  %v7941_v49 = vcombine.low %v2336_v41, %v2346_v3  ;;  %v2370_v28 = vsel %vm9957_vm11, %v2365_v31, %v2369_v38  ;;  %v7969_v19 = vcombine.low %v2813_v8, %v2816_v48 }
  0xe5   : > { %8758 = vmatprep.mubr.bf16.mxu1 %v7931_v47  ;;  %8811 = vmatpush3.bf16.msra.mxu1 %v9339_v42  ;;  %v10475_v47 = vsel %vm10165_vm14, %v7960_v46, %v2819_v18  ;;  %v2381_v42 = vshll.u32 %v10208_v17, 16  ;;  %v10491_v36 = vcombine.low %v2360_v7, %v2370_v28  ;;  %v2823_v27 = vsel %vm10165_vm14, %v2821_v15, %v2822_v13 }
  0xe6   : > { %8719 = vmatmul.mubr.bf16.gmra.mxu0 %v7912_v50  ;;  %8812 = vmatprep.subr.bf16.mxu1 %v9341_v24  ;;  %v2378_v45 = vor.u32 %v2377_v60, %v2374_v20  ;;  %v2387_v50 = vrot.slane %v2385_v35, 4  ;;  %v7970_v52 = vcombine.low %v10475_v47, %v2823_v27  ;;  %v12924_v35 = vshll.u32 %v10230_v40, 16 }
  0xe7   : > { %8722 = vmatprep.mubr.bf16.mxu0 %v7913_v54  ;;  %8775 = vmatpush3.bf16.msra.mxu0 %v9335_v14  ;;  %v2383_v54 = vrot.slane %v2381_v42, 5  ;;  %v12923_v14 = vshrl.u32 %v10230_v40, 16  ;;  %v2405_v34 = vshll.u32 %v10249_v6, 16  ;;  %v12925_v46 = vshrl.u32 %v10249_v6, 16 }
  0xe8   : > { %8776 = vmatprep.subr.bf16.mxu0 %v9340_v5  ;;  %v2379_v43 = vrot.slane %v2378_v45, 4  ;;  %v2401_v38 = vrot.slane %v12924_v35, 5  ;;  %v2415_v8 = vshll.u32 %v2047_v2, 16  ;;  %v7961_v7 = vrot.slane %v10206_v33, 9 }
  0xe9   : > { %v2398_v39 = vrot.slane %v12923_v14, 4  ;;  %8813 = vmatpush3.bf16.msra.mxu1 %v9341_v24  ;;  %v2411_v41 = vrot.slane %v12925_v46, 4  ;;  %v2388_v51 = vor.u32 %v2387_v50, %v2383_v54  ;;  %v12926_v24 = vcombine.low %v10382_v12, %v10384_v4  ;;  %v10543_v50 = vld [vmem:[#allocation2 + $0x50] sm:$0x1] }
  0xea   : > { %v2384_v16 = vsel %vm9957_vm11, %v2379_v43, %v2383_v54  ;;  %8870 = vmatprep.subr.bf16.mxu1 %v10486_v62  ;;  %v2407_v18 = vrot.slane %v2405_v34, 5  ;;  %v2826_v13 = vrot.slane %v10208_v17, 5  ;;  %v2829_v3 = vrot.slane %v10453_v63, 5 }
  0xeb   : > { %8777 = vmatpush3.bf16.msra.mxu0 %v9340_v5  ;;  %v2402_v57 = vor.u32 %v2401_v38, %v2398_v39  ;;  %v2389_v31 = vrot.slane %v2388_v51, 4  ;;  %v2417_v20 = vrot.slane %v2415_v8, 5  ;;  %v7962_v33 = vrot.slane %v10230_v40, 9 }
  0xec   : > { %8759 = vmatmul.mubr.bf16.gmra.mxu1 %v12926_v24  ;;  %8834 = vmatprep.subr.bf16.mxu0 %v10501_v25  ;;  %v2833_v60 = vrot.slane %v10249_v6, 5  ;;  %v2412_v47 = vor.u32 %v2411_v41, %v2407_v18  ;;  %v2827_v5 = vsel %vm10165_vm14, %v7961_v7, %v2826_v13  ;;  %v2828_v15 = vrot.slane %v2826_v13, 4  ;;  %v10534_v6 = vld [vmem:[#allocation2 + $0x44] sm:$0x1] }
  0xed   : > { %8814 = vmatprep.mubr.bf16.mxu1 %v7969_v19  ;;  %v2403_v48 = vrot.slane %v2402_v57, 4  ;;  %v12927_v17 = vcombine.low %v10391_v26, %v10411_v23  ;;  %v2394_v63 = vsel %vm9957_vm11, %v2389_v31, %v2393_v22  ;;  %v2836_v19 = vrot.slane %v2047_v2, 5  ;;  %v9346_v23 = vld [vmem:[%s12887_s3 + $0x1f0] sm:$0xff]  }
  0xee   : > { %v10532_v28 = vsel %vm10165_vm14, %v7962_v33, %v2833_v60  ;;  %v2835_v40 = vrot.slane %v2833_v60, 4  ;;  %v7943_v45 = vcombine.low %v2384_v16, %v2394_v63  ;;  %v2413_v27 = vrot.slane %v2412_v47, 4  ;;  %v9343_v31 = vld [vmem:[%s12887_s3 + $0x1b0] sm:$0xff]  }
  0xef   : > { %8723 = vmatmul.mubr.bf16.gmra.mxu0 %v12927_v17  ;;  %v2408_v42 = vsel %vm9957_vm11, %v2403_v48, %v2407_v18  ;;  %v2830_v26 = vsel %vm10165_vm14, %v2828_v15, %v2829_v3  ;;  %v12929_v54 = vshll.u32 %v10253_v55, 16  ;;  %v2429_v35 = vshll.u32 %v10265_v59, 16  ;;  %v9348_v48 = vld [vmem:[%s12887_s3 + $0x1e8] sm:$0xff]  }
  0xf0   : > { %8778 = vmatprep.mubr.bf16.mxu0 %v7941_v49  ;;  %v7971_v44 = vcombine.low %v2827_v5, %v2830_v26  ;;  %v2837_v2 = vsel %vm10165_vm14, %v2835_v40, %v2836_v19  ;;  %v12928_v49 = vshrl.u32 %v10253_v55, 16  ;;  %v2418_v39 = vsel %vm9957_vm11, %v2413_v27, %v2417_v20 }
  0xf1   : > { %v2425_v14 = vrot.slane %v12929_v54, 5  ;;  %v7972_v22 = vcombine.low %v10532_v28, %v2837_v2  ;;  %v12930_v38 = vshrl.u32 %v10265_v59, 16  ;;  %v10557_v46 = vcombine.low %v2408_v42, %v2418_v39 }
  0xf2   : > { %v2422_v43 = vrot.slane %v12928_v49, 4  ;;  %v2439_v16 = vshll.u32 %v10534_v6, 16  ;;  %v12931_v51 = vshrl.u32 %v10269_v10, 16  ;;  %v2431_v7 = vrot.slane %v2429_v35, 5  ;;  %v10599_v49 = vld [vmem:[#allocation2 + $0x5c] sm:$0x1] }
  0xf3   : > { %v2435_v34 = vrot.slane %v12930_v38, 4  ;;  %v12932_v24 = vshll.u32 %v10269_v10, 16  ;;  %v2453_v18 = vshll.u32 %v10271_v58, 16  ;;  %v12933_v13 = vshrl.u32 %v10271_v58, 16  ;;  %v9347_v35 = vld [vmem:[%s12887_s3 + $0x1a0] sm:$0xff]  }
  0xf4   : > { %v2426_v41 = vor.u32 %v2425_v14, %v2422_v43  ;;  %v2446_v8 = vrot.slane %v12931_v51, 4  ;;  %8815 = vmatmul.mubr.bf16.vlgmr.msra.gmra.mxu1 %v7970_v52  ;;  %v2441_v33 = vrot.slane %v2439_v16, 5  ;;  %v2463_v52 = vshll.u32 %v10543_v50, 16 }
  0xf5   : > { %v2449_v57 = vrot.slane %v12932_v24, 5  ;;  %v2459_v3 = vrot.slane %v12933_v13, 4  ;;  %8818 = vmatprep.mubr.bf16.mxu1 %v7971_v44  ;;  %8871 = vmatpush3.bf16.msra.mxu1 %v10486_v62  ;;  %v7963_v60 = vrot.slane %v10253_v55, 9  ;;  %v2436_v47 = vor.u32 %v2435_v34, %v2431_v7  ;;  %v9344_v62 = vld [vmem:[%s12887_s3 + $0x1a8] sm:$0xff]  }
  0xf6   : > { %v2427_v20 = vrot.slane %v2426_v41, 4  ;;  %8872 = vmatprep.subr.bf16.mxu1 %v9346_v23  ;;  %v2455_v15 = vrot.slane %v2453_v18, 5  ;;  %v2840_v17 = vrot.slane %v10265_v59, 5  ;;  %v2465_v55 = vrot.slane %v2463_v52, 5 }
  0xf7   : > { %v2450_v5 = vor.u32 %v2449_v57, %v2446_v8  ;;  %8779 = vmatmul.mubr.bf16.vlgmr.msra.gmra.mxu0 %v10491_v36  ;;  %v2843_v28 = vrot.slane %v10534_v6, 5  ;;  %v7964_v40 = vrot.slane %v10269_v10, 9  ;;  %v2437_v19 = vrot.slane %v2436_v47, 4  ;;  %v2059_v57 = vld [vmem:[#allocation2 + $0x68] sm:$0x1] }
  0xf8   : > { %v2432_v63 = vsel %vm9957_vm11, %v2427_v20, %v2431_v7  ;;  %8835 = vmatpush3.bf16.msra.mxu0 %v10501_v25  ;;  %8782 = vmatprep.mubr.bf16.mxu0 %v7943_v45  ;;  %v2460_v59 = vor.u32 %v2459_v3, %v2455_v15  ;;  %v2841_v36 = vsel %vm10165_vm14, %v7963_v60, %v2840_v17  ;;  %v2842_v27 = vrot.slane %v2840_v17, 4 }
  0xf9   : > { %v2451_v42 = vrot.slane %v2450_v5, 4  ;;  %8836 = vmatprep.subr.bf16.mxu0 %v9343_v31  ;;  %8873 = vmatpush3.bf16.msra.mxu1 %v9346_v23  ;;  %v2847_v26 = vrot.slane %v10271_v58, 5  ;;  %v2850_v44 = vrot.slane %v10543_v50, 5  ;;  %v12934_v6 = vshrl.u32 %v10310_v53, 16  ;;  %v9350_v23 = vld [vmem:[%s12887_s3 + $0x1e0] sm:$0xff]  }
  0xfa   : > { %v2442_v10 = vsel %vm9957_vm11, %v2437_v19, %v2441_v33  ;;  %v2461_v45 = vrot.slane %v2460_v59, 4  ;;  %8874 = vmatprep.subr.bf16.mxu1 %v9348_v48  ;;  %v12935_v58 = vshll.u32 %v10310_v53, 16  ;;  %v2844_v54 = vsel %vm10165_vm14, %v2842_v27, %v2843_v28  ;;  %v9352_v33 = vld [vmem:[%s12887_s3 + $0x1d8] sm:$0xff]  }
  0xfb   : > { %v2470_v2 = vrot.slane %v12934_v6, 4  ;;  %v2456_v25 = vsel %vm9957_vm11, %v2451_v42, %v2455_v15  ;;  %v7945_v43 = vcombine.low %v2432_v63, %v2442_v10  ;;  %v2848_v14 = vsel %vm10165_vm14, %v7964_v40, %v2847_v26 }
  0xfc   : > { %v2473_v50 = vrot.slane %v12935_v58, 5  ;;  %v2849_v39 = vrot.slane %v2847_v26, 4  ;;  %8837 = vmatpush3.bf16.msra.mxu0 %v9343_v31  ;;  %8819 = vmatmul.mubr.bf16.gmra.mxu1 %v7972_v22  ;;  %v2466_v38 = vsel %vm9957_vm11, %v2461_v45, %v2465_v55  ;;  %v7973_v34 = vcombine.low %v2841_v36, %v2844_v54 }
  0xfd   : > { %v2477_v16 = vshll.u32 %v10323_v56, 16  ;;  %8838 = vmatprep.subr.bf16.mxu0 %v9344_v62  ;;  %v7946_v51 = vcombine.low %v2456_v25, %v2466_v38  ;;  %8875 = vmatpush3.bf16.msra.mxu1 %v9348_v48  ;;  %v12936_v7 = vshrl.u32 %v10323_v56, 16  ;;  %v2487_v24 = vshll.u32 %v10599_v49, 16 }
  0xfe   : > { %v2474_v41 = vor.u32 %v2473_v50, %v2470_v2  ;;  %v2851_v8 = vsel %vm10165_vm14, %v2849_v39, %v2850_v44  ;;  %8822 = vmatprep.mubr.bf16.mxu1 %v7973_v34  ;;  %8876 = vmatprep.subr.bf16.mxu1 %v9350_v23  ;;  %v12937_v31 = vshrl.u32 %v10326_v30, 16  ;;  %v12938_v60 = vshll.u32 %v10326_v30, 16  ;;  %v9351_v50 = vld [vmem:[%s12887_s3 + $0x190] sm:$0xff]  }
  0xff   : > { %v2483_v22 = vrot.slane %v12936_v7, 4  ;;  %v7974_v18 = vcombine.low %v2848_v14, %v2851_v8  ;;  %v2479_v3 = vrot.slane %v2477_v16, 5  ;;  %8783 = vmatmul.mubr.bf16.gmra.mxu0 %v10557_v46  ;;  %v2489_v52 = vrot.slane %v2487_v24, 5  ;;  %v9349_v46 = vld [vmem:[%s12887_s3 + $0x198] sm:$0xff]  }
 0x100   : > { %v2475_v13 = vrot.slane %v2474_v41, 4  ;;  %v2494_v20 = vrot.slane %v12937_v31, 4  ;;  %v2497_v48 = vrot.slane %v12938_v60, 5  ;;  %v2501_v47 = vshll.u32 %v10330_v37, 16  ;;  %8839 = vmatpush3.bf16.msra.mxu0 %v9344_v62  ;;  %8786 = vmatprep.mubr.bf16.mxu0 %v7945_v43  ;;  %v10655_v43 = vld [vmem:[#allocation2 + $0x74] sm:$0x1] }
 0x101   : > { %v12939_v5 = vshrl.u32 %v10330_v37, 16  ;;  %v2484_v63 = vor.u32 %v2483_v22, %v2479_v3  ;;  %v2511_v55 = vshll.u32 %v2059_v57, 16  ;;  %v7965_v28 = vrot.slane %v10310_v53, 9  ;;  %8840 = vmatprep.subr.bf16.mxu0 %v9347_v35  ;;  %8877 = vmatpush3.bf16.msra.mxu1 %v9350_v23  ;;  %v9354_v53 = vld [vmem:[%s12887_s3 + $0x1d0] sm:$0xff]   ;;  %v9355_v41 = vld [vmem:[%s12887_s3 + $0x1c8] sm:$0xff]  }
 0x102   : > { %v2480_v17 = vsel %vm9957_vm11, %v2475_v13, %v2479_v3  ;;  %v2498_v40 = vor.u32 %v2497_v48, %v2494_v20  ;;  %v2503_v19 = vrot.slane %v2501_v47, 5  ;;  %v2854_v42 = vrot.slane %v10323_v56, 5  ;;  %8878 = vmatprep.subr.bf16.mxu1 %v9352_v33  ;;  %v9353_v20 = vld [vmem:[%s12887_s3 + $0x188] sm:$0xff]  }
 0x103   : > { %v2507_v15 = vrot.slane %v12939_v5, 4  ;;  %v2857_v62 = vrot.slane %v10599_v49, 5  ;;  %v2485_v59 = vrot.slane %v2484_v63, 4  ;;  %v2513_v36 = vrot.slane %v2511_v55, 5 }
 0x104   : > { %v7966_v27 = vrot.slane %v10326_v30, 9  ;;  %v2861_v26 = vrot.slane %v10330_v37, 5  ;;  %v2499_v44 = vrot.slane %v2498_v40, 4  ;;  %v2855_v2 = vsel %vm10165_vm14, %v7965_v28, %v2854_v42  ;;  %8841 = vmatpush3.bf16.msra.mxu0 %v9347_v35  ;;  %8823 = vmatmul.mubr.bf16.gmra.mxu1 %v7974_v18 }
 0x105   : > { %v2508_v6 = vor.u32 %v2507_v15, %v2503_v19  ;;  %v2856_v10 = vrot.slane %v2854_v42, 4  ;;  %v2490_v56 = vsel %vm9957_vm11, %v2485_v59, %v2489_v52  ;;  %v2864_v25 = vrot.slane %v2059_v57, 5  ;;  %8842 = vmatprep.subr.bf16.mxu0 %v9349_v46  ;;  %8879 = vmatpush3.bf16.msra.mxu1 %v9352_v33  ;;  %v10671_v57 = vld [vmem:[#allocation2 + $0x80] sm:$0x1] }
 0x106   : > { %v2862_v30 = vsel %vm10165_vm14, %v7966_v27, %v2861_v26  ;;  %v2863_v37 = vrot.slane %v2861_v26, 4  ;;  %v7947_v45 = vcombine.low %v2480_v17, %v2490_v56  ;;  %v2504_v23 = vsel %vm9957_vm11, %v2499_v44, %v2503_v19  ;;  %8880 = vmatprep.subr.bf16.mxu1 %v9354_v53  ;;  %v9357_v42 = vld [vmem:[%s12887_s3 + $0x1c0] sm:$0xff]   ;;  %v10694_v27 = vld [vmem:[#allocation2 + $0x18] sm:$0xf] }
 0x107   : > { %v2509_v49 = vrot.slane %v2508_v6, 4  ;;  %v2858_v58 = vsel %vm10165_vm14, %v2856_v10, %v2857_v62  ;;  %v12940_v39 = vshrl.u32 %v10371_v32, 16  ;;  %v12941_v38 = vshll.u32 %v10371_v32, 16  ;;  %8787 = vmatmul.mubr.bf16.gmra.mxu0 %v7946_v51  ;;  %v9356_v6 = vld [vmem:[%s12887_s3 + $0x180] sm:$0xff]  }
 0x108   : > { %v7975_v54 = vcombine.low %v2855_v2, %v2858_v58  ;;  %v2865_v14 = vsel %vm10165_vm14, %v2863_v37, %v2864_v25  ;;  %v2525_v7 = vshll.u32 %v10373_v21, 16  ;;  %v12942_v22 = vshrl.u32 %v10373_v21, 16  ;;  %8843 = vmatpush3.bf16.msra.mxu0 %v9349_v46  ;;  %8790 = vmatprep.mubr.bf16.mxu0 %v7947_v45  ;;  %v10701_v2 = vld [vmem:[#allocation2 + $0x1c] sm:$0xf]  ;;  %v10707_v37 = vld [vmem:[#allocation2 + $0x24] sm:$0xf] }
 0x109   : > { %v2518_v35 = vrot.slane %v12940_v39, 4  ;;  %v2521_v34 = vrot.slane %v12941_v38, 5  ;;  %v2514_v16 = vsel %vm9957_vm11, %v2509_v49, %v2513_v36  ;;  %v7976_v8 = vcombine.low %v2862_v30, %v2865_v14  ;;  %8844 = vmatprep.subr.bf16.mxu0 %v9351_v50  ;;  %8881 = vmatpush3.bf16.msra.mxu1 %v9354_v53  ;;  %v10723_v14 = vld [vmem:[%s12887_s3 + $0x238] sm:$0xff]  }
 0x10a   : > { %v2531_v24 = vrot.slane %v12942_v22, 4  ;;  %v7948_v18 = vcombine.low %v2504_v23, %v2514_v16  ;;  %v2535_v3 = vshll.u32 %v10655_v43, 16  ;;  %v12943_v31 = vshrl.u32 %v10382_v12, 16  ;;  %8826 = vmatprep.mubr.bf16.mxu1 %v7975_v54  ;;  %8882 = vmatprep.subr.bf16.mxu1 %v9355_v41  ;;  %v10718_v54 = vld [vmem:[#allocation2 + $0x28] sm:$0xf] }
 0x10b   : > { %v2522_v13 = vor.u32 %v2521_v34, %v2518_v35  ;;  %v2527_v33 = vrot.slane %v2525_v7, 5  ;;  %v12944_v52 = vshll.u32 %v10382_v12, 16  ;;  %v2549_v48 = vshll.u32 %v10384_v4, 16 }
 0x10c   : > { %v2542_v51 = vrot.slane %v12943_v31, 4  ;;  %v12945_v47 = vshrl.u32 %v10384_v4, 16  ;;  %v2537_v17 = vrot.slane %v2535_v3, 5  ;;  %v2559_v63 = vshll.u32 %v10671_v57, 16  ;;  %8827 = vmatmul.mubr.bf16.gmra.mxu1 %v7976_v8  ;;  %8845 = vmatpush3.bf16.msra.mxu0 %v9351_v50  ;;  %v10738_v3 = vld [vmem:[#allocation2 + $0x2c] sm:$0x1] }
 0x10d   : > { %v2545_v60 = vrot.slane %v12944_v52, 5  ;;  %v2523_v15 = vrot.slane %v2522_v13, 4  ;;  %v7967_v55 = vrot.slane %v10371_v32, 9  ;;  %v2532_v28 = vor.u32 %v2531_v24, %v2527_v33  ;;  %8846 = vmatprep.subr.bf16.mxu0 %v9353_v20  ;;  %8883 = vmatpush3.bf16.msra.mxu1 %v9355_v41  ;;  %v10729_v41 = vld [vmem:[#allocation2 + $0x20] sm:$0x1] }
 0x10e   : > { %v2555_v5 = vrot.slane %v12945_v47, 4  ;;  %v2551_v40 = vrot.slane %v2549_v48, 5  ;;  %v2868_v19 = vrot.slane %v10373_v21, 5  ;;  %v2561_v59 = vrot.slane %v2559_v63, 5  ;;  %8884 = vmatprep.subr.bf16.mxu1 %v9357_v42  ;;  %v10742_v52 = vld [vmem:[#allocation2 + $0x30] sm:$0xf] }
 0x10f   : > { %v2546_v46 = vor.u32 %v2545_v60, %v2542_v51  ;;  %v2528_v62 = vsel %vm9957_vm11, %v2523_v15, %v2527_v33  ;;  %v2871_v36 = vrot.slane %v10655_v43, 5  ;;  %v7968_v32 = vrot.slane %v10382_v12, 9  ;;  %8791 = vmatmul.mubr.bf16.gmra.mxu0 %v7948_v18  ;;  %v10746_v15 = vld [vmem:[#allocation2 + $0x34] sm:$0xf] }
 0x110   : > { %v2533_v26 = vrot.slane %v2532_v28, 4  ;;  %v2556_v53 = vor.u32 %v2555_v5, %v2551_v40  ;;  %v2869_v44 = vsel %vm10165_vm14, %v7967_v55, %v2868_v19  ;;  %v2870_v10 = vrot.slane %v2868_v19, 4  ;;  %8847 = vmatpush3.bf16.msra.mxu0 %v9353_v20 }
 0x111   : > { %v2547_v21 = vrot.slane %v2546_v46, 4  ;;  %v2875_v56 = vrot.slane %v10384_v4, 5  ;;  %v2878_v12 = vrot.slane %v10671_v57, 5  ;;  %v7987_v30 = vcombine.low %v10694_v27, %v10701_v2  ;;  %8848 = vmatprep.subr.bf16.mxu0 %v9356_v6  ;;  %8885 = vmatpush3.bf16.msra.mxu1 %v9357_v42 }
 0x112   : > { %v2538_v25 = vsel %vm9957_vm11, %v2533_v26, %v2537_v17  ;;  %v2557_v23 = vrot.slane %v2556_v53, 4  ;;  %v3405_v49 = vshrl.u32 %v10694_v27, 16  ;;  %v2872_v58 = vsel %vm10165_vm14, %v2870_v10, %v2871_v36 }
 0x113   : > { %v2552_v45 = vsel %vm9957_vm11, %v2547_v21, %v2551_v40  ;;  %v7949_v4 = vcombine.low %v2528_v62, %v2538_v25  ;;  %v2876_v50 = vsel %vm10165_vm14, %v7968_v32, %v2875_v56  ;;  %v2877_v43 = vrot.slane %v2875_v56, 4  ;;  %v10752_v62 = vld [vmem:[#allocation2 + $0x3c] sm:$0xf]  ;;  %v10755_v21 = vld [vmem:[#allocation2 + $0x40] sm:$0xf] }
 0x114   : > { %v2562_v39 = vsel %vm9957_vm11, %v2557_v23, %v2561_v59  ;;  %v7977_v35 = vcombine.low %v2869_v44, %v2872_v58  ;;  %v3408_v38 = vshll.u32 %v10694_v27, 16  ;;  %v3418_v34 = vshrl.u32 %v10701_v2, 16  ;;  %8849 = vmatpush3.bf16.msra.mxu0 %v9356_v6 }
 0x115   : > { %8794 = vmatprep.mubr.bf16.mxu0 %v7949_v4  ;;  %v7950_v16 = vcombine.low %v2552_v45, %v2562_v39  ;;  %v2879_v8 = vsel %vm10165_vm14, %v2877_v43, %v2878_v12  ;;  %v7988_v7 = vcombine.low %v10707_v37, %v10718_v54  ;;  %v3429_v22 = vshrl.u32 %v10707_v37, 16  ;;  %8906 = vmatprep.subr.bf16.mxu0 %v10723_v14  ;;  %v10764_v45 = vld [vmem:[#allocation2 + $0x38] sm:$0x1] }
 0x116   : > { %8830 = vmatprep.mubr.bf16.mxu1 %v7977_v35  ;;  %v7978_v24 = vcombine.low %v2876_v50, %v2879_v8  ;;  %v3432_v57 = vshll.u32 %v10707_v37, 16  ;;  %v3442_v18 = vshrl.u32 %v10718_v54, 16  ;;  %v3407_v13 = vrot.slane %v3405_v49, 4  ;;  %v9361_v8 = vld [vmem:[%s12887_s3 + $0x230] sm:$0xff]  }
 0x117   : > { %v3410_v31 = vrot.slane %v3408_v38, 5  ;;  %v3414_v51 = vshll.u32 %v10701_v2, 16  ;;  %v3420_v20 = vrot.slane %v3418_v34, 4  ;;  %v3424_v33 = vshll.u32 %v10729_v41, 16  ;;  %8795 = vmatmul.mubr.bf16.gmra.mxu0 %v7950_v16  ;;  %v10772_v38 = vld [vmem:[#allocation2 + $0x44] sm:$0x1] }
 0x118   : > { %8831 = vmatmul.mubr.bf16.gmra.mxu1 %v7978_v24  ;;  %v3431_v60 = vrot.slane %v3429_v22, 4  ;;  %v3434_v48 = vrot.slane %v3432_v57, 5  ;;  %v3438_v47 = vshll.u32 %v10718_v54, 16  ;;  %v3444_v5 = vrot.slane %v3442_v18, 4  ;;  %8850 = vmatprep.mubr.bf16.mxu0 %v7987_v30 }
 0x119   : > { %v3411_v17 = vor.u32 %v3410_v31, %v3407_v13  ;;  %v3416_v63 = vrot.slane %v3414_v51, 5  ;;  %v3426_v55 = vrot.slane %v3424_v33, 5  ;;  %v3448_v28 = vshll.u32 %v10738_v3, 16  ;;  %v10780_v51 = vld [vmem:[#allocation2 + $0x48] sm:$0xf] }
 0x11a   : > { %v3435_v46 = vor.u32 %v3434_v48, %v3431_v60  ;;  %v3440_v40 = vrot.slane %v3438_v47, 5  ;;  %v7989_v19 = vcombine.low %v10742_v52, %v10746_v15  ;;  %v3453_v42 = vshrl.u32 %v10742_v52, 16  ;;  %v10787_v47 = vld [vmem:[#allocation2 + $0x4c] sm:$0xf] }
 0x11b   : > { %v3412_v59 = vrot.slane %v3411_v17, 4  ;;  %v3421_v36 = vor.u32 %v3420_v20, %v3416_v63  ;;  %v3450_v32 = vrot.slane %v3448_v28, 5  ;;  %v3456_v26 = vshll.u32 %v10742_v52, 16  ;;  %v10795_v28 = vld [vmem:[#allocation2 + $0x54] sm:$0xf] }
 0x11c   : > { %v3436_v53 = vrot.slane %v3435_v46, 4  ;;  %v3445_v44 = vor.u32 %v3444_v5, %v3440_v40  ;;  %v3466_v6 = vshrl.u32 %v10746_v15, 16  ;;  %v7990_v10 = vcombine.low %v10752_v62, %v10755_v21 }
 0x11d   : > { %v3417_v56 = vsel %vm9957_vm11, %v3412_v59, %v3416_v63  ;;  %v3422_v12 = vrot.slane %v3421_v36, 4  ;;  %v3477_v30 = vshrl.u32 %v10752_v62, 16  ;;  %v3480_v25 = vshll.u32 %v10752_v62, 16  ;;  %v10799_v59 = vld [vmem:[#allocation2 + $0x58] sm:$0xf] }
 0x11e   : > { %v3441_v23 = vsel %vm9957_vm11, %v3436_v53, %v3440_v40  ;;  %v3446_v49 = vrot.slane %v3445_v44, 4  ;;  %v3490_v4 = vshrl.u32 %v10755_v21, 16  ;;  %v3455_v58 = vrot.slane %v3453_v42, 4 }
 0x11f   : > { %v3427_v50 = vsel %vm9957_vm11, %v3422_v12, %v3426_v55  ;;  %v3458_v43 = vrot.slane %v3456_v26, 5  ;;  %v3462_v39 = vshll.u32 %v10746_v15, 16  ;;  %v3468_v35 = vrot.slane %v3466_v6, 4  ;;  %8851 = vmatmul.mubr.bf16.vlgmr.msra.gmra.mxu0 %v7988_v7  ;;  %v9364_v55 = vld [vmem:[%s12887_s3 + $0x228] sm:$0xff]   ;;  %v10808_v12 = vld [vmem:[#allocation2 + $0x50] sm:$0x1] }
 0x120   : > { %v8005_v34 = vcombine.low %v3417_v56, %v3427_v50  ;;  %v3451_v16 = vsel %vm9957_vm11, %v3446_v49, %v3450_v32  ;;  %v3472_v22 = vshll.u32 %v10764_v45, 16  ;;  %v3479_v24 = vrot.slane %v3477_v30, 4  ;;  %8907 = vmatpush3.bf16.msra.mxu0 %v10723_v14  ;;  %8854 = vmatprep.mubr.bf16.mxu0 %v7989_v19  ;;  %v9366_v50 = vld [vmem:[%s12887_s3 + $0x220] sm:$0xff]  }
 0x121   : > { %v8006_v57 = vcombine.low %v3441_v23, %v3451_v16  ;;  %v3459_v18 = vor.u32 %v3458_v43, %v3455_v58  ;;  %v3464_v13 = vrot.slane %v3462_v39, 5  ;;  %v3482_v31 = vrot.slane %v3480_v25, 5  ;;  %8908 = vmatprep.subr.bf16.mxu0 %v9361_v8  ;;  %v10820_v16 = vld [vmem:[#allocation2 + $0x5c] sm:$0x1] }
 0x122   : > { %8886 = vmatprep.mubr.bf16.mxu1 %v8005_v34  ;;  %v3474_v20 = vrot.slane %v3472_v22, 5  ;;  %v3486_v33 = vshll.u32 %v10755_v21, 16  ;;  %v3492_v60 = vrot.slane %v3490_v4, 4  ;;  %v3496_v48 = vshll.u32 %v10772_v38, 16 }
 0x123   : > { %8887 = vmatmul.mubr.bf16.vlgmr.msra.gmra.mxu1 %v8006_v57  ;;  %v3460_v5 = vrot.slane %v3459_v18, 4  ;;  %v3469_v17 = vor.u32 %v3468_v35, %v3464_v13  ;;  %v3483_v63 = vor.u32 %v3482_v31, %v3479_v24  ;;  %v7991_v7 = vcombine.low %v10780_v51, %v10787_v47  ;;  %v10828_v31 = vld [vmem:[#allocation2 + $0x60] sm:$0xf] }
 0x124   : > { %v3488_v46 = vrot.slane %v3486_v33, 5  ;;  %v3498_v40 = vrot.slane %v3496_v48, 5  ;;  %v3501_v42 = vshrl.u32 %v10780_v51, 16  ;;  %v3504_v14 = vshll.u32 %v10780_v51, 16  ;;  %8909 = vmatpush3.bf16.msra.mxu0 %v9361_v8 }
 0x125   : > { %v3465_v36 = vsel %vm9957_vm11, %v3460_v5, %v3464_v13  ;;  %v3470_v32 = vrot.slane %v3469_v17, 4  ;;  %v3484_v26 = vrot.slane %v3483_v63, 4  ;;  %v3514_v53 = vshrl.u32 %v10787_v47, 16  ;;  %8910 = vmatprep.subr.bf16.mxu0 %v9364_v55  ;;  %v10830_v5 = vld [vmem:[#allocation2 + $0x64] sm:$0xf] }
 0x126   : > { %v3493_v44 = vor.u32 %v3492_v60, %v3488_v46  ;;  %v7992_v6 = vcombine.low %v10795_v28, %v10799_v59  ;;  %v3525_v19 = vshrl.u32 %v10795_v28, 16  ;;  %v3528_v56 = vshll.u32 %v10795_v28, 16 }
 0x127   : > { %v3475_v30 = vsel %vm9957_vm11, %v3470_v32, %v3474_v20  ;;  %v3489_v25 = vsel %vm9957_vm11, %v3484_v26, %v3488_v46  ;;  %v3538_v23 = vshrl.u32 %v10799_v59, 16  ;;  %v3503_v49 = vrot.slane %v3501_v42, 4  ;;  %8855 = vmatmul.mubr.bf16.gmra.mxu0 %v7990_v10  ;;  %v10836_v42 = vld [vmem:[#allocation2 + $0x6c] sm:$0xf]  ;;  %v10842_v32 = vld [vmem:[#allocation2 + $0x70] sm:$0xf] }
 0x128   : > { %v8007_v4 = vcombine.low %v3465_v36, %v3475_v30  ;;  %v3494_v58 = vrot.slane %v3493_v44, 4  ;;  %v3506_v43 = vrot.slane %v3504_v14, 5  ;;  %v3510_v39 = vshll.u32 %v10787_v47, 16  ;;  %8911 = vmatpush3.bf16.msra.mxu0 %v9364_v55  ;;  %8858 = vmatprep.mubr.bf16.mxu0 %v7991_v7 }
 0x129   : > { %v3516_v35 = vrot.slane %v3514_v53, 4  ;;  %v3520_v34 = vshll.u32 %v10808_v12, 16  ;;  %v3527_v8 = vrot.slane %v3525_v19, 4  ;;  %v3530_v22 = vrot.slane %v3528_v56, 5  ;;  %8912 = vmatprep.subr.bf16.mxu0 %v9366_v50 }
 0x12a   : > { %8890 = vmatprep.mubr.bf16.mxu1 %v8007_v4  ;;  %v3499_v24 = vsel %vm9957_vm11, %v3494_v58, %v3498_v40  ;;  %v3507_v57 = vor.u32 %v3506_v43, %v3503_v49  ;;  %v3512_v18 = vrot.slane %v3510_v39, 5  ;;  %v3534_v13 = vshll.u32 %v10799_v59, 16  ;;  %v9368_v40 = vld [vmem:[%s12887_s3 + $0x218] sm:$0xff]   ;;  %v10852_v49 = vld [vmem:[#allocation2 + $0x68] sm:$0x1]  ;;  %v9371_v39 = vld [vmem:[%s12887_s3 + $0x210] sm:$0xff]  }
 0x12b   : > { %v8008_v20 = vcombine.low %v3489_v25, %v3499_v24  ;;  %v3522_v33 = vrot.slane %v3520_v34, 5  ;;  %v3531_v60 = vor.u32 %v3530_v22, %v3527_v8  ;;  %v3540_v48 = vrot.slane %v3538_v23, 4  ;;  %v10862_v24 = vld [vmem:[#allocation2 + $0x74] sm:$0x1] }
 0x12c   : > { %v3508_v10 = vrot.slane %v3507_v57, 4  ;;  %v3517_v17 = vor.u32 %v3516_v35, %v3512_v18  ;;  %v3536_v63 = vrot.slane %v3534_v13, 5  ;;  %v3544_v46 = vshll.u32 %v10820_v16, 16  ;;  %8913 = vmatpush3.bf16.msra.mxu0 %v9366_v50 }
 0x12d   : > { %8891 = vmatmul.mubr.bf16.gmra.mxu1 %v8008_v20  ;;  %v3532_v55 = vrot.slane %v3531_v60, 4  ;;  %v7993_v7 = vcombine.low %v10828_v31, %v10830_v5  ;;  %v3549_v14 = vshrl.u32 %v10828_v31, 16  ;;  %v3552_v36 = vshll.u32 %v10828_v31, 16  ;;  %8914 = vmatprep.subr.bf16.mxu0 %v9368_v40 }
 0x12e   : > { %v3513_v26 = vsel %vm9957_vm11, %v3508_v10, %v3512_v18  ;;  %v3518_v53 = vrot.slane %v3517_v17, 4  ;;  %v3541_v44 = vor.u32 %v3540_v48, %v3536_v63  ;;  %v3546_v19 = vrot.slane %v3544_v46, 5  ;;  %v9372_v17 = vld [vmem:[%s12887_s3 + $0x208] sm:$0xff]  }
 0x12f   : > { %v3537_v56 = vsel %vm9957_vm11, %v3532_v55, %v3536_v63  ;;  %v3562_v30 = vshrl.u32 %v10830_v5, 16  ;;  %v7994_v25 = vcombine.low %v10836_v42, %v10842_v32  ;;  %v3573_v23 = vshrl.u32 %v10836_v42, 16  ;;  %8859 = vmatmul.mubr.bf16.gmra.mxu0 %v7992_v6  ;;  %v10873_v63 = vld [vmem:[#allocation2 + $0x78] sm:$0xf] }
 0x130   : > { %v3523_v4 = vsel %vm9957_vm11, %v3518_v53, %v3522_v33  ;;  %v3542_v58 = vrot.slane %v3541_v44, 4  ;;  %v3576_v43 = vshll.u32 %v10836_v42, 16  ;;  %v3586_v50 = vshrl.u32 %v10842_v32, 16  ;;  %8915 = vmatpush3.bf16.msra.mxu0 %v9368_v40  ;;  %8862 = vmatprep.mubr.bf16.mxu0 %v7993_v7 }
 0x131   : > { %v8009_v35 = vcombine.low %v3513_v26, %v3523_v4  ;;  %v3551_v34 = vrot.slane %v3549_v14, 4  ;;  %v3554_v8 = vrot.slane %v3552_v36, 5  ;;  %v3558_v22 = vshll.u32 %v10830_v5, 16  ;;  %8916 = vmatprep.subr.bf16.mxu0 %v9371_v39  ;;  %v10877_v36 = vld [vmem:[#allocation2 + $0x7c] sm:$0xf] }
 0x132   : > { %v3547_v57 = vsel %vm9957_vm11, %v3542_v58, %v3546_v19  ;;  %v3564_v18 = vrot.slane %v3562_v30, 4  ;;  %v3568_v13 = vshll.u32 %v10852_v49, 16  ;;  %v3575_v20 = vrot.slane %v3573_v23, 4  ;;  %v10881_v19 = vld [vmem:[#allocation2 + $0x84] sm:$0xf] }
 0x133   : > { %8894 = vmatprep.mubr.bf16.mxu1 %v8009_v35  ;;  %v8010_v33 = vcombine.low %v3537_v56, %v3547_v57  ;;  %v3555_v60 = vor.u32 %v3554_v8, %v3551_v34  ;;  %v3560_v48 = vrot.slane %v3558_v22, 5  ;;  %v3578_v10 = vrot.slane %v3576_v43, 5  ;;  %v10885_v4 = vld [vmem:[#allocation2 + $0x88] sm:$0xf] }
 0x134   : > { %v3570_v6 = vrot.slane %v3568_v13, 5  ;;  %v3582_v46 = vshll.u32 %v10842_v32, 16  ;;  %v3588_v55 = vrot.slane %v3586_v50, 4  ;;  %v3592_v14 = vshll.u32 %v10862_v24, 16  ;;  %8917 = vmatpush3.bf16.msra.mxu0 %v9371_v39  ;;  %v9375_v13 = vld [vmem:[%s12887_s3 + $0x200] sm:$0xff]  }
 0x135   : > { %8895 = vmatmul.mubr.bf16.gmra.mxu1 %v8010_v33  ;;  %v3556_v40 = vrot.slane %v3555_v60, 4  ;;  %v3565_v26 = vor.u32 %v3564_v18, %v3560_v48  ;;  %v3579_v53 = vor.u32 %v3578_v10, %v3575_v20  ;;  %v7995_v44 = vcombine.low %v10873_v63, %v10877_v36  ;;  %8918 = vmatprep.subr.bf16.mxu0 %v9372_v17  ;;  %v10894_v18 = vld [vmem:[#allocation2 + $0x80] sm:$0x1] }
 0x136   : > { %v3584_v56 = vrot.slane %v3582_v46, 5  ;;  %v3594_v7 = vrot.slane %v3592_v14, 5  ;;  %v3597_v30 = vshrl.u32 %v10873_v63, 16  ;;  %v3600_v23 = vshll.u32 %v10873_v63, 16 }
 0x137   : > { %v3561_v58 = vsel %vm9957_vm11, %v3556_v40, %v3560_v48  ;;  %v3566_v43 = vrot.slane %v3565_v26, 4  ;;  %v3580_v50 = vrot.slane %v3579_v53, 4  ;;  %v3610_v35 = vshrl.u32 %v10877_v36, 16  ;;  %8863 = vmatmul.mubr.bf16.gmra.mxu0 %v7994_v25  ;;  %v10906_v26 = vld [vmem:[#allocation2 + $0x8c] sm:$0x1] }
 0x138   : > { %v3589_v34 = vor.u32 %v3588_v55, %v3584_v56  ;;  %v7996_v8 = vcombine.low %v10881_v19, %v10885_v4  ;;  %v3621_v22 = vshrl.u32 %v10881_v19, 16  ;;  %v3624_v57 = vshll.u32 %v10881_v19, 16  ;;  %8866 = vmatprep.mubr.bf16.mxu0 %v7995_v44  ;;  %8919 = vmatpush3.bf16.msra.mxu0 %v9372_v17 }
 0x139   : > { %v3571_v39 = vsel %vm9957_vm11, %v3566_v43, %v3570_v6  ;;  %v3585_v20 = vsel %vm9957_vm11, %v3580_v50, %v3584_v56  ;;  %v3634_v33 = vshrl.u32 %v10885_v4, 16  ;;  %v3599_v60 = vrot.slane %v3597_v30, 4  ;;  %8920 = vmatprep.subr.bf16.mxu0 %v9375_v13 }
 0x13a   : > { %v8011_v48 = vcombine.low %v3561_v58, %v3571_v39  ;;  %v3590_v10 = vrot.slane %v3589_v34, 4  ;;  %v3602_v46 = vrot.slane %v3600_v23, 5  ;;  %v3606_v55 = vshll.u32 %v10877_v36, 16 }
 0x13b   : > { %v3612_v14 = vrot.slane %v3610_v35, 4  ;;  %v3616_v40 = vshll.u32 %v10894_v18, 16  ;;  %v3623_v6 = vrot.slane %v3621_v22, 4  ;;  %v3626_v53 = vrot.slane %v3624_v57, 5 }
 0x13c   : > { %8898 = vmatprep.mubr.bf16.mxu1 %v8011_v48  ;;  %v3595_v56 = vsel %vm9957_vm11, %v3590_v10, %v3594_v7  ;;  %v3603_v30 = vor.u32 %v3602_v46, %v3599_v60  ;;  %v3608_v25 = vrot.slane %v3606_v55, 5  ;;  %v3630_v58 = vshll.u32 %v10885_v4, 16  ;;  %8921 = vmatpush3.bf16.msra.mxu0 %v9375_v13 }
 0x13d   : > { %v8012_v23 = vcombine.low %v3585_v20, %v3595_v56  ;;  %v3618_v43 = vrot.slane %v3616_v40, 5  ;;  %v3627_v44 = vor.u32 %v3626_v53, %v3623_v6  ;;  %v3636_v17 = vrot.slane %v3634_v33, 4 }
 0x13e   : > { %v3604_v50 = vrot.slane %v3603_v30, 4  ;;  %v3613_v35 = vor.u32 %v3612_v14, %v3608_v25  ;;  %v3632_v34 = vrot.slane %v3630_v58, 5  ;;  %v3640_v39 = vshll.u32 %v10906_v26, 16 }
 0x13f   : > { %8899 = vmatmul.mubr.bf16.gmra.mxu1 %v8012_v23  ;;  %v3628_v22 = vrot.slane %v3627_v44, 4  ;;  %v8023_v57 = vrot.slane %v10694_v27, 9  ;;  %v3893_v7 = vrot.slane %v10701_v2, 5  ;;  %v3896_v60 = vrot.slane %v10729_v41, 5  ;;  %8867 = vmatmul.mubr.bf16.gmra.mxu0 %v7996_v8 }
 0x140   : > { %v3609_v20 = vsel %vm9957_vm11, %v3604_v50, %v3608_v25  ;;  %v3614_v48 = vrot.slane %v3613_v35, 4  ;;  %v3637_v10 = vor.u32 %v3636_v17, %v3632_v34  ;;  %v3642_v33 = vrot.slane %v3640_v39, 5 }
 0x141   : > { %v3633_v46 = vsel %vm9957_vm11, %v3628_v22, %v3632_v34  ;;  %v3894_v55 = vsel %vm10165_vm14, %v8023_v57, %v3893_v7  ;;  %v3895_v14 = vrot.slane %v3893_v7, 4  ;;  %v8024_v13 = vrot.slane %v10707_v37, 9 }
 0x142   : > { %v3619_v27 = vsel %vm9957_vm11, %v3614_v48, %v3618_v43  ;;  %v3638_v2 = vrot.slane %v3637_v10, 4  ;;  %v3900_v41 = vrot.slane %v10718_v54, 5  ;;  %v3903_v40 = vrot.slane %v10738_v3, 5 }
 0x143   : > { %v8013_v6 = vcombine.low %v3609_v20, %v3619_v27  ;;  %v3897_v53 = vsel %vm10165_vm14, %v3895_v14, %v3896_v60  ;;  %v8025_v56 = vrot.slane %v10742_v52, 9  ;;  %v3907_v30 = vrot.slane %v10746_v15, 5 }
 0x144   : > { %v3643_v37 = vsel %vm9957_vm11, %v3638_v2, %v3642_v33  ;;  %v8033_v8 = vcombine.low %v3894_v55, %v3897_v53  ;;  %v3901_v25 = vsel %vm10165_vm14, %v8024_v13, %v3900_v41  ;;  %v3902_v58 = vrot.slane %v3900_v41, 4 }
 0x145   : > { %8902 = vmatprep.mubr.bf16.mxu1 %v8013_v6  ;;  %v8014_v54 = vcombine.low %v3633_v46, %v3643_v37  ;;  %v3908_v3 = vsel %vm10165_vm14, %v8025_v56, %v3907_v30  ;;  %v3909_v23 = vrot.slane %v3907_v30, 4  ;;  %v3910_v43 = vrot.slane %v10764_v45, 5 }
 0x146   : > { %8922 = vmatprep.mubr.bf16.mxu0 %v8033_v8  ;;  %v3904_v52 = vsel %vm10165_vm14, %v3902_v58, %v3903_v40  ;;  %v8026_v15 = vrot.slane %v10752_v62, 9  ;;  %v3914_v44 = vrot.slane %v10755_v21, 5  ;;  %v3917_v35 = vrot.slane %v10772_v38, 5 }
 0x147   : > { %8903 = vmatmul.mubr.bf16.gmra.mxu1 %v8014_v54  ;;  %v8034_v17 = vcombine.low %v3901_v25, %v3904_v52  ;;  %v3911_v50 = vsel %vm10165_vm14, %v3909_v23, %v3910_v43  ;;  %v3921_v34 = vrot.slane %v10787_v47, 5  ;;  %v8027_v45 = vrot.slane %v10780_v51, 9 }
 0x148   : > { %v8035_v39 = vcombine.low %v3908_v3, %v3911_v50  ;;  %v3916_v22 = vrot.slane %v3914_v44, 4  ;;  %v3924_v57 = vrot.slane %v10808_v12, 5  ;;  %v3915_v62 = vsel %vm10165_vm14, %v8026_v15, %v3914_v44 }
 0x149   : > { %v3923_v7 = vrot.slane %v3921_v34, 4  ;;  %8923 = vmatmul.mubr.bf16.vlgmr.msra.gmra.mxu0 %v8034_v17  ;;  %v3928_v60 = vrot.slane %v10799_v59, 5  ;;  %v3922_v38 = vsel %vm10165_vm14, %v8027_v45, %v3921_v34  ;;  %v3935_v51 = vrot.slane %v10830_v5, 5 }
 0x14a   : > { %8926 = vmatprep.mubr.bf16.mxu0 %v8035_v39  ;;  %v3918_v21 = vsel %vm10165_vm14, %v3916_v22, %v3917_v35  ;;  %v8028_v48 = vrot.slane %v10795_v28, 9  ;;  %v3931_v33 = vrot.slane %v10820_v16, 5  ;;  %v8029_v46 = vrot.slane %v10828_v31, 9 }
 0x14b   : > { %v3925_v47 = vsel %vm10165_vm14, %v3923_v7, %v3924_v57  ;;  %v8036_v12 = vcombine.low %v3915_v62, %v3918_v21  ;;  %v3930_v10 = vrot.slane %v3928_v60, 4  ;;  %v3937_v55 = vrot.slane %v3935_v51, 4 }
 0x14c   : > { %v8037_v20 = vcombine.low %v3922_v38, %v3925_v47  ;;  %v3938_v59 = vrot.slane %v10852_v49, 5  ;;  %v3929_v14 = vsel %vm10165_vm14, %v8028_v48, %v3928_v60  ;;  %v3942_v13 = vrot.slane %v10842_v32, 5 }
 0x14d   : > { %v3932_v5 = vsel %vm10165_vm14, %v3930_v10, %v3931_v33  ;;  %v3936_v28 = vsel %vm10165_vm14, %v8029_v46, %v3935_v51  ;;  %v3949_v31 = vrot.slane %v10877_v36, 5  ;;  %v8030_v2 = vrot.slane %v10836_v42, 9 }
 0x14e   : > { %v3939_v16 = vsel %vm10165_vm14, %v3937_v55, %v3938_v59  ;;  %v8038_v27 = vcombine.low %v3929_v14, %v3932_v5  ;;  %v3944_v41 = vrot.slane %v3942_v13, 4  ;;  %v3945_v40 = vrot.slane %v10862_v24, 5 }
 0x14f   : > { %v8039_v49 = vcombine.low %v3936_v28, %v3939_v16  ;;  %v8031_v6 = vrot.slane %v10873_v63, 9  ;;  %v3951_v53 = vrot.slane %v3949_v31, 4  ;;  %v3952_v32 = vrot.slane %v10894_v18, 5 }
 0x150   : > { %v3943_v56 = vsel %vm10165_vm14, %v8030_v2, %v3942_v13  ;;  %v3946_v36 = vsel %vm10165_vm14, %v3944_v41, %v3945_v40  ;;  %v3956_v30 = vrot.slane %v10885_v4, 5  ;;  %v8032_v18 = vrot.slane %v10881_v19, 9 }
 0x151   : > { %8927 = vmatmul.mubr.bf16.gmra.mxu0 %v8036_v12  ;;  %v3950_v42 = vsel %vm10165_vm14, %v8031_v6, %v3949_v31  ;;  %v3953_v24 = vsel %vm10165_vm14, %v3951_v53, %v3952_v32  ;;  %v8040_v63 = vcombine.low %v3943_v56, %v3946_v36  ;;  %v3959_v25 = vrot.slane %v10906_v26, 5 }
 0x152   : > { %8930 = vmatprep.mubr.bf16.mxu0 %v8037_v20  ;;  %v8041_v37 = vcombine.low %v3950_v42, %v3953_v24  ;;  %v3958_v8 = vrot.slane %v3956_v30, 4  ;;  %v3957_v58 = vsel %vm10165_vm14, %v8032_v18, %v3956_v30 }
 0x154   : > { %v3960_v4 = vsel %vm10165_vm14, %v3958_v8, %v3959_v25 }
 0x155   : > { %v8042_v3 = vcombine.low %v3957_v58, %v3960_v4 }
 0x159   : > { %8931 = vmatmul.mubr.bf16.gmra.mxu0 %v8038_v27 }
 0x15a   : > { %8934 = vmatprep.mubr.bf16.mxu0 %v8039_v49 }
 0x161   : > { %8935 = vmatmul.mubr.bf16.gmra.mxu0 %v8040_v63 }
 0x162   : > { %8938 = vmatprep.mubr.bf16.mxu0 %v8041_v37 }
 0x163   : > { %v8636_v54 = vpop.f32.mrf.mxu0 }
 0x164   : > { %v8672_v23 = vpop.f32.mrf.mxu1 }
 0x165   : > { %v1645_v43 = vadd.f32 %v8672_v23, %v8636_v54  ;;  %v1415_v52 = vpop.f32.mrf.mxu0 }
 0x166   : > { %v1636_v15 = vpop.f32.mrf.mxu1 }
 0x167   : > { %v1637_v44 = vadd.f32 %v1636_v15, %v1415_v52  ;;  %v8637_v19 = vpop.f32.mrf.mxu0 }
 0x168   : > { %v8673_v17 = vpop.f32.mrf.mxu1 }
 0x169   : > { %8939 = vmatmul.mubr.bf16.gmra.mxu0 %v8042_v3  ;;  %v1648_v50 = vadd.f32 %v8673_v17, %v8637_v19  ;;  %v1418_v26 = vpop.f32.mrf.mxu0 }
 0x16a   : > { %v1639_v35 = vpop.f32.mrf.mxu1 }
 0x16b   : > { %v10990_v34 = vadd.f32 %v1639_v35, %v1418_v26  ;;  %v8640_v39 = vpop.f32.mrf.mxu0 }
 0x16c   : > { %v8676_v22 = vpop.f32.mrf.mxu1 }
 0x16d   : > { %v10992_v45 = vadd.f32 %v8676_v22, %v8640_v39  ;;  %v1431_v57 = vpop.f32.mrf.mxu0 }
 0x16e   : > { %v1652_v7 = vpop.f32.mrf.mxu1 }
 0x16f   : > { %v10994_v62 = vadd.f32 %v1652_v7, %v1431_v57  ;;  %v8641_v21 = vpop.f32.mrf.mxu0 }
 0x170   : > { %v8677_v60 = vpop.f32.mrf.mxu1 }
 0x171   : > { %v10996_v38 = vadd.f32 %v8677_v60, %v8641_v21  ;;  %v1434_v47 = vpop.f32.mrf.mxu0 }
 0x172   : > { %v1655_v51 = vpop.f32.mrf.mxu1 }
 0x173   : > { %v10998_v12 = vadd.f32 %v1655_v51, %v1434_v47  ;;  %v8644_v48 = vpop.f32.mrf.mxu0 }
 0x174   : > { %v8680_v20 = vpop.f32.mrf.mxu1 }
 0x175   : > { %v11000_v10 = vadd.f32 %v8680_v20, %v8644_v48  ;;  %v1447_v46 = vpop.f32.mrf.mxu0 }
 0x176   : > { %v1668_v33 = vpop.f32.mrf.mxu1 }
 0x177   : > { %v11002_v55 = vadd.f32 %v1668_v33, %v1447_v46  ;;  %v8645_v14 = vpop.f32.mrf.mxu0 }
 0x178   : > { %v8681_v59 = vpop.f32.mrf.mxu1 }
 0x179   : > { %v11004_v5 = vadd.f32 %v8681_v59, %v8645_v14  ;;  %v1450_v28 = vpop.f32.mrf.mxu0 }
 0x17a   : > { %v1671_v13 = vpop.f32.mrf.mxu1 }
 0x17b   : > { %v11006_v16 = vadd.f32 %v1671_v13, %v1450_v28  ;;  %v8648_v27 = vpop.f32.mrf.mxu0 }
 0x17c   : > { %v8684_v31 = vpop.f32.mrf.mxu1 }
 0x17d   : > { %v11008_v49 = vadd.f32 %v8684_v31, %v8648_v27  ;;  %v1463_v41 = vpop.f32.mrf.mxu0 }
 0x17e   : > { %v1684_v2 = vpop.f32.mrf.mxu1 }
 0x17f   : > { %v11010_v40 = vadd.f32 %v1684_v2, %v1463_v41  ;;  %v8649_v53 = vpop.f32.mrf.mxu0 }
 0x180   : > { %v8685_v6 = vpop.f32.mrf.mxu1 }
 0x181   : > { %v11012_v32 = vadd.f32 %v8685_v6, %v8649_v53  ;;  %v1466_v36 = vpop.f32.mrf.mxu0 }
 0x182   : > { %v1687_v56 = vpop.f32.mrf.mxu1 }
 0x183   : > { %v11014_v30 = vadd.f32 %v1687_v56, %v1466_v36 }
 0x184   : > { %v8688_v42 = vpop.f32.mrf.mxu1 }
 0x185   : > { %v8652_v63 = vpop.f32.mrf.mxu0 }
 0x186   : > { %v1700_v24 = vpop.f32.mrf.mxu1  ;;  %v11016_v37 = vadd.f32 %v8688_v42, %v8652_v63 }
 0x187   : > { %v1479_v8 = vpop.f32.mrf.mxu0 }
 0x188   : > { %v8689_v18 = vpop.f32.mrf.mxu1  ;;  %v11018_v25 = vadd.f32 %v1700_v24, %v1479_v8 }
 0x189   : > { %v8653_v4 = vpop.f32.mrf.mxu0 }
 0x18a   : > { %v1703_v58 = vpop.f32.mrf.mxu1  ;;  %v11020_v54 = vadd.f32 %v8689_v18, %v8653_v4 }
 0x18b   : > { %v1482_v23 = vpop.f32.mrf.mxu0 }
 0x18c   : > { %v8744_v3 = vpop.f32.mrf.mxu1  ;;  %v11022_v52 = vadd.f32 %v1703_v58, %v1482_v23 }
 0x18e   : > { %v2224_v15 = vpop.f32.mrf.mxu1  ;;  %v8708_v19 = vpop.f32.mrf.mxu0 }
 0x18f   : > { %v2017_v17 = vadd.f32 %v8708_v19, %v1645_v43 }
 0x190   : > { %v8745_v26 = vpop.f32.mrf.mxu1  ;;  %v1936_v35 = vpop.f32.mrf.mxu0 }
 0x191   : > { %v2015_v39 = vadd.f32 %v1936_v35, %v1637_v44  ;;  %v11024_v22 = vadd.f32 %v8744_v3, %v2017_v17  ;;  %v4435_v35 = vld [vmem:[#allocation3 + $0xc] sm:$0x1] }
 0x192   : > { %v2227_v57 = vpop.f32.mrf.mxu1  ;;  %v8709_v7 = vpop.f32.mrf.mxu0 }
 0x193   : > { %v2018_v21 = vadd.f32 %v8709_v7, %v1648_v50  ;;  %v11026_v60 = vadd.f32 %v2224_v15, %v2015_v39 }
 0x194   : > { %v8748_v47 = vpop.f32.mrf.mxu1  ;;  %v1939_v51 = vpop.f32.mrf.mxu0 }
 0x195   : > { %v2016_v20 = vadd.f32 %v1939_v51, %v10990_v34  ;;  %v11029_v48 = vadd.f32 %v8745_v26, %v2018_v21 }
 0x196   : > { %v2240_v33 = vpop.f32.mrf.mxu1  ;;  %v8712_v46 = vpop.f32.mrf.mxu0 }
 0x197   : > { %v2021_v43 = vadd.f32 %v8712_v46, %v10992_v45  ;;  %v11032_v59 = vadd.f32 %v2227_v57, %v2016_v20 }
 0x198   : > { %v8749_v44 = vpop.f32.mrf.mxu1  ;;  %v1952_v14 = vpop.f32.mrf.mxu0 }
 0x199   : > { %v2019_v13 = vadd.f32 %v1952_v14, %v10994_v62  ;;  %v11035_v28 = vadd.f32 %v8748_v47, %v2021_v43 }
 0x19a   : > { %v2243_v50 = vpop.f32.mrf.mxu1  ;;  %v8713_v31 = vpop.f32.mrf.mxu0 }
 0x19b   : > { %v2022_v27 = vadd.f32 %v8713_v31, %v10996_v38  ;;  %v11038_v2 = vadd.f32 %v2240_v33, %v2019_v13  ;;  %v4432_v33 = vld [vmem:[#allocation3] sm:$0x1]  ;;  %v4465_v13 = vld [vmem:[#allocation3 + $0x14] sm:$0x1] }
 0x19c   : > { %v8752_v34 = vpop.f32.mrf.mxu1  ;;  %v1955_v41 = vpop.f32.mrf.mxu0 }
 0x19d   : > { %v2020_v6 = vadd.f32 %v1955_v41, %v10998_v12  ;;  %v11041_v53 = vadd.f32 %v8749_v44, %v2022_v27  ;;  %v4466_v27 = vsel %vm9658_vm4, 0, %v4465_v13 }
 0x19e   : > { %v2256_v45 = vpop.f32.mrf.mxu1  ;;  %v8716_v56 = vpop.f32.mrf.mxu0  ;;  %4467 = vst [vmem:[#allocation3 + $0x14] sm:$0x1] %v4466_v27 }
 0x19f   : > { %v2025_v36 = vadd.f32 %v8716_v56, %v11000_v10  ;;  %v11044_v42 = vadd.f32 %v2243_v50, %v2020_v6 }
 0x1a0   : > { %v8753_v62 = vpop.f32.mrf.mxu1  ;;  %v1968_v24 = vpop.f32.mrf.mxu0 }
 0x1a1   : > { %v2023_v63 = vadd.f32 %v1968_v24, %v11002_v55  ;;  %v11047_v18 = vadd.f32 %v8752_v34, %v2025_v36 }
 0x1a2   : > { %v2259_v38 = vpop.f32.mrf.mxu1  ;;  %v8717_v8 = vpop.f32.mrf.mxu0 }
 0x1a3   : > { %v2026_v58 = vadd.f32 %v8717_v8, %v11004_v5  ;;  %v11050_v4 = vadd.f32 %v2256_v45, %v2023_v63  ;;  %v4436_v5 = vsel %vm9643_vm2, 0, %v4435_v35 }
 0x1a4   : > { %v8756_v12 = vpop.f32.mrf.mxu1  ;;  %v1971_v3 = vpop.f32.mrf.mxu0  ;;  %4437 = vst [vmem:[#allocation3 + $0xc] sm:$0x1] %v4436_v5 }
 0x1a5   : > { %v2024_v23 = vadd.f32 %v1971_v3, %v11006_v16  ;;  %v11053_v15 = vadd.f32 %v8753_v62, %v2026_v58 }
 0x1a6   : > { %v2272_v10 = vpop.f32.mrf.mxu1  ;;  %v8720_v19 = vpop.f32.mrf.mxu0 }
 0x1a7   : > { %v2029_v17 = vadd.f32 %v8720_v19, %v11008_v49  ;;  %v11056_v26 = vadd.f32 %v2259_v38, %v2024_v23 }
 0x1a8   : > { %v8757_v55 = vpop.f32.mrf.mxu1  ;;  %v1984_v39 = vpop.f32.mrf.mxu0 }
 0x1a9   : > { %v2027_v57 = vadd.f32 %v1984_v39, %v11010_v40  ;;  %v11061_v7 = vadd.f32 %v8756_v12, %v2029_v17  ;;  %v4433_v40 = vsel %vm9643_vm2, 0, %v4432_v33 }
 0x1aa   : > { %v2275_v21 = vpop.f32.mrf.mxu1  ;;  %v8721_v16 = vpop.f32.mrf.mxu0  ;;  %4434 = vst [vmem:[#allocation3] sm:$0x1] %v4433_v40 }
 0x1ab   : > { %v2030_v47 = vadd.f32 %v8721_v16, %v11012_v32  ;;  %v11064_v51 = vadd.f32 %v2272_v10, %v2027_v57  ;;  %v4471_v10 = vld [vmem:[#allocation3 + $0x2c] sm:$0x1] }
 0x1ac   : > { %v8760_v49 = vpop.f32.mrf.mxu1  ;;  %v1987_v20 = vpop.f32.mrf.mxu0 }
 0x1ad   : > { %v2028_v46 = vadd.f32 %v1987_v20, %v11014_v30  ;;  %v11067_v43 = vadd.f32 %v8757_v55, %v2030_v47  ;;  %v4462_v30 = vld [vmem:[#allocation3 + $0x8] sm:$0x1] }
 0x1ae   : > { %v2288_v44 = vpop.f32.mrf.mxu1  ;;  %v4463_v56 = vsel %vm9658_vm4, 0, %v4462_v30 }
 0x1af   : > { %v8724_v14 = vpop.f32.mrf.mxu0  ;;  %v11072_v31 = vadd.f32 %v2275_v21, %v2028_v46  ;;  %4464 = vst [vmem:[#allocation3 + $0x8] sm:$0x1] %v4463_v56  ;;  %v4477_v56 = vld [vmem:[#allocation3 + $0x44] sm:$0x1] }
 0x1b0   : > { %v2033_v50 = vadd.f32 %v8724_v14, %v11016_v37  ;;  %v8761_v32 = vpop.f32.mrf.mxu1  ;;  %v4441_v37 = vld [vmem:[#allocation3 + $0x24] sm:$0x1]  ;;  %v4444_v14 = vld [vmem:[#allocation3 + $0x30] sm:$0x1] }
 0x1b1   : > { %v2000_v34 = vpop.f32.mrf.mxu0  ;;  %v4442_v38 = vsel %vm9643_vm2, 0, %v4441_v37 }
 0x1b2   : > { %v2031_v41 = vadd.f32 %v2000_v34, %v11018_v25  ;;  %v11077_v6 = vadd.f32 %v8760_v49, %v2033_v50  ;;  %v2291_v45 = vpop.f32.mrf.mxu1  ;;  %4443 = vst [vmem:[#allocation3 + $0x24] sm:$0x1] %v4442_v38  ;;  %v4438_v25 = vld [vmem:[#allocation3 + $0x18] sm:$0x1] }
 0x1b3   : > { %v8725_v36 = vpop.f32.mrf.mxu0  ;;  %v4439_v23 = vsel %vm9643_vm2, 0, %v4438_v25 }
 0x1b4   : > { %v2034_v62 = vadd.f32 %v8725_v36, %v11020_v54  ;;  %v11082_v24 = vadd.f32 %v2288_v44, %v2031_v41  ;;  %v11084_v63 = vpop.f32.mrf.mxu1  ;;  %4440 = vst [vmem:[#allocation3 + $0x18] sm:$0x1] %v4439_v23 }
 0x1b5   : > { %v2003_v8 = vpop.f32.mrf.mxu0 }
 0x1b6   : > { %v2032_v58 = vadd.f32 %v2003_v8, %v11022_v52  ;;  %v11089_v12 = vadd.f32 %v8761_v32, %v2034_v62  ;;  %v11091_v3 = vpop.f32.mrf.mxu1  ;;  %v4472_v52 = vsel %vm9658_vm4, 0, %v4471_v10 }
 0x1b7   : > { %v8780_v54 = vpop.f32.mrf.mxu0  ;;  %4473 = vst [vmem:[#allocation3 + $0x2c] sm:$0x1] %v4472_v52  ;;  %v4474_v52 = vld [vmem:[#allocation3 + $0x38] sm:$0x1] }
 0x1b8   : > { %v11095_v19 = vadd.f32 %v2291_v45, %v2032_v58  ;;  %v11098_v17 = vadd.f32 %v8780_v54, %v11024_v22  ;;  %v11100_v55 = vpop.f32.mrf.mxu1  ;;  %v4468_v22 = vld [vmem:[#allocation3 + $0x20] sm:$0x1] }
 0x1b9   : > { %v2701_v35 = vpop.f32.mrf.mxu0  ;;  %v4469_v49 = vsel %vm9658_vm4, 0, %v4468_v22 }
 0x1ba   : > { %v11105_v39 = vadd.f32 %v2701_v35, %v11026_v60  ;;  %v11107_v5 = vpop.f32.mrf.mxu1  ;;  %4470 = vst [vmem:[#allocation3 + $0x20] sm:$0x1] %v4469_v49  ;;  %v4447_v60 = vld [vmem:[#allocation3 + $0x3c] sm:$0x1]  ;;  %v3099_v11 = vadd.f32 %v11084_v63, %v11098_v17 }
 0x1bb   : > { %v8781_v57 = vpop.f32.mrf.mxu0  ;;  %v4448_v44 = vsel %vm9643_vm2, 0, %v4447_v60 }
 0x1bc   : > { %v11110_v21 = vadd.f32 %v8781_v57, %v11029_v48  ;;  %v11112_v16 = vpop.f32.mrf.mxu1  ;;  %4449 = vst [vmem:[#allocation3 + $0x3c] sm:$0x1] %v4448_v44  ;;  %v4475_v57 = vsel %vm9658_vm4, 0, %v4474_v52 }
 0x1bd   : > { %v2704_v47 = vpop.f32.mrf.mxu0  ;;  %4476 = vst [vmem:[#allocation3 + $0x38] sm:$0x1] %v4475_v57 }
 0x1be   : > { %v11117_v20 = vadd.f32 %v2704_v47, %v11032_v59  ;;  %v11119_v33 = vpop.f32.mrf.mxu1  ;;  %v4445_v59 = vsel %vm9643_vm2, 0, %v4444_v14  ;;  %v4453_v14 = vld [vmem:[#allocation3 + $0x54] sm:$0x1] }
 0x1bf   : > { %v8784_v46 = vpop.f32.mrf.mxu0  ;;  %4446 = vst [vmem:[#allocation3 + $0x30] sm:$0x1] %v4445_v59  ;;  %v4454_v59 = vsel %vm9643_vm2, 0, %v4453_v14 }
 0x1c0   : > { %v11124_v48 = vadd.f32 %v8784_v46, %v11035_v28  ;;  %v11126_v40 = vpop.f32.mrf.mxu1  ;;  %4455 = vst [vmem:[#allocation3 + $0x54] sm:$0x1] %v4454_v59  ;;  %v4480_v59 = vld [vmem:[#allocation3 + $0x50] sm:$0x1]  ;;  %v3098_v17 = vadd.f32 %v11107_v5, %v11117_v20 }
 0x1c1   : > { %v2717_v13 = vpop.f32.mrf.mxu0 }
 0x1c2   : > { %v11131_v50 = vadd.f32 %v2717_v13, %v11038_v2  ;;  %v11133_v32 = vpop.f32.mrf.mxu1  ;;  %v4478_v2 = vsel %vm9658_vm4, 0, %v4477_v56 }
 0x1c3   : > { %v8785_v27 = vpop.f32.mrf.mxu0  ;;  %4479 = vst [vmem:[#allocation3 + $0x44] sm:$0x1] %v4478_v2 }
 0x1c4   : > { %v11136_v34 = vadd.f32 %v8785_v27, %v11041_v53  ;;  %v11138_v28 = vpop.f32.mrf.mxu1 }
 0x1c5   : > { %v2720_v30 = vpop.f32.mrf.mxu0 }
 0x1c6   : > { %v11141_v41 = vadd.f32 %v2720_v30, %v11044_v42  ;;  %v11143_v45 = vpop.f32.mrf.mxu1 }
 0x1c7   : > { %v8788_v36 = vpop.f32.mrf.mxu0 }
 0x1c8   : > { %v11148_v37 = vadd.f32 %v8788_v36, %v11047_v18  ;;  %v11150_v62 = vpop.f32.mrf.mxu1 }
 0x1c9   : > { %v2733_v53 = vpop.f32.mrf.mxu0 }
 0x1ca   : > { %v11153_v38 = vadd.f32 %v2733_v53, %v11050_v4  ;;  %v11155_v8 = vpop.f32.mrf.mxu1  ;;  %v3107_v5 = vadd.f32 %v11138_v28, %v11148_v37 }
 0x1cb   : > { %v8789_v42 = vpop.f32.mrf.mxu0 }
 0x1cc   : > { %v11158_v25 = vadd.f32 %v8789_v42, %v11053_v15  ;;  %v11160_v58 = vpop.f32.mrf.mxu1 }
 0x1cd   : > { %v2736_v23 = vpop.f32.mrf.mxu0 }
 0x1ce   : > { %v11163_v54 = vadd.f32 %v2736_v23, %v11056_v26  ;;  %v3066_v18 = vpop.f32.mrf.mxu1  ;;  %v3108_v20 = vadd.f32 %v11150_v62, %v11158_v25 }
 0x1cf   : > { %v8792_v10 = vpop.f32.mrf.mxu0 }
 0x1d0   : > { %v11166_v35 = vadd.f32 %v8792_v10, %v11061_v7  ;;  %v8829_v4 = vpop.f32.mrf.mxu1 }
 0x1d1   : > { %v2749_v22 = vpop.f32.mrf.mxu0 }
 0x1d2   : > { %v2792_v15 = vadd.f32 %v2749_v22, %v11064_v51  ;;  %v3069_v47 = vpop.f32.mrf.mxu1 }
 0x1d3   : > { %v8793_v49 = vpop.f32.mrf.mxu0 }
 0x1d4   : > { %v2795_v60 = vadd.f32 %v8793_v49, %v11067_v43  ;;  %v11172_v26 = vadd.f32 %v3066_v18, %v2792_v15 }
 0x1d5   : > { %v2752_v46 = vpop.f32.mrf.mxu0 }
 0x1d6   : > { %v2793_v7 = vadd.f32 %v2752_v46, %v11072_v31  ;;  %v11175_v13 = vadd.f32 %v8829_v4, %v2795_v60 }
 0x1d7   : > { %v8796_v27 = vpop.f32.mrf.mxu0 }
 0x1d8   : > { %v8832_v44 = vpop.f32.mrf.mxu1  ;;  %v2798_v51 = vadd.f32 %v8796_v27, %v11077_v6  ;;  %v11180_v56 = vadd.f32 %v3069_v47, %v2793_v7 }
 0x1d9   : > { %v2765_v43 = vpop.f32.mrf.mxu0 }
 0x1da   : > { %v3082_v30 = vpop.f32.mrf.mxu1  ;;  %v2796_v2 = vadd.f32 %v2765_v43, %v11082_v24  ;;  %v11183_v53 = vadd.f32 %v8832_v44, %v2798_v51  ;;  %v4450_v24 = vld [vmem:[#allocation3 + $0x48] sm:$0x1]  ;;  %v4483_v44 = vld [vmem:[#allocation3 + $0x5c] sm:$0x1]  ;;  %v4459_v43 = vld [vmem:[#allocation3 + $0x6c] sm:$0x1] }
 0x1db   : > { %v8797_v42 = vpop.f32.mrf.mxu0  ;;  %v4484_v7 = vsel %vm9658_vm4, 0, %v4483_v44 }
 0x1dc   : > { %v8833_v36 = vpop.f32.mrf.mxu1  ;;  %v2799_v31 = vadd.f32 %v8797_v42, %v11089_v12  ;;  %v11186_v23 = vadd.f32 %v3082_v30, %v2796_v2  ;;  %v4451_v12 = vsel %vm9643_vm2, 0, %v4450_v24  ;;  %4485 = vst [vmem:[#allocation3 + $0x5c] sm:$0x1] %v4484_v7  ;;  %v4481_v30 = vsel %vm9658_vm4, 0, %v4480_v59  ;;  %v4489_v59 = vld [vmem:[#allocation3 + $0x74] sm:$0x1] }
 0x1dd   : > { %v2768_v10 = vpop.f32.mrf.mxu0  ;;  %4452 = vst [vmem:[#allocation3 + $0x48] sm:$0x1] %v4451_v12  ;;  %4482 = vst [vmem:[#allocation3 + $0x50] sm:$0x1] %v4481_v30  ;;  %v4460_v2 = vsel %vm9643_vm2, 0, %v4459_v43  ;;  %v4490_v43 = vsel %vm9658_vm4, 0, %v4489_v59 }
 0x1de   : > { %v3085_v18 = vpop.f32.mrf.mxu1  ;;  %v2797_v52 = vadd.f32 %v2768_v10, %v11095_v19  ;;  %v11189_v4 = vadd.f32 %v8833_v36, %v2799_v31  ;;  %4461 = vst [vmem:[#allocation3 + $0x6c] sm:$0x1] %v4460_v2  ;;  %v4456_v31 = vld [vmem:[#allocation3 + $0x60] sm:$0x1]  ;;  %4491 = vst [vmem:[#allocation3 + $0x74] sm:$0x1] %v4490_v43 }
 0x1df   : > { %v8852_v6 = vpop.f32.mrf.mxu0  ;;  %v4457_v10 = vsel %vm9643_vm2, 0, %v4456_v31  ;;  %v4486_v31 = vld [vmem:[#allocation3 + $0x68] sm:$0x1] }
 0x1e0   : > { %v11191_v57 = vadd.f32 %v3085_v18, %v2797_v52  ;;  %4458 = vst [vmem:[#allocation3 + $0x60] sm:$0x1] %v4457_v10  ;;  %v4487_v10 = vsel %vm9658_vm4, 0, %v4486_v31 }
 0x1e1   : > { %v3305_v15 = vpop.f32.mrf.mxu0  ;;  %4488 = vst [vmem:[#allocation3 + $0x68] sm:$0x1] %v4487_v10 }
 0x1e3   : > { %v11193_v22 = vpop.f32.mrf.mxu1  ;;  %v11199_v49 = vpop.f32.mrf.mxu0 }
 0x1e5   : > { %v11195_v47 = vpop.f32.mrf.mxu1  ;;  %v11203_v19 = vpop.f32.mrf.mxu0 }
 0x1e7   : > { %v11201_v60 = vpop.f32.mrf.mxu1  ;;  %v11207_v14 = vpop.f32.mrf.mxu0 }
 0x1e9   : > { %v11205_v46 = vpop.f32.mrf.mxu1  ;;  %v11211_v27 = vpop.f32.mrf.mxu0 }
 0x1eb   : > { %v11217_v36 = vpop.f32.mrf.mxu0 }
 0x1ed   : > { %v11215_v51 = vpop.f32.mrf.mxu1  ;;  %v3324_v18 = vpop.f32.mrf.mxu0 }
 0x1ef   : > { %v11221_v42 = vpop.f32.mrf.mxu1  ;;  %v8860_v24 = vpop.f32.mrf.mxu0 }
 0x1f1   : > { %v11225_v52 = vpop.f32.mrf.mxu1  ;;  %v11229_v44 = vpop.f32.mrf.mxu0 }
 0x1f2   : > { %12946 = vst [vmem:[#allocation9_spill] sm:$0xff] %v11225_v52 }
 0x1f3   : > { %v11227_v12 = vpop.f32.mrf.mxu1  ;;  %v8861_v30 = vpop.f32.mrf.mxu0 }
 0x1f4   : > { %12947 = vst [vmem:[#allocation10_spill] sm:$0xff] %v11227_v12 }
 0x1f5   : > { %v11231_v7 = vpop.f32.mrf.mxu1  ;;  %v3340_v29 = vpop.f32.mrf.mxu0 }
 0x1f6   : > { %12948 = vst [vmem:[#allocation11_spill] sm:$0xff] %v11231_v7 }
 0x1f7   : > { %v11235_v2 = vpop.f32.mrf.mxu1  ;;  %v8864_v9 = vpop.f32.mrf.mxu0 }
 0x1f8   : > { %12949 = vst [vmem:[#allocation12_spill] sm:$0xff] %v11235_v2 }
 0x1f9   : > { %v11239_v1 = vpop.f32.mrf.mxu1  ;;  %v3353_v0 = vpop.f32.mrf.mxu0 }
 0x1fa   : > { %v11242_v61 = vadd.f32 %v3353_v0, %v11172_v26  ;;  %v3097_v26 = vadd.f32 %v11091_v3, %v11105_v39  ;;  %v3101_v3 = vadd.f32 %v11119_v33, %v11131_v50  ;;  %v3104_v39 = vadd.f32 %v11126_v40, %v11136_v34 }
 0x1fb   : > { %v8865_v7 = vpop.f32.mrf.mxu0  ;;  %v11244_v12 = vpop.f32.mrf.mxu1  ;;  %v3385_v33 = vadd.f32 %v11203_v19, %v3098_v17  ;;  %v3106_v40 = vadd.f32 %v11155_v8, %v11163_v54  ;;  %v3111_v50 = vadd.f32 %v11160_v58, %v11166_v35  ;;  %v3394_v58 = vadd.f32 %v8860_v24, %v3107_v5  ;;  %v12952_v24 = vld [vmem:[#allocation9_spill] sm:$0xff] }
 0x1fc   : > { %12950 = vst [vmem:[#allocation13_spill] sm:$0xff] %v11242_v61  ;;  %v11247_v59 = vadd.f32 %v8865_v7, %v11175_v13  ;;  %v3386_v61 = vadd.f32 %v8852_v6, %v3099_v11  ;;  %v3391_v37 = vadd.f32 %v11217_v36, %v3104_v39 }
 0x1fd   : > { %v3356_v43 = vpop.f32.mrf.mxu0  ;;  %v3398_v19 = vadd.f32 %v8864_v9, %v3111_v50 }
 0x1fe   : > { %v11250_v2 = vadd.f32 %v3356_v43, %v11180_v56  ;;  %v3100_v56 = vadd.f32 %v11100_v55, %v11110_v21  ;;  %v3384_v43 = vadd.f32 %v3305_v15, %v3097_v26  ;;  %v3102_v55 = vadd.f32 %v11133_v32, %v11141_v41 }
 0x1ff   : > { %v8868_v52 = vpop.f32.mrf.mxu0  ;;  %v11254_v31 = vpop.f32.mrf.mxu1  ;;  %v3863_v21 = vadd.f32 %v11193_v22, %v3386_v61  ;;  %v11294_v61 = vld [vmem:[%s12888_s4] ss:$0 sm:$0xff]  ;;  %v3395_v15 = vadd.f32 %v8861_v30, %v3108_v20  ;;  %v3868_v11 = vadd.f32 %v12952_v24, %v3391_v37 }
 0x200   : > { %12951 = vst [vmem:[#allocation14_spill] sm:$0xff] %v11250_v2  ;;  %v11257_v10 = vadd.f32 %v8868_v52, %v11183_v53  ;;  %v3103_v53 = vadd.f32 %v11112_v16, %v11124_v48  ;;  %v3105_v16 = vadd.f32 %v11143_v45, %v11153_v38  ;;  %v3861_v32 = vadd.f32 %v11195_v47, %v3384_v43  ;;  %v11307_v38 = vld [vmem:[%s12889_s5] ss:$0 sm:$0xff] }
 0x201   : > { %v3369_v0 = vpop.f32.mrf.mxu0  ;;  %v3830_v2 = vpop.f32.mrf.mxu1  ;;  %v3388_v45 = vadd.f32 %v11211_v27, %v3101_v3  ;;  %v3389_v62 = vadd.f32 %v3324_v18, %v3102_v55  ;;  %v3393_v47 = vadd.f32 %v3340_v29, %v3106_v40  ;;  %v12954_v30 = vld [vmem:[#allocation11_spill] sm:$0xff]  ;;  %v11336_v3 = vadd.f32 %v11254_v31, %v3398_v19 }
 0x202   : > { %v11262_v13 = vadd.f32 %v3369_v0, %v11186_v23  ;;  %v3390_v41 = vadd.f32 %v11207_v14, %v3103_v53  ;;  %v3392_v22 = vadd.f32 %v11229_v44, %v3105_v16  ;;  %v12953_v0 = vld [vmem:[#allocation10_spill] sm:$0xff]  ;;  %v11322_v29 = vadd.f32 %v12954_v30, %v3394_v58 }
 0x203   : > { %v8869_v7 = vpop.f32.mrf.mxu0  ;;  %v8901_v34 = vpop.f32.mrf.mxu1  ;;  %v3865_v52 = vadd.f32 %v11221_v42, %v3388_v45  ;;  %v11333_v42 = vadd.f32 %v11244_v12, %v3393_v47 }
 0x204   : > { %v11267_v63 = vadd.f32 %v8869_v7, %v11189_v4  ;;  %v3387_v4 = vadd.f32 %v11199_v49, %v3100_v56  ;;  %v12955_v56 = vld [vmem:[#allocation12_spill] sm:$0xff]  ;;  %v11343_v16 = vadd.f32 %v8901_v34, %v11247_v59 }
 0x205   : > { %v3372_v23 = vpop.f32.mrf.mxu0  ;;  %v3833_v14 = vpop.f32.mrf.mxu1  ;;  %v11327_v43 = vadd.f32 %v12955_v56, %v3392_v22 }
 0x206   : > { %v11282_v6 = vadd.f32 %v3372_v23, %v11191_v57  ;;  %v3864_v25 = vadd.f32 %v11201_v60, %v3387_v4  ;;  %v3862_v57 = vadd.f32 %v11205_v46, %v3385_v33  ;;  %v3867_v60 = vadd.f32 %v11215_v51, %v3390_v41  ;;  %v12956_v4 = vld [vmem:[#allocation13_spill] sm:$0xff] }
 0x207   : > { %v11319_v46 = vadd.f32 %v12953_v0, %v3389_v62  ;;  %v11330_v51 = vadd.f32 %v11239_v1, %v3395_v15  ;;  %v8904_v39 = vpop.f32.mrf.mxu1  ;;  %v11340_v5 = vadd.f32 %v3830_v2, %v12956_v4  ;;  %v12957_v33 = vld [vmem:[#allocation14_spill] sm:$0xff] }
 0x209   : > { %v8924_v48 = vpop.f32.mrf.mxu0 }
 0x20a   : > { %v4180_v28 = vadd.f32 %v8924_v48, %v3863_v21  ;;  %v11347_v48 = vadd.f32 %v3833_v14, %v12957_v33 }
 0x20b   : > { %v4099_v8 = vpop.f32.mrf.mxu0 }
 0x20c   : > { %v4207_v54 = vmul.f32 %v11294_v61, %v4180_v28  ;;  %v4178_v35 = vadd.f32 %v4099_v8, %v3861_v32  ;;  %v11350_v32 = vadd.f32 %v8904_v39, %v11257_v10 }
 0x20d   : > { %v8925_v49 = vpop.f32.mrf.mxu0 }
 0x20e   : > { %v4234_v27 = vadd.f32 %v11307_v38, %v4207_v54  ;;  %v4205_v36 = vmul.f32 %v11294_v61, %v4178_v35  ;;  %v4181_v18 = vadd.f32 %v8925_v49, %v3864_v25 }
 0x20f   : > { %v4102_v44 = vpop.f32.mrf.mxu0 }
 0x210   : > { %v4274_v9 = vmul.f32 0.044715, %v4234_v27  ;;  %v4232_v26 = vadd.f32 %v11307_v38, %v4205_v36  ;;  %v4208_v7 = vmul.f32 %v11294_v61, %v4181_v18  ;;  %v4179_v17 = vadd.f32 %v4102_v44, %v3862_v57 }
 0x211   : > { %v8928_v53 = vpop.f32.mrf.mxu0  ;;  %v11354_v8 = vmul.f32 0.5, %v4234_v27 }
 0x212   : > { %v4294_v23 = vmul.f32 %v4274_v9, %v4234_v27  ;;  %v4272_v55 = vmul.f32 0.044715, %v4232_v26  ;;  %v4235_v21 = vadd.f32 %v11307_v38, %v4208_v7  ;;  %v4206_v1 = vmul.f32 %v11294_v61, %v4179_v17 }
 0x213   : > { %v4184_v12 = vadd.f32 %v8928_v53, %v3867_v60  ;;  %v4115_v20 = vpop.f32.mrf.mxu0  ;;  %v11359_v47 = vmul.f32 0.5, %v4232_v26 }
 0x214   : > { %v4314_v31 = vmul.f32 %v4294_v23, %v4234_v27  ;;  %v4292_v40 = vmul.f32 %v4272_v55, %v4232_v26  ;;  %v4275_v50 = vmul.f32 0.044715, %v4235_v21  ;;  %v4233_v28 = vadd.f32 %v11307_v38, %v4206_v1 }
 0x215   : > { %v4211_v2 = vmul.f32 %v11294_v61, %v4184_v12  ;;  %v4182_v41 = vadd.f32 %v4115_v20, %v3865_v52  ;;  %v8929_v59 = vpop.f32.mrf.mxu0  ;;  %v11363_v52 = vmul.f32 0.5, %v4235_v21 }
 0x216   : > { %v4334_v34 = vadd.f32 %v4314_v31, %v4234_v27  ;;  %v4312_v45 = vmul.f32 %v4292_v40, %v4232_v26  ;;  %v4295_v37 = vmul.f32 %v4275_v50, %v4235_v21  ;;  %v4185_v62 = vadd.f32 %v8929_v59, %v3868_v11 }
 0x217   : > { %v4273_v25 = vmul.f32 0.044715, %v4233_v28  ;;  %v4238_v58 = vadd.f32 %v11307_v38, %v4211_v2  ;;  %v4209_v54 = vmul.f32 %v11294_v61, %v4182_v41  ;;  %v4118_v35 = vpop.f32.mrf.mxu0  ;;  %v11365_v9 = vmul.f32 0.5, %v4233_v28 }
 0x218   : > { %v4354_v10 = vmul.f32 0.7978846, %v4334_v34  ;;  %v4332_v57 = vadd.f32 %v4312_v45, %v4232_v26  ;;  %v4315_v22 = vmul.f32 %v4295_v37, %v4235_v21  ;;  %v4212_v15 = vmul.f32 %v11294_v61, %v4185_v62 }
 0x219   : > { %v4293_v49 = vmul.f32 %v4273_v25, %v4233_v28  ;;  %v4278_v19 = vmul.f32 0.044715, %v4238_v58  ;;  %v4236_v14 = vadd.f32 %v11307_v38, %v4209_v54  ;;  %v8932_v36 = vpop.f32.mrf.mxu0  ;;  %v4183_v53 = vadd.f32 %v4118_v35, %v11319_v46 }
 0x21a   : > { %9376 = vtanh.f32 %v4354_v10  ;;  %v4352_v27 = vmul.f32 0.7978846, %v4332_v57  ;;  %v4335_v18 = vadd.f32 %v4315_v22, %v4235_v21  ;;  %v4239_v60 = vadd.f32 %v11307_v38, %v4212_v15 }
 0x21b   : > { %v4313_v24 = vmul.f32 %v4293_v49, %v4233_v28  ;;  %v4298_v11 = vmul.f32 %v4278_v19, %v4238_v58  ;;  %v4276_v0 = vmul.f32 0.044715, %v4236_v14  ;;  %v4131_v44 = vpop.f32.mrf.mxu0  ;;  %v4188_v55 = vadd.f32 %v8932_v36, %v11322_v29 }
 0x21c   : > { %9378 = vtanh.f32 %v4352_v27  ;;  %v4355_v30 = vmul.f32 0.7978846, %v4335_v18  ;;  %v4279_v26 = vmul.f32 0.044715, %v4239_v60  ;;  %v4186_v21 = vadd.f32 %v4131_v44, %v11327_v43 }
 0x21d   : > { %v4333_v7 = vadd.f32 %v4313_v24, %v4233_v28  ;;  %v4318_v56 = vmul.f32 %v4298_v11, %v4238_v58  ;;  %v4296_v17 = vmul.f32 %v4276_v0, %v4236_v14  ;;  %v8933_v39 = vpop.f32.mrf.mxu0  ;;  %v4210_v20 = vmul.f32 %v11294_v61, %v4183_v53 }
 0x21e   : > { %9380 = vtanh.f32 %v4355_v30  ;;  %v4299_v23 = vmul.f32 %v4279_v26, %v4239_v60  ;;  %v4215_v40 = vmul.f32 %v11294_v61, %v4188_v55  ;;  %v4213_v50 = vmul.f32 %v11294_v61, %v4186_v21 }
 0x21f   : > { %v4353_v4 = vmul.f32 0.7978846, %v4333_v7  ;;  %v4338_v1 = vadd.f32 %v4318_v56, %v4238_v58  ;;  %v4316_v12 = vmul.f32 %v4296_v17, %v4236_v14  ;;  %v4134_v33 = vpop.f32.mrf.mxu0  ;;  %v4189_v46 = vadd.f32 %v8933_v39, %v11330_v51 }
 0x220   : > { %v4319_v31 = vmul.f32 %v4299_v23, %v4239_v60  ;;  %v4237_v29 = vadd.f32 %v11307_v38, %v4210_v20  ;;  %v4242_v43 = vadd.f32 %v11307_v38, %v4215_v40  ;;  %v4240_v59 = vadd.f32 %v11307_v38, %v4213_v50 }
 0x221   : > { %9382 = vtanh.f32 %v4353_v4  ;;  %v4358_v28 = vmul.f32 0.7978846, %v4338_v1  ;;  %v4336_v2 = vadd.f32 %v4316_v12, %v4236_v14  ;;  %v4216_v34 = vmul.f32 %v11294_v61, %v4189_v46  ;;  %v8936_v25 = vpop.f32.mrf.mxu0 }
 0x222   : > { %v4339_v41 = vadd.f32 %v4319_v31, %v4239_v60  ;;  %v11378_v45 = vmul.f32 0.5, %v4238_v58  ;;  %v4277_v62 = vmul.f32 0.044715, %v4237_v29  ;;  %v11380_v54 = vmul.f32 0.5, %v4236_v14 }
 0x223   : > { %9384 = vtanh.f32 %v4358_v28  ;;  %v4356_v37 = vmul.f32 0.7978846, %v4336_v2  ;;  %v11382_v51 = vmul.f32 0.5, %v4239_v60  ;;  %v4282_v10 = vmul.f32 0.044715, %v4242_v43 }
 0x224   : > { %v4359_v35 = vmul.f32 0.7978846, %v4339_v41  ;;  %v4297_v57 = vmul.f32 %v4277_v62, %v4237_v29  ;;  %v4280_v22 = vmul.f32 0.044715, %v4240_v59  ;;  %v11385_v15 = vadd.f32 %v11307_v38, %v4216_v34 }
 0x225   : > { %9386 = vtanh.f32 %v4356_v37  ;;  %v4302_v49 = vmul.f32 %v4282_v10, %v4242_v43  ;;  %v4187_v58 = vadd.f32 %v4134_v33, %v11333_v42  ;;  %v4192_v19 = vadd.f32 %v8936_v25, %v11336_v3  ;;  %v4759_v10 = vld [vmem:[#allocation3 + $0xc] sm:$0xf] }
 0x226   : > { %9388 = vtanh.f32 %v4359_v35  ;;  %v11389_v27 = vmul.f32 0.5, %v4237_v29  ;;  %v4317_v14 = vmul.f32 %v4297_v57, %v4237_v29  ;;  %v4300_v18 = vmul.f32 %v4280_v22, %v4240_v59 }
 0x227   : > { %v9377_v36 = vpop.eup %9376  ;;  %v4283_v60 = vmul.f32 0.044715, %v11385_v15  ;;  %v11392_v11 = vmul.f32 0.5, %v4242_v43  ;;  %v4322_v0 = vmul.f32 %v4302_v49, %v4242_v43  ;;  %v4214_v44 = vmul.f32 %v11294_v61, %v4187_v58 }
 0x228   : > { %v4394_v24 = vadd.f32 1.0, %v9377_v36  ;;  %v4337_v26 = vadd.f32 %v4317_v14, %v4237_v29  ;;  %v4320_v7 = vmul.f32 %v4300_v18, %v4240_v59  ;;  %v4219_v3 = vmul.f32 %v11294_v61, %v4192_v19 }
 0x229   : > { %v9379_v30 = vpop.eup %9378  ;;  %v4303_v42 = vmul.f32 %v4283_v60, %v11385_v15  ;;  %v4342_v53 = vadd.f32 %v4322_v0, %v4242_v43  ;;  %v11398_v39 = vmul.f32 0.5, %v4240_v59  ;;  %v11402_v1 = vadd.f32 %v11307_v38, %v4214_v44  ;;  %v4752_v60 = vld [vmem:[#allocation3] sm:$0xf] }
 0x22a   : > { %v4414_v56 = vmul.f32 %v4394_v24, %v11354_v8  ;;  %v4392_v17 = vadd.f32 1.0, %v9379_v30  ;;  %v4357_v55 = vmul.f32 0.7978846, %v4337_v26  ;;  %v4340_v21 = vadd.f32 %v4320_v7, %v4240_v59  ;;  %v4812_v26 = vld [vmem:[#allocation3 + $0x68] sm:$0x1] }
 0x22b   : > { %v9381_v23 = vpop.eup %9380  ;;  %v4323_v4 = vmul.f32 %v4303_v42, %v11385_v15  ;;  %v4362_v31 = vmul.f32 0.7978846, %v4342_v53  ;;  %v11407_v50 = vadd.f32 %v11307_v38, %v4219_v3 }
 0x22c   : > { %v8255_v12 = vpack.c.bf16 %v4414_v56, %v4414_v56  ;;  %v4412_v20 = vmul.f32 %v4392_v17, %v11359_v47  ;;  %v4395_v33 = vadd.f32 1.0, %v9381_v23  ;;  %9390 = vtanh.f32 %v4357_v55  ;;  %v4147_v56 = vpop.f32.mrf.mxu0  ;;  %v4763_v17 = vld [vmem:[#allocation3 + $0x14] sm:$0x1] }
 0x22d   : > { %v4360_v40 = vmul.f32 0.7978846, %v4340_v21  ;;  %v4343_v8 = vadd.f32 %v4323_v4, %v11385_v15  ;;  %9392 = vtanh.f32 %v4362_v31  ;;  %v4281_v47 = vmul.f32 0.044715, %v11402_v1 }
 0x22e   : > { %v9383_v46 = vpop.eup %9382  ;;  %v4570_v28 = vshrl.u32 %v8255_v12, 16  ;;  %v4573_v2 = vshll.u32 %v8255_v12, 16  ;;  %v8253_v29 = vpack.c.bf16 %v4412_v20, %v4412_v20  ;;  %v4415_v41 = vmul.f32 %v4395_v33, %v11363_v52 }
 0x22f   : > { %v4393_v43 = vadd.f32 1.0, %v9383_v46  ;;  %v4363_v59 = vmul.f32 0.7978846, %v4343_v8  ;;  %9394 = vtanh.f32 %v4360_v40  ;;  %v4301_v49 = vmul.f32 %v4281_v47, %v11402_v1 }
 0x230   : > { %v9385_v34 = vpop.eup %9384  ;;  %v4572_v37 = vrot.slane %v4570_v28, 7  ;;  %v4553_v62 = vshrl.u32 %v8253_v29, 16  ;;  %v4556_v25 = vshll.u32 %v8253_v29, 16  ;;  %v8256_v35 = vpack.c.bf16 %v4415_v41, %v4415_v41  ;;  %v4756_v41 = vld [vmem:[#allocation3 + $0x8] sm:$0x1] }
 0x231   : > { %v4413_v57 = vmul.f32 %v4393_v43, %v11365_v9  ;;  %v4398_v22 = vadd.f32 1.0, %v9385_v34  ;;  %9396 = vtanh.f32 %v4363_v59  ;;  %v11424_v43 = vpop.f32.mrf.mxu0 }
 0x232   : > { %v9387_v58 = vpop.eup %9386  ;;  %v4575_v19 = vor.u32 %v4573_v2, %v4572_v37  ;;  %v4576_v52 = vrot.slane %v4572_v37, 4  ;;  %v4555_v36 = vrot.slane %v4553_v62, 7  ;;  %v4578_v14 = vshrl.u32 %v8256_v35, 16 }
 0x233   : > { %v9389_v18 = vpop.eup %9388  ;;  %v4581_v24 = vshll.u32 %v8256_v35, 16  ;;  %v8254_v0 = vpack.c.bf16 %v4413_v57, %v4413_v57  ;;  %v4418_v44 = vmul.f32 %v4398_v22, %v11378_v45  ;;  %v4396_v30 = vadd.f32 1.0, %v9387_v58  ;;  %v4773_v35 = vld [vmem:[#allocation3 + $0x24] sm:$0xf] }
 0x234   : > { %v4760_v7 = vsel %vm9737_vm7, %v4575_v19, %v4759_v10  ;;  %v4558_v9 = vor.u32 %v4556_v25, %v4555_v36  ;;  %v4559_v42 = vrot.slane %v4555_v36, 4  ;;  %v4580_v3 = vrot.slane %v4578_v14, 7 }
 0x235   : > { %4761 = vst [vmem:[#allocation3 + $0xc] sm:$0xf] %v4760_v7  ;;  %v4561_v53 = vshrl.u32 %v8254_v0, 16  ;;  %v4564_v23 = vshll.u32 %v8254_v0, 16  ;;  %v8259_v55 = vpack.c.bf16 %v4418_v44, %v4418_v44  ;;  %v4416_v21 = vmul.f32 %v4396_v30, %v11380_v54 }
 0x236   : > { %v4753_v4 = vsel %vm9737_vm7, %v4558_v9, %v4752_v60  ;;  %v4583_v12 = vor.u32 %v4581_v24, %v4580_v3  ;;  %v4585_v45 = vrot.slane %v4580_v3, 4  ;;  %v4399_v20 = vadd.f32 1.0, %v9389_v18  ;;  %v4150_v24 = vpop.f32.mrf.mxu0 }
 0x237   : > { %4754 = vst [vmem:[#allocation3] sm:$0xf] %v4753_v4  ;;  %v4563_v33 = vrot.slane %v4561_v53, 7  ;;  %v4604_v31 = vshrl.u32 %v8259_v55, 16  ;;  %v4607_v40 = vshll.u32 %v8259_v55, 16  ;;  %v8257_v8 = vpack.c.bf16 %v4416_v21, %v4416_v21 }
 0x238   : > { %v4584_v28 = vsel %vm9752_vm8, %v4576_v52, %v4583_v12  ;;  %v4764_v29 = vsel %vm9643_vm2, %v4585_v45, %v4763_v17  ;;  %v4419_v54 = vmul.f32 %v4399_v20, %v11382_v51  ;;  %v11427_v57 = vmul.f32 0.5, %v11385_v15  ;;  %v4777_v17 = vld [vmem:[#allocation3 + $0x2c] sm:$0x1] }
 0x239   : > { %4762 = vst [vmem:[#allocation3 + $0x10] sm:$0xf] %v4584_v28  ;;  %4765 = vst [vmem:[#allocation3 + $0x14] sm:$0x1] %v4764_v29  ;;  %v4566_v47 = vor.u32 %v4564_v23, %v4563_v33  ;;  %v4568_v34 = vrot.slane %v4563_v33, 4  ;;  %v4606_v37 = vrot.slane %v4604_v31, 7  ;;  %v9391_v25 = vpop.eup %9390  ;;  %v4321_v22 = vmul.f32 %v4301_v49, %v11402_v1  ;;  %v8940_v33 = vpop.f32.mrf.mxu0 }
 0x23a   : > { %v4587_v62 = vshrl.u32 %v8257_v8, 16  ;;  %v8260_v10 = vpack.c.bf16 %v4419_v54, %v4419_v54  ;;  %v4190_v58 = vadd.f32 %v4147_v56, %v11340_v5  ;;  %v4590_v52 = vshll.u32 %v8257_v8, 16  ;;  %v9393_v36 = vpop.eup %9392  ;;  %v4766_v49 = vld [vmem:[#allocation3 + $0x18] sm:$0xf]  ;;  %v3846_v8 = vpop.f32.mrf.mxu1 }
 0x23b   : > { %v4567_v51 = vsel %vm9752_vm8, %v4559_v42, %v4566_v47  ;;  %v4757_v59 = vsel %vm9643_vm2, %v4568_v34, %v4756_v41  ;;  %v4609_v19 = vor.u32 %v4607_v40, %v4606_v37  ;;  %v4610_v14 = vrot.slane %v4606_v37, 4 }
 0x23c   : > { %4755 = vst [vmem:[#allocation3 + $0x4] sm:$0xf] %v4567_v51  ;;  %4758 = vst [vmem:[#allocation3 + $0x8] sm:$0x1] %v4757_v59  ;;  %v11435_v18 = vrot.slane %v4587_v62, 7  ;;  %v4612_v15 = vshrl.u32 %v8260_v10, 16  ;;  %v4341_v44 = vadd.f32 %v4321_v22, %v11402_v1  ;;  %v9395_v7 = vpop.eup %9394 }
 0x23d   : > { %v4397_v60 = vadd.f32 1.0, %v9391_v25  ;;  %v4774_v5 = vsel %vm9737_vm7, %v4609_v19, %v4773_v35  ;;  %v4402_v0 = vadd.f32 1.0, %v9393_v36  ;;  %v4286_v30 = vmul.f32 0.044715, %v11407_v50  ;;  %v4770_v51 = vld [vmem:[#allocation3 + $0x20] sm:$0x1] }
 0x23e   : > { %4775 = vst [vmem:[#allocation3 + $0x24] sm:$0xf] %v4774_v5  ;;  %v4592_v9 = vor.u32 %v4590_v52, %v11435_v18  ;;  %v4614_v42 = vrot.slane %v4612_v15, 7  ;;  %v4615_v3 = vshll.u32 %v8260_v10, 16  ;;  %v4400_v23 = vadd.f32 1.0, %v9395_v7  ;;  %v4163_v10 = vpop.f32.mrf.mxu0  ;;  %v9397_v22 = vpop.eup %9396 }
 0x23f   : > { %v4417_v56 = vmul.f32 %v4397_v60, %v11389_v27  ;;  %v4422_v53 = vmul.f32 %v4402_v0, %v11392_v11  ;;  %v4361_v55 = vmul.f32 0.7978846, %v4341_v44  ;;  %v4306_v21 = vmul.f32 %v4286_v30, %v11407_v50  ;;  %v4787_v60 = vld [vmem:[#allocation3 + $0x3c] sm:$0xf] }
 0x240   : > { %v4767_v4 = vsel %vm9737_vm7, %v4592_v9, %v4766_v49  ;;  %v4617_v12 = vor.u32 %v4615_v3, %v4614_v42  ;;  %v4619_v45 = vrot.slane %v4614_v42, 4  ;;  %v4420_v40 = vmul.f32 %v4400_v23, %v11398_v39  ;;  %v8941_v7 = vpop.f32.mrf.mxu0 }
 0x241   : > { %v8258_v20 = vpack.c.bf16 %v4417_v56, %v4417_v56  ;;  %4768 = vst [vmem:[#allocation3 + $0x18] sm:$0xf] %v4767_v4  ;;  %v8263_v31 = vpack.c.bf16 %v4422_v53, %v4422_v53  ;;  %9398 = vtanh.f32 %v4361_v55  ;;  %v4326_v27 = vmul.f32 %v4306_v21, %v11407_v50 }
 0x242   : > { %v4593_v11 = vrot.slane %v11435_v18, 4  ;;  %v4618_v28 = vsel %vm9752_vm8, %v4610_v14, %v4617_v12  ;;  %v4778_v29 = vsel %vm9643_vm2, %v4619_v45, %v4777_v17  ;;  %v8261_v34 = vpack.c.bf16 %v4420_v40, %v4420_v40  ;;  %v8905_v14 = vpop.f32.mrf.mxu1 }
 0x243   : > { %v4595_v41 = vshrl.u32 %v8258_v20, 16  ;;  %4776 = vst [vmem:[#allocation3 + $0x28] sm:$0xf] %v4618_v28  ;;  %4779 = vst [vmem:[#allocation3 + $0x2c] sm:$0x1] %v4778_v29  ;;  %v4598_v54 = vshll.u32 %v8258_v20, 16  ;;  %v4346_v39 = vadd.f32 %v4326_v27, %v11407_v50  ;;  %v4217_v25 = vmul.f32 %v11294_v61, %v4190_v58 }
 0x244   : > { %v4638_v47 = vshrl.u32 %v8263_v31, 16  ;;  %v4641_v62 = vshll.u32 %v8263_v31, 16  ;;  %v4193_v35 = vadd.f32 %v11424_v43, %v11343_v16  ;;  %v4621_v19 = vshrl.u32 %v8261_v34, 16 }
 0x245   : > { %v4597_v37 = vrot.slane %v4595_v41, 7  ;;  %v4366_v52 = vmul.f32 0.7978846, %v4346_v39  ;;  %v4191_v36 = vadd.f32 %v4150_v24, %v11347_v48  ;;  %v4403_v5 = vadd.f32 1.0, %v9397_v22  ;;  %v4780_v24 = vld [vmem:[#allocation3 + $0x30] sm:$0xf] }
 0x246   : > { %v11458_v59 = vrot.slane %v4638_v47, 7  ;;  %v11462_v49 = vadd.f32 %v11307_v38, %v4217_v25  ;;  %v11465_v16 = vrot.slane %v4621_v19, 7  ;;  %v4624_v43 = vshll.u32 %v8261_v34, 16  ;;  %v4791_v41 = vld [vmem:[#allocation3 + $0x44] sm:$0x1] }
 0x247   : > { %v4600_v18 = vor.u32 %v4598_v54, %v4597_v37  ;;  %v4602_v15 = vrot.slane %v4597_v37, 4  ;;  %9400 = vtanh.f32 %v4366_v52  ;;  %v3877_v0 = vadd.f32 %v3846_v8, %v11262_v13  ;;  %v3849_v8 = vpop.f32.mrf.mxu1 }
 0x248   : > { %v4643_v58 = vor.u32 %v4641_v62, %v11458_v59  ;;  %v4423_v30 = vmul.f32 %v4403_v5, %v11427_v57  ;;  %v3880_v9 = vadd.f32 %v8905_v14, %v11267_v63  ;;  %v4626_v3 = vor.u32 %v4624_v43, %v11465_v16 }
 0x249   : > { %v4601_v44 = vsel %vm9752_vm8, %v4593_v11, %v4600_v18  ;;  %v4771_v48 = vsel %vm9643_vm2, %v4602_v15, %v4770_v51  ;;  %v4284_v13 = vmul.f32 0.044715, %v11462_v49  ;;  %v4220_v17 = vmul.f32 %v11294_v61, %v4193_v35 }
 0x24a   : > { %4769 = vst [vmem:[#allocation3 + $0x1c] sm:$0xf] %v4601_v44  ;;  %4772 = vst [vmem:[#allocation3 + $0x20] sm:$0x1] %v4771_v48  ;;  %v4788_v42 = vsel %vm9737_vm7, %v4643_v58, %v4787_v60  ;;  %v8264_v56 = vpack.c.bf16 %v4423_v30, %v4423_v30  ;;  %v4218_v53 = vmul.f32 %v11294_v61, %v4191_v36  ;;  %v4261_v12 = vmul.f32 0.5, %v11402_v1 }
 0x24b   : > { %4789 = vst [vmem:[#allocation3 + $0x3c] sm:$0xf] %v4788_v42  ;;  %v4196_v57 = vadd.f32 %v8940_v33, %v11350_v32  ;;  %v4781_v63 = vsel %vm9737_vm7, %v4626_v3, %v4780_v24  ;;  %v4304_v23 = vmul.f32 %v4284_v13, %v11462_v49  ;;  %v4194_v55 = vadd.f32 %v4163_v10, %v3877_v0 }
 0x24c   : > { %v4197_v21 = vadd.f32 %v8941_v7, %v3880_v9  ;;  %4782 = vst [vmem:[#allocation3 + $0x30] sm:$0xf] %v4781_v63  ;;  %v4646_v4 = vshrl.u32 %v8264_v56, 16  ;;  %v11486_v45 = vadd.f32 %v11307_v38, %v4220_v17  ;;  %v11489_v20 = vadd.f32 %v11307_v38, %v4218_v53 }
 0x24d   : > { %v4644_v31 = vrot.slane %v11458_v59, 4  ;;  %v4324_v32 = vmul.f32 %v4304_v23, %v11462_v49  ;;  %v4223_v33 = vmul.f32 %v11294_v61, %v4196_v57  ;;  %v4221_v40 = vmul.f32 %v11294_v61, %v4194_v55  ;;  %v4784_v57 = vld [vmem:[#allocation3 + $0x38] sm:$0x1] }
 0x24e   : > { %v9399_v27 = vpop.eup %9398  ;;  %v4648_v11 = vrot.slane %v4646_v4, 7  ;;  %v4649_v28 = vshll.u32 %v8264_v56, 16  ;;  %v4287_v1 = vmul.f32 0.044715, %v11486_v45  ;;  %v4224_v29 = vmul.f32 %v11294_v61, %v4197_v21 }
 0x24f   : > { %v4401_v54 = vadd.f32 1.0, %v9399_v27  ;;  %v4344_v47 = vadd.f32 %v4324_v32, %v11462_v49  ;;  %v4285_v34 = vmul.f32 0.044715, %v11489_v20  ;;  %v11500_v39 = vadd.f32 %v11307_v38, %v4223_v33 }
 0x250   : > { %v4651_v37 = vor.u32 %v4649_v28, %v4648_v11  ;;  %v4653_v62 = vrot.slane %v4648_v11, 4  ;;  %v4307_v25 = vmul.f32 %v4287_v1, %v11486_v45  ;;  %v11504_v35 = vadd.f32 %v11307_v38, %v4221_v40 }
 0x251   : > { %v3878_v10 = vadd.f32 %v3849_v8, %v11282_v6  ;;  %v4421_v22 = vmul.f32 %v4401_v54, %v4261_v12  ;;  %v4364_v51 = vmul.f32 0.7978846, %v4344_v47  ;;  %v4305_v59 = vmul.f32 %v4285_v34, %v11489_v20 }
 0x252   : > { %v4652_v19 = vsel %vm9752_vm8, %v4644_v31, %v4651_v37  ;;  %v4792_v52 = vsel %vm9643_vm2, %v4653_v62, %v4791_v41  ;;  %v4327_v36 = vmul.f32 %v4307_v25, %v11486_v45  ;;  %v4290_v14 = vmul.f32 0.044715, %v11500_v39 }
 0x253   : > { %4790 = vst [vmem:[#allocation3 + $0x40] sm:$0xf] %v4652_v19  ;;  %4793 = vst [vmem:[#allocation3 + $0x44] sm:$0x1] %v4792_v52  ;;  %v8262_v18 = vpack.c.bf16 %v4421_v22, %v4421_v22  ;;  %v4266_v15 = vmul.f32 0.5, %v11407_v50  ;;  %9402 = vtanh.f32 %v4364_v51  ;;  %v4325_v6 = vmul.f32 %v4305_v59, %v11489_v20  ;;  %v4166_v50 = vpop.f32.mrf.mxu0 }
 0x254   : > { %v9401_v60 = vpop.eup %9400  ;;  %v4347_v5 = vadd.f32 %v4327_v36, %v11486_v45  ;;  %v4310_v58 = vmul.f32 %v4290_v14, %v11500_v39  ;;  %v4288_v43 = vmul.f32 0.044715, %v11504_v35  ;;  %v11520_v0 = vadd.f32 %v11307_v38, %v4224_v29 }
 0x255   : > { %v4627_v44 = vrot.slane %v11465_v16, 4  ;;  %v4629_v48 = vshrl.u32 %v8262_v18, 16  ;;  %v4406_v24 = vadd.f32 1.0, %v9401_v60  ;;  %v4345_v30 = vadd.f32 %v4325_v6, %v11489_v20 }
 0x256   : > { %v4632_v7 = vshll.u32 %v8262_v18, 16  ;;  %v4367_v9 = vmul.f32 0.7978846, %v4347_v5  ;;  %v4330_v42 = vmul.f32 %v4310_v58, %v11500_v39  ;;  %v4308_v3 = vmul.f32 %v4288_v43, %v11504_v35 }
 0x257   : > { %v4631_v13 = vrot.slane %v4629_v48, 7  ;;  %v4426_v56 = vmul.f32 %v4406_v24, %v4266_v15  ;;  %v4365_v17 = vmul.f32 0.7978846, %v4345_v30  ;;  %v4291_v53 = vmul.f32 0.044715, %v11520_v0 }
 0x258   : > { %9404 = vtanh.f32 %v4367_v9  ;;  %v4350_v16 = vadd.f32 %v4330_v42, %v11500_v39  ;;  %v4328_v63 = vmul.f32 %v4308_v3, %v11504_v35  ;;  %v4195_v23 = vadd.f32 %v4166_v50, %v3878_v10  ;;  %v4794_v30 = vld [vmem:[#allocation3 + $0x48] sm:$0xf] }
 0x259   : > { %v4634_v55 = vor.u32 %v4632_v7, %v4631_v13  ;;  %v4636_v21 = vrot.slane %v4631_v13, 4  ;;  %v8267_v4 = vpack.c.bf16 %v4426_v56, %v4426_v56  ;;  %9406 = vtanh.f32 %v4365_v17 }
 0x25a   : > { %v4370_v12 = vmul.f32 0.7978846, %v4350_v16  ;;  %v4348_v31 = vadd.f32 %v4328_v63, %v11504_v35  ;;  %v4311_v32 = vmul.f32 %v4291_v53, %v11520_v0  ;;  %v4222_v33 = vmul.f32 %v11294_v61, %v4195_v23  ;;  %v4801_v61 = vld [vmem:[#allocation3 + $0x54] sm:$0xf] }
 0x25b   : > { %v4635_v40 = vsel %vm9752_vm8, %v4627_v44, %v4634_v55  ;;  %v4785_v27 = vsel %vm9643_vm2, %v4636_v21, %v4784_v57  ;;  %v4672_v8 = vshrl.u32 %v8267_v4, 16  ;;  %v4675_v41 = vshll.u32 %v8267_v4, 16  ;;  %v4805_v4 = vld [vmem:[#allocation3 + $0x5c] sm:$0x1] }
 0x25c   : > { %4783 = vst [vmem:[#allocation3 + $0x34] sm:$0xf] %v4635_v40  ;;  %4786 = vst [vmem:[#allocation3 + $0x38] sm:$0x1] %v4785_v27  ;;  %9408 = vtanh.f32 %v4370_v12  ;;  %v4368_v11 = vmul.f32 0.7978846, %v4348_v31  ;;  %v4331_v28 = vmul.f32 %v4311_v32, %v11520_v0  ;;  %v11538_v1 = vadd.f32 %v11307_v38, %v4222_v33 }
 0x25d   : > { %v11540_v29 = vrot.slane %v4672_v8, 7  ;;  %v4264_v38 = vmul.f32 0.5, %v11462_v49  ;;  %v4267_v18 = vmul.f32 0.5, %v11486_v45  ;;  %v4265_v5 = vmul.f32 0.5, %v11489_v20  ;;  %v4798_v27 = vld [vmem:[#allocation3 + $0x50] sm:$0x1] }
 0x25e   : > { %9410 = vtanh.f32 %v4368_v11  ;;  %v4351_v54 = vadd.f32 %v4331_v28, %v11520_v0  ;;  %v4289_v47 = vmul.f32 0.044715, %v11538_v1  ;;  %v4270_v7 = vmul.f32 0.5, %v11500_v39 }
 0x25f   : > { %v4677_v34 = vor.u32 %v4675_v41, %v11540_v29  ;;  %v4268_v17 = vmul.f32 0.5, %v11504_v35  ;;  %v4678_v39 = vrot.slane %v11540_v29, 4  ;;  %v4271_v32 = vmul.f32 0.5, %v11520_v0 }
 0x260   : > { %v9403_v37 = vpop.eup %9402  ;;  %v4371_v62 = vmul.f32 0.7978846, %v4351_v54  ;;  %v4309_v25 = vmul.f32 %v4289_v47, %v11538_v1 }
 0x261   : > { %v4802_v10 = vsel %vm9737_vm7, %v4677_v34, %v4801_v61  ;;  %v4404_v22 = vadd.f32 1.0, %v9403_v37 }
 0x262   : > { %4803 = vst [vmem:[#allocation3 + $0x54] sm:$0xf] %v4802_v10  ;;  %9412 = vtanh.f32 %v4371_v62  ;;  %v4329_v51 = vmul.f32 %v4309_v25, %v11538_v1  ;;  %v4815_v62 = vld [vmem:[#allocation3 + $0x6c] sm:$0xf] }
 0x263   : > { %v4424_v59 = vmul.f32 %v4404_v22, %v4264_v38 }
 0x264   : > { %v4349_v19 = vadd.f32 %v4329_v51, %v11538_v1 }
 0x265   : > { %v9405_v52 = vpop.eup %9404  ;;  %v8265_v36 = vpack.c.bf16 %v4424_v59, %v4424_v59 }
 0x266   : > { %v9407_v14 = vpop.eup %9406  ;;  %v4407_v15 = vadd.f32 1.0, %v9405_v52  ;;  %v4369_v6 = vmul.f32 0.7978846, %v4349_v19  ;;  %v4808_v52 = vld [vmem:[#allocation3 + $0x60] sm:$0xf] }
 0x267   : > { %v4655_v60 = vshrl.u32 %v8265_v36, 16  ;;  %v4405_v58 = vadd.f32 1.0, %v9407_v14  ;;  %v4658_v48 = vshll.u32 %v8265_v36, 16  ;;  %v4269_v14 = vmul.f32 0.5, %v11538_v1 }
 0x268   : > { %v4427_v49 = vmul.f32 %v4407_v15, %v4267_v18  ;;  %9414 = vtanh.f32 %v4369_v6 }
 0x269   : > { %v9409_v43 = vpop.eup %9408  ;;  %v4657_v44 = vrot.slane %v4655_v60, 7  ;;  %v4425_v24 = vmul.f32 %v4405_v58, %v4265_v5 }
 0x26a   : > { %v8268_v50 = vpack.c.bf16 %v4427_v49, %v4427_v49  ;;  %v4410_v9 = vadd.f32 1.0, %v9409_v43 }
 0x26b   : > { %v9411_v42 = vpop.eup %9410  ;;  %v4660_v3 = vor.u32 %v4658_v48, %v4657_v44  ;;  %v8266_v45 = vpack.c.bf16 %v4425_v24, %v4425_v24  ;;  %v4661_v33 = vrot.slane %v4657_v44, 4  ;;  %v4819_v44 = vld [vmem:[#allocation3 + $0x74] sm:$0x1] }
 0x26c   : > { %v4680_v13 = vshrl.u32 %v8268_v50, 16  ;;  %v4430_v56 = vmul.f32 %v4410_v9, %v4270_v7  ;;  %v4408_v20 = vadd.f32 1.0, %v9411_v42  ;;  %v4683_v63 = vshll.u32 %v8268_v50, 16 }
 0x26d   : > { %v4795_v53 = vsel %vm9737_vm7, %v4660_v3, %v4794_v30  ;;  %v4663_v57 = vshrl.u32 %v8266_v45, 16  ;;  %v4666_v31 = vshll.u32 %v8266_v45, 16 }
 0x26e   : > { %4796 = vst [vmem:[#allocation3 + $0x48] sm:$0xf] %v4795_v53  ;;  %v4682_v16 = vrot.slane %v4680_v13, 7  ;;  %v8271_v23 = vpack.c.bf16 %v4430_v56, %v4430_v56  ;;  %v4428_v55 = vmul.f32 %v4408_v20, %v4268_v17 }
 0x26f   : > { %v9413_v21 = vpop.eup %9412  ;;  %v4665_v12 = vrot.slane %v4663_v57, 7 }
 0x270   : > { %v4685_v35 = vor.u32 %v4683_v63, %v4682_v16  ;;  %v4687_v40 = vrot.slane %v4682_v16, 4  ;;  %v4706_v8 = vshrl.u32 %v8271_v23, 16  ;;  %v8269_v41 = vpack.c.bf16 %v4428_v55, %v4428_v55 }
 0x271   : > { %v4668_v11 = vor.u32 %v4666_v31, %v4665_v12  ;;  %v4670_v28 = vrot.slane %v4665_v12, 4  ;;  %v4411_v61 = vadd.f32 1.0, %v9413_v21  ;;  %v4709_v34 = vshll.u32 %v8271_v23, 16 }
 0x272   : > { %v4686_v54 = vsel %vm9752_vm8, %v4678_v39, %v4685_v35  ;;  %v4806_v29 = vsel %vm9643_vm2, %v4687_v40, %v4805_v4  ;;  %v4708_v47 = vrot.slane %v4706_v8, 7  ;;  %v4689_v25 = vshrl.u32 %v8269_v41, 16 }
 0x273   : > { %4804 = vst [vmem:[#allocation3 + $0x58] sm:$0xf] %v4686_v54  ;;  %4807 = vst [vmem:[#allocation3 + $0x5c] sm:$0x1] %v4806_v29  ;;  %v4669_v0 = vsel %vm9752_vm8, %v4661_v33, %v4668_v11  ;;  %v4799_v37 = vsel %vm9643_vm2, %v4670_v28, %v4798_v27  ;;  %v4431_v38 = vmul.f32 %v4411_v61, %v4271_v32  ;;  %v4692_v59 = vshll.u32 %v8269_v41, 16 }
 0x274   : > { %4797 = vst [vmem:[#allocation3 + $0x4c] sm:$0xf] %v4669_v0  ;;  %4800 = vst [vmem:[#allocation3 + $0x50] sm:$0x1] %v4799_v37  ;;  %v4711_v10 = vor.u32 %v4709_v34, %v4708_v47  ;;  %v4691_v51 = vrot.slane %v4689_v25, 7  ;;  %v4712_v48 = vrot.slane %v4708_v47, 4 }
 0x275   : > { %v9415_v22 = vpop.eup %9414  ;;  %v8272_v36 = vpack.c.bf16 %v4431_v38, %v4431_v38 }
 0x276   : > { %v4816_v19 = vsel %vm9737_vm7, %v4711_v10, %v4815_v62  ;;  %v4409_v18 = vadd.f32 1.0, %v9415_v22  ;;  %v4694_v15 = vor.u32 %v4692_v59, %v4691_v51  ;;  %v4695_v3 = vrot.slane %v4691_v51, 4 }
 0x277   : > { %4817 = vst [vmem:[#allocation3 + $0x6c] sm:$0xf] %v4816_v19  ;;  %v4714_v6 = vshrl.u32 %v8272_v36, 16  ;;  %v4717_v49 = vshll.u32 %v8272_v36, 16 }
 0x278   : > { %v4429_v60 = vmul.f32 %v4409_v18, %v4269_v14  ;;  %v4809_v5 = vsel %vm9737_vm7, %v4694_v15, %v4808_v52 }
 0x279   : > { %4810 = vst [vmem:[#allocation3 + $0x60] sm:$0xf] %v4809_v5  ;;  %v4716_v58 = vrot.slane %v4714_v6, 7 }
 0x27a   : > { %v8270_v43 = vpack.c.bf16 %v4429_v60, %v4429_v60 }
 0x27b   : > { %v4719_v24 = vor.u32 %v4717_v49, %v4716_v58  ;;  %v4721_v30 = vrot.slane %v4716_v58, 4 }
 0x27c   : > { %v4697_v50 = vshrl.u32 %v8270_v43, 16  ;;  %v4700_v42 = vshll.u32 %v8270_v43, 16 }
 0x27d   : > { %v4720_v1 = vsel %vm9752_vm8, %v4712_v48, %v4719_v24  ;;  %v4820_v7 = vsel %vm9643_vm2, %v4721_v30, %v4819_v44 }
 0x27e   : > { %v4699_v9 = vrot.slane %v4697_v50, 7  ;;  %4818 = vst [vmem:[#allocation3 + $0x70] sm:$0xf] %v4720_v1  ;;  %4821 = vst [vmem:[#allocation3 + $0x74] sm:$0x1] %v4820_v7 }
 0x27f   : > { %4824 = sbr.rel (%p7856_p12) target bundleno = 647 (0x287), region = 76 }
 0x280   : > { %v4702_v45 = vor.u32 %v4700_v42, %v4699_v9  ;;  %v4704_v13 = vrot.slane %v4699_v9, 4 }
 0x282   : > { %v4703_v56 = vsel %vm9752_vm8, %v4695_v3, %v4702_v45  ;;  %v4813_v17 = vsel %vm9643_vm2, %v4704_v13, %v4812_v26 }
 0x283   : > { %4811 = vst [vmem:[#allocation3 + $0x64] sm:$0xf] %v4703_v56  ;;  %4814 = vst [vmem:[#allocation3 + $0x68] sm:$0x1] %v4813_v17 }
 0x284   : > { %v9554_v20 = vmov 0  }
 0x285   : > { %4825 = vst [vmem:[#allocation3] sm:$0xf] %v9554_v20  ;;  %4826 = vst [vmem:[#allocation3 + $0x4] sm:$0xf] %v9554_v20 }
 0x286   : > { %4827 = vst [vmem:[#allocation3 + $0x8] sm:$0x1] %v9554_v20 }
 0x287 PF: > { %4830 = sbr.rel (%p7858_p0) target bundleno = 655 (0x28f), region = 80 }
 0x28c   : > { %v9555_v53 = vmov 0  }
 0x28d   : > { %4832 = vst [vmem:[#allocation3 + $0x6c] sm:$0xf] %v9555_v53  ;;  %4833 = vst [vmem:[#allocation3 + $0x70] sm:$0xf] %v9555_v53 }
 0x28e   : > { %4834 = vst [vmem:[#allocation3 + $0x74] sm:$0x1] %v9555_v53 }
 0x28f PF: > { %v9416_v46 = vld [vmem:[%s12890_s6 + $0x78] sm:$0xff]   ;;  %v9417_v2 = vld [vmem:[%s12890_s6 + $0x70] sm:$0xff]   ;;  %v9418_v57 = vld [vmem:[%s12890_s6 + $0x68] sm:$0xff]  }
 0x290   : > { %8942 = vmatprep.subr.bf16.mxu1 %v9416_v46  ;;  %v9419_v16 = vld [vmem:[%s12890_s6 + $0x60] sm:$0xff]   ;;  %v9424_v63 = vld [vmem:[%s12890_s6 + $0xb8] sm:$0xff]   ;;  %v11599_v23 = vld [vmem:[#allocation3] sm:$0xf] }
 0x291   : > { %8943 = vmatpush3.bf16.msra.mxu1 %v9416_v46  ;;  %v11601_v55 = vld [vmem:[#allocation3 + $0x4] sm:$0xf]  ;;  %v11603_v21 = vld [vmem:[#allocation3 + $0x8] sm:$0x1]  ;;  %9006 = vmatprep.subr.bf16.mxu0 %v9424_v63  ;;  %v4876_v4 = vshrl.u32 %v11599_v23, 16  ;;  %v4879_v12 = vshll.u32 %v11599_v23, 16 }
 0x292   : > { %8944 = vmatprep.subr.bf16.mxu1 %v9417_v2  ;;  %v9420_v39 = vld [vmem:[%s12890_s6 + $0x58] sm:$0xff]   ;;  %v4885_v31 = vshll.u32 %v11601_v55, 16  ;;  %v4889_v32 = vshrl.u32 %v11601_v55, 16  ;;  %9007 = vmatpush3.bf16.msra.mxu0 %v9424_v63  ;;  %v4895_v35 = vshll.u32 %v11603_v21, 16  ;;  %v11615_v40 = vld [vmem:[#allocation3 + $0x10] sm:$0xf] }
 0x293   : > { %v11612_v33 = vld [vmem:[#allocation3 + $0xc] sm:$0xf]  ;;  %v11617_v27 = vld [vmem:[#allocation3 + $0x14] sm:$0x1]  ;;  %v4878_v11 = vrot.slane %v4876_v4, 4  ;;  %v4881_v28 = vrot.slane %v4879_v12, 5 }
 0x294   : > { %v4900_v8 = vshrl.u32 %v11612_v33, 16  ;;  %v4887_v41 = vrot.slane %v4885_v31, 5  ;;  %v4891_v61 = vrot.slane %v4889_v32, 4  ;;  %v4897_v54 = vrot.slane %v4895_v35, 5  ;;  %v9426_v10 = vld [vmem:[%s12890_s6 + $0xb0] sm:$0xff]   ;;  %v9428_v5 = vld [vmem:[%s12890_s6 + $0xa8] sm:$0xff]  }
 0x295   : > { %8945 = vmatpush3.bf16.msra.mxu1 %v9417_v2  ;;  %v4903_v47 = vshll.u32 %v11612_v33, 16  ;;  %v4909_v34 = vshll.u32 %v11615_v40, 16  ;;  %v4882_v0 = vor.u32 %v4881_v28, %v4878_v11  ;;  %v4913_v62 = vshrl.u32 %v11615_v40, 16  ;;  %v9421_v51 = vld [vmem:[%s12890_s6 + $0x50] sm:$0xff]   ;;  %9008 = vmatprep.subr.bf16.mxu0 %v9426_v10  ;;  %v11640_v58 = vld [vmem:[#allocation3 + $0x18] sm:$0xf] }
 0x296   : > { %8946 = vmatprep.subr.bf16.mxu1 %v9418_v57  ;;  %v4902_v29 = vrot.slane %v4900_v8, 4  ;;  %v4892_v37 = vor.u32 %v4891_v61, %v4887_v41  ;;  %v4919_v25 = vshll.u32 %v11617_v27, 16  ;;  %9009 = vmatpush3.bf16.msra.mxu0 %v9426_v10  ;;  %v11642_v49 = vld [vmem:[#allocation3 + $0x1c] sm:$0xf]  ;;  %v8107_v43 = vrot.slane %v11599_v23, 9  ;;  %v9423_v12 = vld [vmem:[%s12890_s6 + $0x40] sm:$0xff]  }
 0x297   : > { %v4905_v38 = vrot.slane %v4903_v47, 5  ;;  %v11627_v22 = vrot.slane %v4909_v34, 5  ;;  %v4883_v59 = vrot.slane %v4882_v0, 4  ;;  %v4915_v52 = vrot.slane %v4913_v62, 4  ;;  %v9422_v44 = vld [vmem:[%s12890_s6 + $0x48] sm:$0xff]   ;;  %9010 = vmatprep.subr.bf16.mxu0 %v9428_v5  ;;  %v9432_v61 = vld [vmem:[%s12890_s6 + $0x98] sm:$0xff]  }
 0x298   : > { %v4893_v19 = vrot.slane %v4892_v37, 4  ;;  %v4921_v14 = vrot.slane %v4919_v25, 5  ;;  %v11648_v30 = vld [vmem:[#allocation3 + $0x20] sm:$0x1]  ;;  %v4924_v50 = vshrl.u32 %v11640_v58, 16  ;;  %v4927_v1 = vshll.u32 %v11640_v58, 16 }
 0x299   : > { %8947 = vmatpush3.bf16.msra.mxu1 %v9418_v57  ;;  %v4906_v36 = vor.u32 %v4905_v38, %v4902_v29  ;;  %v4888_v15 = vsel %vm9957_vm11, %v4883_v59, %v4887_v41  ;;  %v4916_v60 = vor.u32 %v4915_v52, %v11627_v22  ;;  %v4933_v9 = vshll.u32 %v11642_v49, 16  ;;  %v11655_v3 = vld [vmem:[#allocation3 + $0x24] sm:$0xf]  ;;  %v11657_v56 = vld [vmem:[#allocation3 + $0x28] sm:$0xf]  ;;  %v9430_v57 = vld [vmem:[%s12890_s6 + $0xa0] sm:$0xff]  }
 0x29a   : > { %8948 = vmatprep.subr.bf16.mxu1 %v9419_v16  ;;  %v4898_v6 = vsel %vm9957_vm11, %v4893_v19, %v4897_v54  ;;  %v4937_v42 = vshrl.u32 %v11642_v49, 16  ;;  %v4943_v26 = vshll.u32 %v11648_v30, 16  ;;  %9011 = vmatpush3.bf16.msra.mxu0 %v9428_v5  ;;  %v4926_v45 = vrot.slane %v4924_v50, 4  ;;  %v11659_v17 = vld [vmem:[#allocation3 + $0x2c] sm:$0x1]  ;;  %v9427_v5 = vld [vmem:[%s12890_s6 + $0x30] sm:$0xff]  }
 0x29b   : > { %v8075_v48 = vcombine.low %v4888_v15, %v4898_v6  ;;  %v4907_v24 = vrot.slane %v4906_v36, 4  ;;  %v4917_v7 = vrot.slane %v4916_v60, 4  ;;  %v4929_v13 = vrot.slane %v4927_v1, 5  ;;  %9012 = vmatprep.subr.bf16.mxu0 %v9430_v57  ;;  %v9425_v54 = vld [vmem:[%s12890_s6 + $0x38] sm:$0xff]   ;;  %v11688_v10 = vld [vmem:[#allocation3 + $0x30] sm:$0xf] }
 0x29c   : > { %v4935_v53 = vrot.slane %v4933_v9, 5  ;;  %v4939_v46 = vrot.slane %v4937_v42, 4  ;;  %v4945_v2 = vrot.slane %v4943_v26, 5  ;;  %v4951_v4 = vshll.u32 %v11655_v3, 16  ;;  %v11695_v59 = vld [vmem:[#allocation3 + $0x38] sm:$0x1] }
 0x29d   : > { %8949 = vmatpush3.bf16.msra.mxu1 %v9419_v16  ;;  %8958 = vmatprep.mubr.bf16.mxu1 %v8075_v48  ;;  %v4912_v20 = vsel %vm9957_vm11, %v4907_v24, %v11627_v22  ;;  %v4922_v16 = vsel %vm9957_vm11, %v4917_v7, %v4921_v14  ;;  %v4930_v63 = vor.u32 %v4929_v13, %v4926_v45  ;;  %v4957_v32 = vshll.u32 %v11657_v56, 16  ;;  %v11701_v60 = vld [vmem:[#allocation3 + $0x3c] sm:$0xf]  ;;  %v11707_v1 = vld [vmem:[#allocation3 + $0x40] sm:$0xf] }
 0x29e   : > { %8950 = vmatprep.subr.bf16.mxu1 %v9420_v39  ;;  %v4940_v31 = vor.u32 %v4939_v46, %v4935_v53  ;;  %v4961_v35 = vshrl.u32 %v11657_v56, 16  ;;  %v4967_v8 = vshll.u32 %v11659_v17, 16  ;;  %v4953_v41 = vrot.slane %v4951_v4, 5  ;;  %9013 = vmatpush3.bf16.msra.mxu0 %v9430_v57  ;;  %v11709_v26 = vld [vmem:[#allocation3 + $0x44] sm:$0x1] }
 0x29f   : > { %v4931_v11 = vrot.slane %v4930_v63, 4  ;;  %v11683_v47 = vrot.slane %v4957_v32, 5  ;;  %v5463_v0 = vrot.slane %v11601_v55, 5  ;;  %v8076_v37 = vcombine.low %v4912_v20, %v4922_v16  ;;  %9014 = vmatprep.subr.bf16.mxu0 %v9432_v61  ;;  %v9434_v13 = vld [vmem:[%s12890_s6 + $0x90] sm:$0xff]  }
 0x2a0   : > { %v4941_v29 = vrot.slane %v4940_v31, 4  ;;  %v4963_v34 = vrot.slane %v4961_v35, 4  ;;  %v4972_v19 = vshrl.u32 %v11688_v10, 16  ;;  %v4975_v52 = vshll.u32 %v11688_v10, 16  ;;  %v9429_v35 = vld [vmem:[%s12890_s6 + $0x28] sm:$0xff]  }
 0x2a1   : > { %8951 = vmatpush3.bf16.msra.mxu1 %v9420_v39  ;;  %v4948_v39 = vshrl.u32 %v11655_v3, 16  ;;  %v4936_v62 = vsel %vm9957_vm11, %v4931_v11, %v4935_v53  ;;  %v4969_v14 = vrot.slane %v4967_v8, 5  ;;  %v4991_v50 = vshll.u32 %v11695_v59, 16 }
 0x2a2   : > { %8952 = vmatprep.subr.bf16.mxu1 %v9421_v51  ;;  %v4946_v38 = vsel %vm9957_vm11, %v4941_v29, %v4945_v2  ;;  %v4964_v22 = vor.u32 %v4963_v34, %v11683_v47  ;;  %9015 = vmatpush3.bf16.msra.mxu0 %v9432_v61  ;;  %v4974_v48 = vrot.slane %v4972_v19, 4  ;;  %v4977_v24 = vrot.slane %v4975_v52, 5 }
 0x2a3   : > { %v4950_v28 = vrot.slane %v4948_v39, 4  ;;  %v8077_v7 = vcombine.low %v4936_v62, %v4946_v38  ;;  %v4996_v45 = vshrl.u32 %v11701_v60, 16  ;;  %v4993_v46 = vrot.slane %v4991_v50, 5  ;;  %9016 = vmatprep.subr.bf16.mxu0 %v9434_v13  ;;  %v11736_v62 = vld [vmem:[#allocation3 + $0x4c] sm:$0xf] }
 0x2a4   : > { %v4978_v53 = vor.u32 %v4977_v24, %v4974_v48  ;;  %v4999_v2 = vshll.u32 %v11701_v60, 16  ;;  %v5005_v39 = vshll.u32 %v11707_v1, 16  ;;  %v5009_v31 = vshrl.u32 %v11707_v1, 16  ;;  %v11757_v50 = vld [vmem:[#allocation3 + $0x5c] sm:$0x1] }
 0x2a5   : > { %8953 = vmatpush3.bf16.msra.mxu1 %v9421_v51  ;;  %v4954_v25 = vor.u32 %v4953_v41, %v4950_v28  ;;  %v11693_v51 = vld [vmem:[#allocation3 + $0x34] sm:$0xf]  ;;  %v4998_v63 = vrot.slane %v4996_v45, 4  ;;  %v5015_v32 = vshll.u32 %v11709_v26, 16  ;;  %v9436_v28 = vld [vmem:[%s12890_s6 + $0x88] sm:$0xff]   ;;  %v5029_v48 = vshll.u32 %v11736_v62, 16 }
 0x2a6   : > { %8954 = vmatprep.subr.bf16.mxu1 %v9422_v44  ;;  %v4981_v15 = vshll.u32 %v11693_v51, 16  ;;  %v4985_v6 = vshrl.u32 %v11693_v51, 16  ;;  %v4979_v4 = vrot.slane %v4978_v53, 4  ;;  %9017 = vmatpush3.bf16.msra.mxu0 %v9434_v13  ;;  %v5007_v11 = vrot.slane %v5005_v39, 5  ;;  %v9438_v39 = vld [vmem:[%s12890_s6 + $0x80] sm:$0xff]  }
 0x2a7   : > { %v4955_v36 = vrot.slane %v4954_v25, 4  ;;  %v5011_v29 = vrot.slane %v5009_v31, 4  ;;  %9018 = vmatprep.subr.bf16.mxu0 %v9436_v28  ;;  %v11738_v25 = vld [vmem:[#allocation3 + $0x50] sm:$0x1]  ;;  %v5033_v24 = vshrl.u32 %v11736_v62, 16 }
 0x2a8   : > { %v4983_v9 = vrot.slane %v4981_v15, 5  ;;  %v4987_v42 = vrot.slane %v4985_v6, 4  ;;  %v11749_v15 = vld [vmem:[#allocation3 + $0x54] sm:$0xf]  ;;  %v11751_v6 = vld [vmem:[#allocation3 + $0x58] sm:$0xf] }
 0x2a9   : > { %8955 = vmatpush3.bf16.msra.mxu1 %v9422_v44  ;;  %v4965_v44 = vrot.slane %v4964_v22, 4  ;;  %v4960_v20 = vsel %vm9957_vm11, %v4955_v36, %v11683_v47  ;;  %v5017_v47 = vrot.slane %v5015_v32, 5  ;;  %v11746_v22 = vsel %vm10165_vm14, %v8107_v43, %v5463_v0 }
 0x2aa   : > { %8956 = vmatprep.subr.bf16.mxu1 %v9423_v12  ;;  %v4988_v16 = vor.u32 %v4987_v42, %v4983_v9  ;;  %v4984_v41 = vsel %vm9957_vm11, %v4979_v4, %v4983_v9  ;;  %v5012_v36 = vor.u32 %v5011_v29, %v5007_v11  ;;  %9019 = vmatpush3.bf16.msra.mxu0 %v9436_v28  ;;  %v5039_v43 = vshll.u32 %v11738_v25, 16 }
 0x2ab   : > { %v4970_v57 = vsel %vm9957_vm11, %v4965_v44, %v4969_v14  ;;  %v5044_v45 = vshrl.u32 %v11749_v15, 16  ;;  %v5035_v53 = vrot.slane %v5033_v24, 4  ;;  %9020 = vmatprep.subr.bf16.mxu0 %v9438_v39  ;;  %v9435_v24 = vld [vmem:[%s12890_s6 + $0x10] sm:$0xff]  }
 0x2ac   : > { %v4989_v8 = vrot.slane %v4988_v16, 4  ;;  %v8078_v34 = vcombine.low %v4960_v20, %v4970_v57  ;;  %v5013_v42 = vrot.slane %v5012_v36, 4  ;;  %v5031_v20 = vrot.slane %v5029_v48, 5 }
 0x2ad   : > { %8957 = vmatpush3.bf16.msra.mxu1 %v9423_v12  ;;  %v5001_v12 = vrot.slane %v4999_v2, 5  ;;  %v5046_v57 = vrot.slane %v5044_v45, 4  ;;  %v5047_v16 = vshll.u32 %v11749_v15, 16  ;;  %v5470_v36 = vrot.slane %v11615_v40, 5 }
 0x2ae   : > { %8974 = vmatprep.subr.bf16.mxu1 %v9425_v54  ;;  %v5018_v2 = vsel %vm9957_vm11, %v5013_v42, %v5017_v47  ;;  %v5036_v32 = vor.u32 %v5035_v53, %v5031_v20  ;;  %9021 = vmatpush3.bf16.msra.mxu0 %v9438_v39  ;;  %v5487_v39 = vrot.slane %v11659_v17, 5  ;;  %v8111_v17 = vrot.slane %v11688_v10, 9 }
 0x2af   : > { %v5002_v61 = vor.u32 %v5001_v12, %v4998_v63  ;;  %v5053_v63 = vshll.u32 %v11751_v6, 16  ;;  %v9433_v12 = vld [vmem:[%s12890_s6 + $0x18] sm:$0xff]   ;;  %v5472_v45 = vrot.slane %v5470_v36, 4 }
 0x2b0   : > { %8959 = vmatmul.mubr.bf16.vlgmr.msra.gmra.mxu1 %v8076_v37  ;;  %v11734_v37 = vld [vmem:[#allocation3 + $0x48] sm:$0xf]  ;;  %v5037_v29 = vrot.slane %v5036_v32, 4 }
 0x2b1   : > { %8975 = vmatpush3.bf16.msra.mxu1 %v9425_v54  ;;  %8962 = vmatprep.mubr.bf16.mxu1 %v8077_v7  ;;  %v4994_v54 = vsel %vm9957_vm11, %v4989_v8, %v4993_v46  ;;  %v5003_v52 = vrot.slane %v5002_v61, 4  ;;  %v5020_v14 = vshrl.u32 %v11734_v37, 16  ;;  %v5023_v44 = vshll.u32 %v11734_v37, 16  ;;  %v9431_v7 = vld [vmem:[%s12890_s6 + $0x20] sm:$0xff]  }
 0x2b2   : > { %8976 = vmatprep.subr.bf16.mxu1 %v9427_v5  ;;  %v8079_v19 = vcombine.low %v4984_v41, %v4994_v54  ;;  %v5041_v46 = vrot.slane %v5039_v43, 5  ;;  %v5057_v8 = vshrl.u32 %v11751_v6, 16  ;;  %v5055_v28 = vrot.slane %v5053_v63, 5 }
 0x2b3   : > { %v5008_v9 = vsel %vm9957_vm11, %v5003_v52, %v5007_v11  ;;  %v5025_v13 = vrot.slane %v5023_v44, 5  ;;  %v5049_v11 = vrot.slane %v5047_v16, 5  ;;  %v5063_v41 = vshll.u32 %v11757_v50, 16 }
 0x2b4   : > { %v8080_v4 = vcombine.low %v5008_v9, %v5018_v2  ;;  %v5465_v61 = vrot.slane %v5463_v0, 4  ;;  %v5059_v47 = vrot.slane %v5057_v8, 4  ;;  %v8108_v52 = vrot.slane %v11612_v33, 9 }
 0x2b5   : > { %8977 = vmatpush3.bf16.msra.mxu1 %v9427_v5  ;;  %v5022_v5 = vrot.slane %v5020_v14, 4  ;;  %v5050_v54 = vor.u32 %v5049_v11, %v5046_v57  ;;  %v9440_v14 = vld [vmem:[%s12890_s6 + $0x138] sm:$0xff]   ;;  %v5042_v44 = vsel %vm9957_vm11, %v5037_v29, %v5041_v46  ;;  %v9437_v46 = vld [vmem:[%s12890_s6 + $0x8] sm:$0xff]   ;;  %v5480_v2 = vrot.slane %v11648_v30, 5  ;;  %v9444_v30 = vld [vmem:[%s12890_s6 + $0x130] sm:$0xff]  }
 0x2b6   : > { %8978 = vmatprep.subr.bf16.mxu1 %v9429_v35  ;;  %v5060_v48 = vor.u32 %v5059_v47, %v5055_v28  ;;  %9070 = vmatprep.subr.bf16.mxu0 %v9440_v14  ;;  %v8110_v57 = vrot.slane %v11655_v3, 9  ;;  %v5484_v63 = vrot.slane %v11657_v56, 5  ;;  %v8091_v8 = vcombine.low %v11599_v23, %v11601_v55  ;;  %v9439_v47 = vld [vmem:[%s12890_s6] sm:$0xff]  }
 0x2b7   : > { %v5026_v31 = vor.u32 %v5025_v13, %v5022_v5  ;;  %v5051_v9 = vrot.slane %v5050_v54, 4  ;;  %v5473_v13 = vrot.slane %v11617_v27, 5  ;;  %v5498_v55 = vrot.slane %v11707_v1, 5  ;;  %v9446_v54 = vld [vmem:[%s12890_s6 + $0x128] sm:$0xff]  }
 0x2b8   : > { %8963 = vmatmul.mubr.bf16.gmra.mxu1 %v8078_v34  ;;  %v5466_v34 = vrot.slane %v11603_v21, 5  ;;  %v5061_v5 = vrot.slane %v5060_v48, 4  ;;  %v5486_v11 = vrot.slane %v5484_v63, 4  ;;  %v5485_v29 = vsel %vm10165_vm14, %v8110_v57, %v5484_v63  ;;  %v11878_v57 = vld [vmem:[#allocation3 + $0x10] sm:$0xf] }
 0x2b9   : > { %8979 = vmatpush3.bf16.msra.mxu1 %v9429_v35  ;;  %8966 = vmatprep.mubr.bf16.mxu1 %v8079_v19  ;;  %v5027_v35 = vrot.slane %v5026_v31, 4  ;;  %v5065_v19 = vrot.slane %v5063_v41, 5  ;;  %v5056_v53 = vsel %vm9957_vm11, %v5051_v9, %v5055_v28  ;;  %v5474_v16 = vsel %vm10165_vm14, %v5472_v45, %v5473_v13 }
 0x2ba   : > { %8980 = vmatprep.subr.bf16.mxu1 %v9431_v7  ;;  %v5467_v21 = vsel %vm10165_vm14, %v5465_v61, %v5466_v34  ;;  %v5491_v41 = vrot.slane %v11693_v51, 5  ;;  %v5494_v61 = vrot.slane %v11695_v59, 5  ;;  %v5488_v23 = vsel %vm10165_vm14, %v5486_v11, %v5487_v39 }
 0x2bb   : > { %v5032_v0 = vsel %vm9957_vm11, %v5027_v35, %v5031_v20  ;;  %v8115_v42 = vcombine.low %v11746_v22, %v5467_v21  ;;  %v8109_v20 = vrot.slane %v11640_v58, 9  ;;  %v5477_v22 = vrot.slane %v11642_v49, 5  ;;  %v9443_v21 = vld [vmem:[%s12890_s6 + $0xf8] sm:$0xff]  }
 0x2bc   : > { %v8081_v43 = vcombine.low %v5032_v0, %v5042_v44  ;;  %v5066_v27 = vsel %vm9957_vm11, %v5061_v5, %v5065_v19  ;;  %v5492_v59 = vsel %vm10165_vm14, %v8111_v17, %v5491_v41  ;;  %v5493_v34 = vrot.slane %v5491_v41, 4  ;;  %v11896_v17 = vld [vmem:[#allocation3 + $0x1c] sm:$0xf]  ;;  %v11898_v41 = vld [vmem:[#allocation3 + $0x20] sm:$0x1] }
 0x2bd   : > { %8981 = vmatpush3.bf16.msra.mxu1 %v9431_v7  ;;  %v5471_v7 = vsel %vm10165_vm14, %v8108_v52, %v5470_v36  ;;  %9022 = vmatprep.mubr.bf16.mxu0 %v8115_v42  ;;  %v5479_v31 = vrot.slane %v5477_v22, 4  ;;  %v8082_v32 = vcombine.low %v5056_v53, %v5066_v27  ;;  %v8112_v19 = vrot.slane %v11701_v60, 9  ;;  %v11880_v27 = vld [vmem:[#allocation3 + $0x14] sm:$0x1] }
 0x2be   : > { %8982 = vmatprep.subr.bf16.mxu1 %v9433_v12  ;;  %v8118_v52 = vcombine.low %v5485_v29, %v5488_v23  ;;  %v5495_v36 = vsel %vm10165_vm14, %v5493_v34, %v5494_v61  ;;  %v5501_v0 = vrot.slane %v11709_v26, 5  ;;  %v5505_v48 = vrot.slane %v11736_v62, 5  ;;  %v9450_v26 = vld [vmem:[%s12890_s6 + $0x120] sm:$0xff]  }
 0x2bf   : > { %v5481_v28 = vsel %vm10165_vm14, %v5479_v31, %v5480_v2  ;;  %v8119_v44 = vcombine.low %v5492_v59, %v5495_v36  ;;  %v8092_v42 = vcombine.low %v11612_v33, %v11615_v40  ;;  %v5512_v45 = vrot.slane %v11751_v6, 5  ;;  %v11890_v31 = vld [vmem:[#allocation3 + $0x18] sm:$0xf] }
 0x2c0   : > { %8967 = vmatmul.mubr.bf16.gmra.mxu1 %v8080_v4  ;;  %v8116_v4 = vcombine.low %v5471_v7, %v5474_v16  ;;  %v5507_v9 = vrot.slane %v5505_v48, 4  ;;  %v5499_v7 = vsel %vm10165_vm14, %v8112_v19, %v5498_v55  ;;  %v8093_v13 = vcombine.low %v11640_v58, %v11642_v49  ;;  %v11874_v49 = vld [vmem:[#allocation3 + $0xc] sm:$0xf] }
 0x2c1   : > { %8983 = vmatpush3.bf16.msra.mxu1 %v9433_v12  ;;  %8970 = vmatprep.mubr.bf16.mxu1 %v8081_v43  ;;  %v5478_v12 = vsel %vm10165_vm14, %v8109_v20, %v5477_v22  ;;  %v5508_v43 = vrot.slane %v11738_v25, 5  ;;  %v9445_v25 = vld [vmem:[%s12890_s6 + $0xf0] sm:$0xff]   ;;  %v8114_v33 = vrot.slane %v11749_v15, 9  ;;  %v8094_v40 = vcombine.low %v11655_v3, %v11657_v56  ;;  %v9452_v20 = vld [vmem:[%s12890_s6 + $0x118] sm:$0xff]   ;;  %v9462_v3 = vld [vmem:[%s12890_s6 + $0x100] sm:$0xff]  }
 0x2c2   : > { %8984 = vmatprep.subr.bf16.mxu1 %v9435_v24  ;;  %9023 = vmatmul.mubr.bf16.vlgmr.msra.gmra.mxu0 %v8116_v4  ;;  %v8117_v35 = vcombine.low %v5478_v12, %v5481_v28  ;;  %v5515_v58 = vrot.slane %v11757_v50, 5  ;;  %v8095_v2 = vcombine.low %v11688_v10, %v11693_v51  ;;  %v5977_v16 = vshrl.u32 %v11874_v49, 16  ;;  %v9449_v50 = vld [vmem:[%s12890_s6 + $0xe8] sm:$0xff]  }
 0x2c3   : > { %9071 = vmatpush3.bf16.msra.mxu0 %v9440_v14  ;;  %v5500_v14 = vrot.slane %v5498_v55, 4  ;;  %v5980_v63 = vshll.u32 %v11874_v49, 16  ;;  %v5514_v39 = vrot.slane %v5512_v45, 4  ;;  %v5986_v4 = vshll.u32 %v11878_v57, 16  ;;  %v9456_v55 = vld [vmem:[%s12890_s6 + $0x110] sm:$0xff]  }
 0x2c4   : > { %9072 = vmatprep.subr.bf16.mxu0 %v9444_v30  ;;  %9026 = vmatprep.mubr.bf16.mxu0 %v8117_v35  ;;  %v5996_v12 = vshll.u32 %v11880_v27, 16  ;;  %v5979_v11 = vrot.slane %v5977_v16, 4  ;;  %v6001_v23 = vshrl.u32 %v11890_v31, 16  ;;  %v6004_v59 = vshll.u32 %v11890_v31, 16 }
 0x2c5   : > { %8985 = vmatpush3.bf16.msra.mxu1 %v9435_v24  ;;  %v8113_v24 = vrot.slane %v11734_v37, 9  ;;  %v5502_v5 = vsel %vm10165_vm14, %v5500_v14, %v5501_v0  ;;  %v5982_v28 = vrot.slane %v5980_v63, 5  ;;  %v5988_v61 = vrot.slane %v5986_v4, 5 }
 0x2c6   : > { %8986 = vmatprep.subr.bf16.mxu1 %v9437_v46  ;;  %v8120_v22 = vcombine.low %v5499_v7, %v5502_v5  ;;  %v5998_v29 = vrot.slane %v5996_v12, 5  ;;  %v6010_v34 = vshll.u32 %v11896_v17, 16  ;;  %v5516_v19 = vsel %vm10165_vm14, %v5514_v39, %v5515_v58  ;;  %v11956_v12 = vld [vmem:[#allocation3 + $0x34] sm:$0xf] }
 0x2c7   : > { %9073 = vmatpush3.bf16.msra.mxu0 %v9444_v30  ;;  %v5506_v53 = vsel %vm10165_vm14, %v8113_v24, %v5505_v48  ;;  %v5990_v30 = vshrl.u32 %v11878_v57, 16  ;;  %v6003_v36 = vrot.slane %v6001_v23, 4  ;;  %v6020_v14 = vshll.u32 %v11898_v41, 16  ;;  %v9451_v24 = vld [vmem:[%s12890_s6 + $0xe0] sm:$0xff]  }
 0x2c8   : > { %8971 = vmatmul.mubr.bf16.gmra.mxu1 %v8082_v32  ;;  %9074 = vmatprep.subr.bf16.mxu0 %v9446_v54  ;;  %v11910_v48 = vrot.slane %v6010_v34, 5  ;;  %v8097_v10 = vcombine.low %v11734_v37, %v11736_v62  ;;  %v6062_v23 = vshrl.u32 %v11956_v12, 16 }
 0x2c9   : > { %8987 = vmatpush3.bf16.msra.mxu1 %v9437_v46  ;;  %8990 = vmatprep.mubr.bf16.mxu1 %v8091_v8  ;;  %v5509_v46 = vsel %vm10165_vm14, %v5507_v9, %v5508_v43  ;;  %v11894_v8 = vsel %vm10165_vm14, %v8114_v33, %v5512_v45  ;;  %v5992_v35 = vrot.slane %v5990_v30, 4  ;;  %v8096_v43 = vcombine.low %v11701_v60, %v11707_v1  ;;  %v11926_v33 = vld [vmem:[#allocation3 + $0x28] sm:$0xf]  ;;  %v11928_v60 = vld [vmem:[#allocation3 + $0x2c] sm:$0x1] }
 0x2ca   : > { %8988 = vmatprep.subr.bf16.mxu1 %v9439_v47  ;;  %9027 = vmatmul.mubr.bf16.gmra.mxu0 %v8118_v52  ;;  %v8121_v32 = vcombine.low %v5506_v53, %v5509_v46  ;;  %v8122_v7 = vcombine.low %v11894_v8, %v5516_v19  ;;  %v9455_v1 = vld [vmem:[%s12890_s6 + $0xd8] sm:$0xff]   ;;  %v6034_v58 = vshll.u32 %v11926_v33, 16  ;;  %v6038_v16 = vshrl.u32 %v11926_v33, 16  ;;  %v11949_v30 = vld [vmem:[#allocation3 + $0x30] sm:$0xf] }
 0x2cb   : > { %9030 = vmatprep.mubr.bf16.mxu0 %v8119_v44  ;;  %9075 = vmatpush3.bf16.msra.mxu0 %v9446_v54  ;;  %v6014_v54 = vshrl.u32 %v11896_v17, 16  ;;  %v5993_v52 = vor.u32 %v5992_v35, %v5988_v61  ;;  %v6006_v44 = vrot.slane %v6004_v59, 5  ;;  %v6049_v8 = vshrl.u32 %v11949_v30, 16  ;;  %v9464_v19 = vld [vmem:[%s12890_s6 + $0x1b8] sm:$0xff]  }
 0x2cc   : > { %9076 = vmatprep.subr.bf16.mxu0 %v9450_v26  ;;  %v6036_v4 = vrot.slane %v6034_v58, 5  ;;  %v6052_v35 = vshll.u32 %v11949_v30, 16 }
 0x2cd   : > { %8989 = vmatpush3.bf16.msra.mxu1 %v9439_v47  ;;  %v5983_v47 = vor.u32 %v5982_v28, %v5979_v11  ;;  %v5994_v9 = vrot.slane %v5993_v52, 4  ;;  %v6007_v45 = vor.u32 %v6006_v44, %v6003_v36  ;;  %v6051_v62 = vrot.slane %v6049_v8, 4  ;;  %v12016_v8 = vld [vmem:[#allocation3 + $0x50] sm:$0x1] }
 0x2ce   : > { %9038 = vmatprep.subr.bf16.mxu1 %v9443_v21  ;;  %v6054_v59 = vrot.slane %v6052_v35, 5 }
 0x2cf   : > { %9077 = vmatpush3.bf16.msra.mxu0 %v9450_v26  ;;  %v5984_v0 = vrot.slane %v5983_v47, 4  ;;  %v9458_v26 = vld [vmem:[%s12890_s6 + $0x108] sm:$0xff]  }
 0x2d0   : > { %8991 = vmatmul.mubr.bf16.vlgmr.msra.gmra.mxu1 %v8092_v42  ;;  %9078 = vmatprep.subr.bf16.mxu0 %v9452_v20  ;;  %v6022_v42 = vrot.slane %v6020_v14, 5  ;;  %v6064_v14 = vrot.slane %v6062_v23, 4 }
 0x2d1   : > { %9039 = vmatpush3.bf16.msra.mxu1 %v9443_v21  ;;  %8994 = vmatprep.mubr.bf16.mxu1 %v8093_v13  ;;  %v6016_v21 = vrot.slane %v6014_v54, 4  ;;  %v5989_v5 = vsel %vm9957_vm11, %v5984_v0, %v5988_v61  ;;  %v11924_v13 = vld [vmem:[#allocation3 + $0x24] sm:$0xf]  ;;  %v8098_v54 = vcombine.low %v11749_v15, %v11751_v6  ;;  %v9461_v0 = vld [vmem:[%s12890_s6 + $0xc8] sm:$0xff]  }
 0x2d2   : > { %9040 = vmatprep.subr.bf16.mxu1 %v9445_v25  ;;  %9031 = vmatmul.mubr.bf16.gmra.mxu0 %v8120_v22  ;;  %v6025_v53 = vshrl.u32 %v11924_v13, 16  ;;  %v6028_v46 = vshll.u32 %v11924_v13, 16  ;;  %v11982_v6 = vld [vmem:[#allocation3 + $0x3c] sm:$0xf] }
 0x2d3   : > { %9034 = vmatprep.mubr.bf16.mxu0 %v8121_v32  ;;  %9079 = vmatpush3.bf16.msra.mxu0 %v9452_v20  ;;  %v5999_v20 = vsel %vm9957_vm11, %v5994_v9, %v5998_v29  ;;  %v11958_v32 = vld [vmem:[#allocation3 + $0x38] sm:$0x1]  ;;  %v6058_v29 = vshll.u32 %v11956_v12, 16  ;;  %v11989_v9 = vld [vmem:[#allocation3 + $0x44] sm:$0x1] }
 0x2d4   : > { %9080 = vmatprep.subr.bf16.mxu0 %v9456_v55  ;;  %v8147_v56 = vcombine.low %v5989_v5, %v5999_v20  ;;  %v6027_v63 = vrot.slane %v6025_v53, 4  ;;  %v6030_v39 = vrot.slane %v6028_v46, 5  ;;  %v6068_v34 = vshll.u32 %v11958_v32, 16  ;;  %v9468_v5 = vld [vmem:[%s12890_s6 + $0x1b0] sm:$0xff]  }
 0x2d5   : > { %9041 = vmatpush3.bf16.msra.mxu1 %v9445_v25  ;;  %v6017_v25 = vor.u32 %v6016_v21, %v11910_v48  ;;  %v11975_v36 = vrot.slane %v6058_v29, 5  ;;  %v6055_v21 = vor.u32 %v6054_v59, %v6051_v62  ;;  %v8133_v59 = vcombine.low %v11924_v13, %v11926_v33 }
 0x2d6   : > { %9042 = vmatprep.subr.bf16.mxu1 %v9449_v50  ;;  %v6031_v28 = vor.u32 %v6030_v39, %v6027_v63  ;;  %v6070_v15 = vrot.slane %v6068_v34, 5  ;;  %v12006_v39 = vld [vmem:[#allocation3 + $0x48] sm:$0xf] }
 0x2d7   : > { %v6018_v22 = vrot.slane %v6017_v25, 4  ;;  %9081 = vmatpush3.bf16.msra.mxu0 %v9456_v55  ;;  %v9457_v55 = vld [vmem:[%s12890_s6 + $0xd0] sm:$0xff]   ;;  %v6056_v25 = vrot.slane %v6055_v21, 4  ;;  %v6100_v35 = vshll.u32 %v12006_v39, 16  ;;  %v12035_v21 = vld [vmem:[#allocation3 + $0x54] sm:$0xf] }
 0x2d8   : > { %8995 = vmatmul.mubr.bf16.gmra.mxu1 %v8094_v40  ;;  %v6008_v40 = vrot.slane %v6007_v45, 4  ;;  %9082 = vmatprep.subr.bf16.mxu0 %v9458_v26  ;;  %v6032_v47 = vrot.slane %v6031_v28, 4 }
 0x2d9   : > { %9043 = vmatpush3.bf16.msra.mxu1 %v9449_v50  ;;  %8998 = vmatprep.mubr.bf16.mxu1 %v8095_v2  ;;  %v6044_v50 = vshll.u32 %v11928_v60, 16  ;;  %v6040_v2 = vrot.slane %v6038_v16, 4  ;;  %v6023_v11 = vsel %vm9957_vm11, %v6018_v22, %v6022_v42  ;;  %v6073_v42 = vshrl.u32 %v11982_v6, 16 }
 0x2da   : > { %9044 = vmatprep.subr.bf16.mxu1 %v9451_v24  ;;  %v6013_v51 = vsel %vm9957_vm11, %v6008_v40, %v11910_v48  ;;  %9035 = vmatmul.mubr.bf16.gmra.mxu0 %v8122_v7  ;;  %v6037_v48 = vsel %vm9957_vm11, %v6032_v47, %v6036_v4  ;;  %v6076_v7 = vshll.u32 %v11982_v6, 16  ;;  %v8131_v40 = vcombine.low %v11874_v49, %v11878_v57  ;;  %v9467_v47 = vld [vmem:[%s12890_s6 + $0x178] sm:$0xff]  }
 0x2db   : > { %v6046_v61 = vrot.slane %v6044_v50, 5  ;;  %9086 = vmatprep.mubr.bf16.mxu0 %v8147_v56  ;;  %v6041_v37 = vor.u32 %v6040_v2, %v6036_v4  ;;  %9083 = vmatpush3.bf16.msra.mxu0 %v9458_v26  ;;  %v8148_v44 = vcombine.low %v6013_v51, %v6023_v11  ;;  %v6065_v26 = vor.u32 %v6064_v14, %v11975_v36  ;;  %v12008_v4 = vld [vmem:[#allocation3 + $0x4c] sm:$0xf]  ;;  %v9474_v14 = vld [vmem:[%s12890_s6 + $0x1a0] sm:$0xff]  }
 0x2dc   : > { %9084 = vmatprep.subr.bf16.mxu0 %v9462_v3  ;;  %v6075_v46 = vrot.slane %v6073_v42, 4  ;;  %v6078_v58 = vrot.slane %v6076_v7, 5  ;;  %v6092_v56 = vshll.u32 %v11989_v9, 16  ;;  %v8132_v22 = vcombine.low %v11890_v31, %v11896_v17 }
 0x2dd   : > { %9045 = vmatpush3.bf16.msra.mxu1 %v9451_v24  ;;  %v6042_v52 = vrot.slane %v6041_v37, 4  ;;  %v6066_v53 = vrot.slane %v6065_v26, 4  ;;  %v6061_v50 = vsel %vm9957_vm11, %v6056_v25, %v11975_v36  ;;  %v6097_v11 = vshrl.u32 %v12006_v39, 16  ;;  %v12041_v26 = vld [vmem:[#allocation3 + $0x5c] sm:$0x1] }
 0x2de   : > { %9046 = vmatprep.subr.bf16.mxu1 %v9455_v1  ;;  %v6079_v51 = vor.u32 %v6078_v58, %v6075_v46  ;;  %v6094_v2 = vrot.slane %v6092_v56, 5  ;;  %v6106_v37 = vshll.u32 %v12008_v4, 16  ;;  %v6110_v23 = vshrl.u32 %v12008_v4, 16 }
 0x2df   : > { %v6047_v24 = vsel %vm9957_vm11, %v6042_v52, %v6046_v61  ;;  %9085 = vmatpush3.bf16.msra.mxu0 %v9462_v3  ;;  %v9463_v3 = vld [vmem:[%s12890_s6 + $0xc0] sm:$0xff]   ;;  %v6071_v28 = vsel %vm9957_vm11, %v6066_v53, %v6070_v15  ;;  %v6099_v29 = vrot.slane %v6097_v11, 4  ;;  %v6121_v42 = vshrl.u32 %v12035_v21, 16 }
 0x2e0   : > { %8999 = vmatmul.mubr.bf16.gmra.mxu1 %v8096_v43  ;;  %v11987_v43 = vld [vmem:[#allocation3 + $0x40] sm:$0xf]  ;;  %v8149_v45 = vcombine.low %v6037_v48, %v6047_v24  ;;  %9134 = vmatprep.subr.bf16.mxu0 %v9464_v19  ;;  %v6080_v62 = vrot.slane %v6079_v51, 4  ;;  %v6108_v52 = vrot.slane %v6106_v37, 5  ;;  %v8150_v36 = vcombine.low %v6061_v50, %v6071_v28  ;;  %v12053_v51 = vld [vmem:[#allocation3 + $0x64] sm:$0xf] }
 0x2e1   : > { %9047 = vmatpush3.bf16.msra.mxu1 %v9455_v1  ;;  %9002 = vmatprep.mubr.bf16.mxu1 %v8097_v10  ;;  %v6082_v1 = vshll.u32 %v11987_v43, 16  ;;  %v6086_v20 = vshrl.u32 %v11987_v43, 16  ;;  %v9470_v10 = vld [vmem:[%s12890_s6 + $0x1a8] sm:$0xff]   ;;  %v6124_v7 = vshll.u32 %v12035_v21, 16  ;;  %v6123_v46 = vrot.slane %v6121_v42, 4 }
 0x2e2   : > { %9048 = vmatprep.subr.bf16.mxu1 %v9457_v55  ;;  %9087 = vmatmul.mubr.bf16.vlgmr.msra.gmra.mxu0 %v8148_v44  ;;  %v6112_v44 = vrot.slane %v6110_v23, 4  ;;  %v6140_v56 = vshll.u32 %v12041_v26, 16  ;;  %v6154_v23 = vshll.u32 %v12053_v51, 16 }
 0x2e3   : > { %v6084_v16 = vrot.slane %v6082_v1, 5  ;;  %v6088_v63 = vrot.slane %v6086_v20, 4  ;;  %9135 = vmatpush3.bf16.msra.mxu0 %v9464_v19  ;;  %9090 = vmatprep.mubr.bf16.mxu0 %v8149_v45  ;;  %v6102_v19 = vrot.slane %v6100_v35, 5  ;;  %v6126_v58 = vrot.slane %v6124_v7, 5  ;;  %v12058_v35 = vld [vmem:[#allocation3 + $0x68] sm:$0x1] }
 0x2e4   : > { %9136 = vmatprep.subr.bf16.mxu0 %v9468_v5  ;;  %v6113_v25 = vor.u32 %v6112_v44, %v6108_v52  ;;  %v6164_v44 = vshll.u32 %v12058_v35, 16 }
 0x2e5   : > { %9049 = vmatpush3.bf16.msra.mxu1 %v9457_v55  ;;  %v6089_v61 = vor.u32 %v6088_v63, %v6084_v16  ;;  %v6116_v55 = vshll.u32 %v12016_v8, 16  ;;  %v6103_v24 = vor.u32 %v6102_v19, %v6099_v29  ;;  %v6127_v28 = vor.u32 %v6126_v58, %v6123_v46  ;;  %v9482_v58 = vld [vmem:[%s12890_s6 + $0x188] sm:$0xff]  }
 0x2e6   : > { %9050 = vmatprep.subr.bf16.mxu1 %v9461_v0  ;;  %v6158_v19 = vshrl.u32 %v12053_v51, 16 }
 0x2e7   : > { %v6090_v34 = vrot.slane %v6089_v61, 4  ;;  %v6118_v48 = vrot.slane %v6116_v55, 5  ;;  %9137 = vmatpush3.bf16.msra.mxu0 %v9468_v5  ;;  %v9469_v5 = vld [vmem:[%s12890_s6 + $0x170] sm:$0xff]   ;;  %v6104_v53 = vrot.slane %v6103_v24, 4  ;;  %v6142_v61 = vrot.slane %v6140_v56, 5 }
 0x2e8   : > { %9003 = vmatmul.mubr.bf16.gmra.mxu1 %v8098_v54  ;;  %v6085_v54 = vsel %vm9957_vm11, %v6080_v62, %v6084_v16  ;;  %9138 = vmatprep.subr.bf16.mxu0 %v9470_v10  ;;  %v6114_v16 = vrot.slane %v6113_v25, 4  ;;  %v9476_v62 = vld [vmem:[%s12890_s6 + $0x198] sm:$0xff]   ;;  %v6128_v55 = vrot.slane %v6127_v28, 4  ;;  %v6160_v24 = vrot.slane %v6158_v19, 4  ;;  %v12096_v56 = vld [vmem:[#allocation3 + $0x1c] sm:$0xf] }
 0x2e9   : > { %9051 = vmatpush3.bf16.msra.mxu1 %v9461_v0  ;;  %9054 = vmatprep.mubr.bf16.mxu1 %v8131_v40  ;;  %v6095_v15 = vsel %vm9957_vm11, %v6090_v34, %v6094_v2  ;;  %v12039_v0 = vld [vmem:[#allocation3 + $0x58] sm:$0xf]  ;;  %v12051_v40 = vld [vmem:[#allocation3 + $0x60] sm:$0xf]  ;;  %v6109_v11 = vsel %vm9957_vm11, %v6104_v53, %v6108_v52  ;;  %v6394_v28 = vrot.slane %v11896_v17, 5  ;;  %v6390_v17 = vrot.slane %v11880_v27, 5 }
 0x2ea   : > { %9052 = vmatprep.subr.bf16.mxu1 %v9463_v3  ;;  %v8151_v45 = vcombine.low %v6085_v54, %v6095_v15  ;;  %v6130_v1 = vshll.u32 %v12039_v0, 16  ;;  %v6134_v20 = vshrl.u32 %v12039_v0, 16  ;;  %9091 = vmatmul.mubr.bf16.gmra.mxu0 %v8150_v36  ;;  %v6145_v2 = vshrl.u32 %v12051_v40, 16  ;;  %v9490_v27 = vld [vmem:[%s12890_s6 + $0x238] sm:$0xff]  }
 0x2eb   : > { %9139 = vmatpush3.bf16.msra.mxu0 %v9470_v10  ;;  %v6148_v37 = vshll.u32 %v12051_v40, 16  ;;  %v6156_v54 = vrot.slane %v6154_v23, 5  ;;  %v6401_v23 = vrot.slane %v11926_v33, 5  ;;  %v6397_v19 = vrot.slane %v11898_v41, 5  ;;  %v12132_v33 = vld [vmem:[#allocation3 + $0x34] sm:$0xf] }
 0x2ec   : > { %v6132_v63 = vrot.slane %v6130_v1, 5  ;;  %v6136_v50 = vrot.slane %v6134_v20, 4  ;;  %9140 = vmatprep.subr.bf16.mxu0 %v9474_v14  ;;  %9094 = vmatprep.mubr.bf16.mxu0 %v8151_v45  ;;  %v6147_v10 = vrot.slane %v6145_v2, 4  ;;  %v9475_v1 = vld [vmem:[%s12890_s6 + $0x160] sm:$0xff]   ;;  %v8135_v20 = vcombine.low %v11982_v6, %v11987_v43 }
 0x2ed   : > { %9053 = vmatpush3.bf16.msra.mxu1 %v9463_v3  ;;  %v6119_v3 = vsel %vm9957_vm11, %v6114_v16, %v6118_v48  ;;  %v6150_v34 = vrot.slane %v6148_v37, 5  ;;  %v9473_v48 = vld [vmem:[%s12890_s6 + $0x168] sm:$0xff]   ;;  %v6161_v25 = vor.u32 %v6160_v24, %v6156_v54  ;;  %v12112_v37 = vld [vmem:[#allocation3 + $0x24] sm:$0xf]  ;;  %v8166_v41 = vrot.slane %v11949_v30, 9 }
 0x2ee   : > { %9102 = vmatprep.subr.bf16.mxu1 %v9467_v47  ;;  %v6137_v29 = vor.u32 %v6136_v50, %v6132_v63  ;;  %v8152_v52 = vcombine.low %v6109_v11, %v6119_v3  ;;  %v9479_v50 = vld [vmem:[%s12890_s6 + $0x158] sm:$0xff]   ;;  %v9486_v11 = vld [vmem:[%s12890_s6 + $0x180] sm:$0xff]   ;;  %v6411_v24 = vrot.slane %v11958_v32, 5 }
 0x2ef   : > { %9141 = vmatpush3.bf16.msra.mxu0 %v9474_v14  ;;  %v6151_v15 = vor.u32 %v6150_v34, %v6147_v10  ;;  %v6166_v14 = vrot.slane %v6164_v44, 5  ;;  %v6162_v46 = vrot.slane %v6161_v25, 4  ;;  %v12114_v3 = vld [vmem:[#allocation3 + $0x28] sm:$0xf]  ;;  %v8164_v34 = vrot.slane %v11890_v31, 9  ;;  %v9485_v44 = vld [vmem:[%s12890_s6 + $0x148] sm:$0xff]  }
 0x2f0   : > { %9055 = vmatmul.mubr.bf16.vlgmr.msra.gmra.mxu1 %v8132_v22  ;;  %v6138_v36 = vrot.slane %v6137_v29, 4  ;;  %v6133_v22 = vsel %vm9957_vm11, %v6128_v55, %v6132_v63  ;;  %9142 = vmatprep.subr.bf16.mxu0 %v9476_v62  ;;  %v6387_v63 = vrot.slane %v11878_v57, 5  ;;  %v8163_v29 = vrot.slane %v11874_v49, 9 }
 0x2f1   : > { %9103 = vmatpush3.bf16.msra.mxu1 %v9467_v47  ;;  %9058 = vmatprep.mubr.bf16.mxu1 %v8133_v59  ;;  %v8134_v47 = vcombine.low %v11949_v30, %v11956_v12  ;;  %v9480_v59 = vld [vmem:[%s12890_s6 + $0x190] sm:$0xff]   ;;  %v6152_v45 = vrot.slane %v6151_v15, 4  ;;  %v6167_v16 = vsel %vm9957_vm11, %v6162_v46, %v6166_v14  ;;  %v8137_v55 = vcombine.low %v12035_v21, %v12039_v0 }
 0x2f2   : > { %9104 = vmatprep.subr.bf16.mxu1 %v9469_v5  ;;  %v6143_v42 = vsel %vm9957_vm11, %v6138_v36, %v6142_v61  ;;  %9095 = vmatmul.mubr.bf16.gmra.mxu0 %v8152_v52  ;;  %v8136_v61 = vcombine.low %v12006_v39, %v12008_v4  ;;  %v6389_v10 = vrot.slane %v6387_v63, 4  ;;  %v12126_v52 = vld [vmem:[#allocation3 + $0x30] sm:$0xf]  ;;  %v6396_v36 = vrot.slane %v6394_v28, 4 }
 0x2f3   : > { %v8153_v7 = vcombine.low %v6133_v22, %v6143_v42  ;;  %9143 = vmatpush3.bf16.msra.mxu0 %v9476_v62  ;;  %v6157_v53 = vsel %vm9957_vm11, %v6152_v45, %v6156_v54  ;;  %v9481_v62 = vld [vmem:[%s12890_s6 + $0x150] sm:$0xff]   ;;  %v6408_v49 = vrot.slane %v11956_v12, 5  ;;  %v8165_v54 = vrot.slane %v11924_v13, 9  ;;  %v12166_v45 = vld [vmem:[#allocation3 + $0x4c] sm:$0xf] }
 0x2f4   : > { %9144 = vmatprep.subr.bf16.mxu0 %v9480_v59  ;;  %v8154_v2 = vcombine.low %v6157_v53, %v6167_v16  ;;  %v6404_v31 = vrot.slane %v11928_v60, 5  ;;  %v8188_v12 = vcombine.low %v12112_v37, %v12114_v3  ;;  %v12144_v22 = vld [vmem:[#allocation3 + $0x40] sm:$0xf]  ;;  %v6403_v15 = vrot.slane %v6401_v23, 4 }
 0x2f5   : > { %9105 = vmatpush3.bf16.msra.mxu1 %v9469_v5  ;;  %9098 = vmatprep.mubr.bf16.mxu0 %v8153_v7  ;;  %v12094_v5 = vld [vmem:[#allocation3 + $0x18] sm:$0xf]  ;;  %v6388_v13 = vsel %vm10165_vm14, %v8163_v29, %v6387_v63  ;;  %v6391_v60 = vsel %vm10165_vm14, %v6389_v10, %v6390_v17  ;;  %v12153_v30 = vsel %vm10165_vm14, %v8164_v34, %v6394_v28  ;;  %v6410_v7 = vrot.slane %v6408_v49, 4  ;;  %v12218_v17 = vld [vmem:[#allocation3 + $0x64] sm:$0xf] }
 0x2f6   : > { %9106 = vmatprep.subr.bf16.mxu1 %v9473_v48  ;;  %v8187_v57 = vcombine.low %v12094_v5, %v12096_v56  ;;  %v12162_v32 = vsel %vm10165_vm14, %v6396_v36, %v6397_v19  ;;  %v8189_v42 = vcombine.low %v12126_v52, %v12132_v33  ;;  %v6415_v25 = vrot.slane %v11987_v43, 5  ;;  %v12228_v34 = vld [vmem:[#allocation3 + $0x6c] sm:$0xf]  ;;  %v12230_v19 = vld [vmem:[#allocation3 + $0x70] sm:$0xf] }
 0x2f7   : > { %9145 = vmatpush3.bf16.msra.mxu0 %v9480_v59  ;;  %v12158_v59 = vld [vmem:[#allocation3 + $0x48] sm:$0xf]  ;;  %v8167_v14 = vrot.slane %v11982_v6, 9  ;;  %v6422_v53 = vrot.slane %v12008_v4, 5  ;;  %v8138_v46 = vcombine.low %v12051_v40, %v12053_v51  ;;  %v8171_v16 = vcombine.low %v6388_v13, %v6391_v60 }
 0x2f8   : > { %9059 = vmatmul.mubr.bf16.gmra.mxu1 %v8134_v47  ;;  %9146 = vmatprep.subr.bf16.mxu0 %v9482_v58  ;;  %v9492_v47 = vld [vmem:[%s12890_s6 + $0x230] sm:$0xff]   ;;  %v6417_v63 = vrot.slane %v6415_v25, 4  ;;  %v6425_v43 = vrot.slane %v12016_v8, 5  ;;  %v8172_v6 = vcombine.low %v12153_v30, %v12162_v32  ;;  %v12188_v4 = vsel %vm10165_vm14, %v8165_v54, %v6401_v23  ;;  %v9497_v32 = vld [vmem:[%s12890_s6 + $0x1e8] sm:$0xff]  }
 0x2f9   : > { %9107 = vmatpush3.bf16.msra.mxu1 %v9473_v48  ;;  %9062 = vmatprep.mubr.bf16.mxu1 %v8135_v20  ;;  %v12142_v48 = vld [vmem:[#allocation3 + $0x3c] sm:$0xf]  ;;  %v8168_v20 = vrot.slane %v12006_v39, 9  ;;  %v6424_v8 = vrot.slane %v6422_v53, 4  ;;  %v12200_v28 = vsel %vm10165_vm14, %v8166_v41, %v6408_v49  ;;  %v12212_v29 = vsel %vm10165_vm14, %v8167_v14, %v6415_v25  ;;  %v12266_v25 = vld [vmem:[#allocation3 + $0x2c] sm:$0x1] }
 0x2fa   : > { %9108 = vmatprep.subr.bf16.mxu1 %v9475_v1  ;;  %9099 = vmatmul.mubr.bf16.gmra.mxu0 %v8154_v2  ;;  %v9496_v39 = vld [vmem:[%s12890_s6 + $0x228] sm:$0xff]   ;;  %v8169_v36 = vrot.slane %v12035_v21, 9  ;;  %v6429_v49 = vrot.slane %v12039_v0, 5  ;;  %v8170_v54 = vrot.slane %v12051_v40, 9  ;;  %v6439_v41 = vrot.slane %v12058_v35, 5 }
 0x2fb   : > { %9147 = vmatpush3.bf16.msra.mxu0 %v9482_v58  ;;  %9150 = vmatprep.mubr.bf16.mxu0 %v8187_v57  ;;  %v9487_v58 = vld [vmem:[%s12890_s6 + $0x140] sm:$0xff]   ;;  %v12192_v2 = vld [vmem:[#allocation3 + $0x58] sm:$0xf]  ;;  %v12204_v57 = vld [vmem:[#allocation3 + $0x60] sm:$0xf]  ;;  %v12216_v10 = vsel %vm10165_vm14, %v8168_v20, %v6422_v53  ;;  %v8194_v14 = vcombine.low %v12228_v34, %v12230_v19 }
 0x2fc   : > { %9148 = vmatprep.subr.bf16.mxu0 %v9486_v11  ;;  %v6431_v40 = vrot.slane %v6429_v49, 4 }
 0x2fd   : > { %9109 = vmatpush3.bf16.msra.mxu1 %v9475_v1  ;;  %v6418_v1 = vrot.slane %v11989_v9, 5  ;;  %v8190_v9 = vcombine.low %v12142_v48, %v12144_v22 }
 0x2fe   : > { %9110 = vmatprep.subr.bf16.mxu1 %v9479_v50 }
 0x2ff   : > { %9149 = vmatpush3.bf16.msra.mxu0 %v9486_v11  ;;  %v12196_v11 = vsel %vm10165_vm14, %v6403_v15, %v6404_v31  ;;  %v12222_v23 = vsel %vm10165_vm14, %v6417_v63, %v6418_v1  ;;  %v6436_v31 = vrot.slane %v12053_v51, 5  ;;  %v9498_v51 = vld [vmem:[%s12890_s6 + $0x220] sm:$0xff]   ;;  %v12256_v15 = vsel %vm10165_vm14, %v8169_v36, %v6429_v49 }
 0x300   : > { %9063 = vmatmul.mubr.bf16.gmra.mxu1 %v8136_v61  ;;  %9198 = vmatprep.subr.bf16.mxu0 %v9490_v27  ;;  %v8191_v61 = vcombine.low %v12158_v59, %v12166_v45  ;;  %v8173_v21 = vcombine.low %v12188_v4, %v12196_v11  ;;  %v8175_v35 = vcombine.low %v12212_v29, %v12222_v23  ;;  %v8220_v63 = vrot.slane %v12112_v37, 9 }
 0x301   : > { %9111 = vmatpush3.bf16.msra.mxu1 %v9479_v50  ;;  %9066 = vmatprep.mubr.bf16.mxu1 %v8137_v55  ;;  %v12190_v50 = vld [vmem:[#allocation3 + $0x54] sm:$0xf]  ;;  %v12226_v55 = vsel %vm10165_vm14, %v6424_v8, %v6425_v43  ;;  %v12272_v1 = vsel %vm10165_vm14, %v8170_v54, %v6436_v31  ;;  %v7318_v43 = vrot.slane %v12114_v3, 5  ;;  %v7321_v4 = vrot.slane %v12266_v25, 5 }
 0x302   : > { %9112 = vmatprep.subr.bf16.mxu1 %v9481_v62  ;;  %9151 = vmatmul.mubr.bf16.vlgmr.msra.gmra.mxu0 %v8188_v12  ;;  %v9491_v12 = vld [vmem:[%s12890_s6 + $0x1f8] sm:$0xff]   ;;  %v8176_v13 = vcombine.low %v12216_v10, %v12226_v55  ;;  %v6901_v8 = vshrl.u32 %v12094_v5, 16  ;;  %v6910_v11 = vshll.u32 %v12096_v56, 16  ;;  %v6949_v23 = vshrl.u32 %v12126_v52, 16 }
 0x303   : > { %9199 = vmatpush3.bf16.msra.mxu0 %v9490_v27  ;;  %9154 = vmatprep.mubr.bf16.mxu0 %v8189_v42  ;;  %v6432_v27 = vrot.slane %v12041_v26, 5  ;;  %v8192_v26 = vcombine.low %v12190_v50, %v12192_v2  ;;  %v8219_v42 = vrot.slane %v12094_v5, 9  ;;  %v7320_v49 = vrot.slane %v7318_v43, 4 }
 0x304   : > { %9200 = vmatprep.subr.bf16.mxu0 %v9492_v47  ;;  %v6903_v54 = vrot.slane %v6901_v8, 4  ;;  %v6912_v30 = vrot.slane %v6910_v11, 5 }
 0x305   : > { %9113 = vmatpush3.bf16.msra.mxu1 %v9481_v62  ;;  %v12208_v62 = vsel %vm10165_vm14, %v6410_v7, %v6411_v24  ;;  %v6438_v24 = vrot.slane %v6436_v31, 4  ;;  %v12262_v60 = vsel %vm10165_vm14, %v6431_v40, %v6432_v27  ;;  %v7311_v7 = vrot.slane %v12096_v56, 5 }
 0x306   : > { %9114 = vmatprep.subr.bf16.mxu1 %v9485_v44  ;;  %v8174_v0 = vcombine.low %v12200_v28, %v12208_v62  ;;  %v6914_v27 = vshrl.u32 %v12096_v56, 16  ;;  %v12319_v40 = vsel %vm10165_vm14, %v7320_v49, %v7321_v4  ;;  %v8221_v49 = vrot.slane %v12126_v52, 9 }
 0x307   : > { %9201 = vmatpush3.bf16.msra.mxu0 %v9492_v47  ;;  %v6653_v47 = vld [vmem:[#allocation3 + $0x20] sm:$0x1]  ;;  %v12276_v20 = vsel %vm10165_vm14, %v6438_v24, %v6439_v41  ;;  %v8222_v28 = vrot.slane %v12142_v48, 9  ;;  %v7332_v62 = vrot.slane %v12144_v22, 5 }
 0x308   : > { %9067 = vmatmul.mubr.bf16.gmra.mxu1 %v8138_v46  ;;  %9202 = vmatprep.subr.bf16.mxu0 %v9496_v39  ;;  %v7314_v53 = vrot.slane %v6653_v47, 5  ;;  %v9494_v46 = vld [vmem:[%s12890_s6 + $0x1f0] sm:$0xff]   ;;  %v8178_v36 = vcombine.low %v12272_v1, %v12276_v20  ;;  %v6916_v56 = vrot.slane %v6914_v27, 4  ;;  %v6920_v41 = vshll.u32 %v6653_v47, 16 }
 0x309   : > { %9115 = vmatpush3.bf16.msra.mxu1 %v9485_v44  ;;  %9118 = vmatprep.mubr.bf16.mxu1 %v8171_v16  ;;  %v8193_v44 = vcombine.low %v12204_v57, %v12218_v17  ;;  %v7313_v16 = vrot.slane %v7311_v7, 4  ;;  %v6938_v47 = vshrl.u32 %v12114_v3, 16 }
 0x30a   : > { %9116 = vmatprep.subr.bf16.mxu1 %v9487_v58  ;;  %9155 = vmatmul.mubr.bf16.gmra.mxu0 %v8190_v9  ;;  %v9502_v9 = vld [vmem:[%s12890_s6 + $0x218] sm:$0xff]  }
 0x30b   : > { %9203 = vmatpush3.bf16.msra.mxu0 %v9496_v39  ;;  %9158 = vmatprep.mubr.bf16.mxu0 %v8191_v61  ;;  %v6904_v39 = vshll.u32 %v12094_v5, 16  ;;  %v12299_v61 = vsel %vm10165_vm14, %v8219_v42, %v7311_v7  ;;  %v12304_v5 = vsel %vm10165_vm14, %v7313_v16, %v7314_v53  ;;  %v6934_v42 = vshll.u32 %v12114_v3, 16 }
 0x30c   : > { %9204 = vmatprep.subr.bf16.mxu0 %v9498_v51  ;;  %v6917_v7 = vor.u32 %v6916_v56, %v6912_v30  ;;  %v6922_v53 = vrot.slane %v6920_v41, 5  ;;  %v6940_v3 = vrot.slane %v6938_v47, 4  ;;  %v6958_v47 = vshll.u32 %v12132_v33, 16 }
 0x30d   : > { %9117 = vmatpush3.bf16.msra.mxu1 %v9487_v58  ;;  %v8177_v58 = vcombine.low %v12256_v15, %v12262_v60  ;;  %v6906_v31 = vrot.slane %v6904_v39, 5  ;;  %v6936_v8 = vrot.slane %v6934_v42, 5  ;;  %v6944_v39 = vshll.u32 %v12266_v25, 16 }
 0x30e   : > { %9166 = vmatprep.subr.bf16.mxu1 %v9491_v12  ;;  %v6918_v11 = vrot.slane %v6917_v7, 4  ;;  %v8227_v25 = vcombine.low %v12299_v61, %v12304_v5 }
 0x30f   : > { %9205 = vmatpush3.bf16.msra.mxu0 %v9498_v51  ;;  %v6907_v24 = vor.u32 %v6906_v31, %v6903_v54  ;;  %v6928_v51 = vshll.u32 %v12112_v37, 16  ;;  %v6941_v31 = vor.u32 %v6940_v3, %v6936_v8  ;;  %v6946_v56 = vrot.slane %v6944_v39, 5 }
 0x310   : > { %9119 = vmatmul.mubr.bf16.vlgmr.msra.gmra.mxu1 %v8172_v6  ;;  %v12311_v6 = vsel %vm10165_vm14, %v8220_v63, %v7318_v43  ;;  %9206 = vmatprep.subr.bf16.mxu0 %v9502_v9  ;;  %v12324_v63 = vld [vmem:[#allocation3 + $0x38] sm:$0x1]  ;;  %v6973_v3 = vshrl.u32 %v12142_v48, 16 }
 0x311   : > { %9167 = vmatpush3.bf16.msra.mxu1 %v9491_v12  ;;  %9122 = vmatprep.mubr.bf16.mxu1 %v8173_v21  ;;  %v6925_v12 = vshrl.u32 %v12112_v37, 16  ;;  %v9504_v21 = vld [vmem:[%s12890_s6 + $0x210] sm:$0xff]   ;;  %v6908_v43 = vrot.slane %v6907_v24, 4  ;;  %v6930_v4 = vrot.slane %v6928_v51, 5  ;;  %v9500_v37 = vld [vmem:[%s12890_s6 + $0x1e0] sm:$0xff]   ;;  %v7328_v54 = vrot.slane %v12324_v63, 5 }
 0x312   : > { %9168 = vmatprep.subr.bf16.mxu1 %v9494_v46  ;;  %9159 = vmatmul.mubr.bf16.gmra.mxu0 %v8192_v26  ;;  %v9508_v26 = vld [vmem:[%s12890_s6 + $0x208] sm:$0xff]   ;;  %v8228_v61 = vcombine.low %v12311_v6, %v12319_v40  ;;  %v7334_v51 = vrot.slane %v7332_v62, 4  ;;  %v6968_v39 = vshll.u32 %v12324_v63, 16  ;;  %v6976_v63 = vshll.u32 %v12142_v48, 16 }
 0x313   : > { %v6927_v16 = vrot.slane %v6925_v12, 4  ;;  %9207 = vmatpush3.bf16.msra.mxu0 %v9502_v9  ;;  %9162 = vmatprep.mubr.bf16.mxu0 %v8193_v44  ;;  %v6913_v9 = vsel %vm9957_vm11, %v6908_v43, %v6912_v30  ;;  %v6923_v44 = vsel %vm9957_vm11, %v6918_v11, %v6922_v53  ;;  %v12351_v12 = vld [vmem:[#allocation3 + $0x44] sm:$0x1]  ;;  %v6942_v30 = vrot.slane %v6941_v31, 4  ;;  %v9509_v48 = vld [vmem:[%s12890_s6 + $0x1c8] sm:$0xff]  }
 0x314   : > { %9208 = vmatprep.subr.bf16.mxu0 %v9504_v21  ;;  %v12375_v24 = vcombine.low %v6913_v9, %v6923_v44  ;;  %v7335_v42 = vrot.slane %v12351_v12, 5  ;;  %v6951_v53 = vrot.slane %v6949_v23, 4  ;;  %v6960_v11 = vrot.slane %v6958_v47, 5 }
 0x315   : > { %9169 = vmatpush3.bf16.msra.mxu1 %v9494_v46  ;;  %v7325_v46 = vrot.slane %v12132_v33, 5  ;;  %v6931_v27 = vor.u32 %v6930_v4, %v6927_v16  ;;  %v6947_v7 = vsel %vm9957_vm11, %v6942_v30, %v6946_v56  ;;  %v6952_v16 = vshll.u32 %v12126_v52, 16  ;;  %v9506_v52 = vld [vmem:[%s12890_s6 + $0x1d0] sm:$0xff]  }
 0x316   : > { %9170 = vmatprep.subr.bf16.mxu1 %v9497_v32  ;;  %v12391_v4 = vsel %vm10165_vm14, %v8222_v28, %v7332_v62  ;;  %v6975_v9 = vrot.slane %v6973_v3, 4  ;;  %v6970_v31 = vrot.slane %v6968_v39, 5  ;;  %v6978_v10 = vrot.slane %v6976_v63, 5 }
 0x317   : > { %v7327_v41 = vrot.slane %v7325_v46, 4  ;;  %v6932_v5 = vrot.slane %v6931_v27, 4  ;;  %9209 = vmatpush3.bf16.msra.mxu0 %v9504_v21  ;;  %v6986_v27 = vshrl.u32 %v12144_v22, 16  ;;  %v8223_v56 = vrot.slane %v12158_v59, 9 }
 0x318   : > { %9123 = vmatmul.mubr.bf16.gmra.mxu1 %v8174_v0  ;;  %v9503_v0 = vld [vmem:[%s12890_s6 + $0x1d8] sm:$0xff]   ;;  %9210 = vmatprep.subr.bf16.mxu0 %v9508_v26  ;;  %v6979_v60 = vor.u32 %v6978_v10, %v6975_v9  ;;  %v8224_v30 = vrot.slane %v12190_v50, 9  ;;  %v7346_v23 = vrot.slane %v12192_v2, 5  ;;  %v7006_v39 = vshll.u32 %v12166_v45, 16 }
 0x319   : > { %9171 = vmatpush3.bf16.msra.mxu1 %v9497_v32  ;;  %9126 = vmatprep.mubr.bf16.mxu1 %v8175_v35  ;;  %v12365_v32 = vsel %vm10165_vm14, %v8221_v49, %v7325_v46  ;;  %v12369_v29 = vsel %vm10165_vm14, %v7327_v41, %v7328_v54  ;;  %v9510_v35 = vld [vmem:[%s12890_s6 + $0x200] sm:$0xff]   ;;  %v6937_v21 = vsel %vm9957_vm11, %v6932_v5, %v6936_v8  ;;  %v6962_v8 = vshrl.u32 %v12132_v33, 16  ;;  %v6671_v9 = vld [vmem:[#allocation3 + $0x68] sm:$0x1] }
 0x31a   : > { %9172 = vmatprep.subr.bf16.mxu1 %v9500_v37  ;;  %9163 = vmatmul.mubr.bf16.gmra.mxu0 %v8194_v14  ;;  %v8229_v43 = vcombine.low %v12365_v32, %v12369_v29  ;;  %v6954_v14 = vrot.slane %v6952_v16, 5  ;;  %v12403_v49 = vsel %vm10165_vm14, %v7334_v51, %v7335_v42  ;;  %v6982_v46 = vshll.u32 %v12144_v22, 16 }
 0x31b   : > { %9211 = vmatpush3.bf16.msra.mxu0 %v9508_v26  ;;  %9214 = vmatprep.mubr.bf16.mxu0 %v8227_v25  ;;  %v6964_v33 = vrot.slane %v6962_v8, 4  ;;  %v6992_v54 = vshll.u32 %v12351_v12, 16  ;;  %v6665_v25 = vld [vmem:[#allocation3 + $0x50] sm:$0x1]  ;;  %v7339_v41 = vrot.slane %v12166_v45, 5  ;;  %v12435_v29 = vrot.slane %v6979_v60, 4 }
 0x31c   : > { %9212 = vmatprep.subr.bf16.mxu0 %v9510_v35  ;;  %v6955_v26 = vor.u32 %v6954_v14, %v6951_v53  ;;  %v12418_v55 = vrot.slane %v6982_v46, 5  ;;  %v12422_v12 = vld [vmem:[#allocation3 + $0x5c] sm:$0x1]  ;;  %v7342_v5 = vrot.slane %v6665_v25, 5  ;;  %v8230_v42 = vcombine.low %v12391_v4, %v12403_v49 }
 0x31d   : > { %9173 = vmatpush3.bf16.msra.mxu1 %v9500_v37  ;;  %v12398_v37 = vcombine.low %v6937_v21, %v6947_v7  ;;  %v6965_v44 = vor.u32 %v6964_v33, %v6960_v11  ;;  %v9511_v21 = vld [vmem:[%s12890_s6 + $0x1c0] sm:$0xff]   ;;  %v7340_v6 = vsel %vm10165_vm14, %v8223_v56, %v7339_v41  ;;  %v7348_v16 = vrot.slane %v7346_v23, 4 }
 0x31e   : > { %9174 = vmatprep.subr.bf16.mxu1 %v9503_v0  ;;  %v6956_v22 = vrot.slane %v6955_v26, 4  ;;  %v6985_v53 = vsel %vm9957_vm11, %v12435_v29, %v12418_v55  ;;  %v7347_v47 = vsel %vm10165_vm14, %v8224_v30, %v7346_v23  ;;  %v7000_v8 = vshll.u32 %v12158_v59, 16 }
 0x31f   : > { %9213 = vmatpush3.bf16.msra.mxu0 %v9510_v35  ;;  %v6966_v15 = vrot.slane %v6965_v44, 4  ;;  %v7349_v35 = vrot.slane %v12422_v12, 5  ;;  %v7010_v14 = vshrl.u32 %v12166_v45, 16  ;;  %v7030_v33 = vshll.u32 %v12192_v2, 16 }
 0x320   : > { %9127 = vmatmul.mubr.bf16.gmra.mxu1 %v8176_v13  ;;  %v6988_v13 = vrot.slane %v6986_v27, 4  ;;  %v6961_v28 = vsel %vm9957_vm11, %v6956_v22, %v6960_v11  ;;  %v7016_v11 = vshll.u32 %v6665_v25, 16  ;;  %v7002_v20 = vrot.slane %v7000_v8, 5 }
 0x321   : > { %9175 = vmatpush3.bf16.msra.mxu1 %v9503_v0  ;;  %9130 = vmatprep.mubr.bf16.mxu1 %v8177_v58  ;;  %v12424_v58 = vrot.slane %v6992_v54, 5  ;;  %v7341_v0 = vrot.slane %v7339_v41, 4  ;;  %v6971_v32 = vsel %vm9957_vm11, %v6966_v15, %v6970_v31  ;;  %v7012_v49 = vrot.slane %v7010_v14, 4 }
 0x322   : > { %9176 = vmatprep.subr.bf16.mxu1 %v9506_v52  ;;  %v6989_v62 = vor.u32 %v6988_v13, %v12418_v55  ;;  %9215 = vmatmul.mubr.bf16.vlgmr.msra.gmra.mxu0 %v8228_v61  ;;  %v6997_v61 = vshrl.u32 %v12158_v59, 16  ;;  %v8205_v7 = vcombine.low %v6961_v28, %v6971_v32  ;;  %v7008_v59 = vrot.slane %v7006_v39, 5  ;;  %v6674_v55 = vld [vmem:[#allocation3 + $0x74] sm:$0x1] }
 0x323   : > { %9218 = vmatprep.mubr.bf16.mxu0 %v8229_v43  ;;  %v7343_v40 = vsel %vm10165_vm14, %v7341_v0, %v7342_v5  ;;  %v7018_v46 = vrot.slane %v7016_v11, 5  ;;  %v7034_v26 = vshrl.u32 %v12192_v2, 16  ;;  %v12474_v25 = vrot.slane %v7030_v33, 5 }
 0x324   : > { %v12442_v51 = vrot.slane %v6989_v62, 4  ;;  %v6999_v43 = vrot.slane %v6997_v61, 4  ;;  %v8231_v4 = vcombine.low %v7340_v6, %v7343_v40  ;;  %v7013_v27 = vor.u32 %v7012_v49, %v7008_v59 }
 0x325   : > { %9177 = vmatpush3.bf16.msra.mxu1 %v9506_v52  ;;  %v7350_v52 = vsel %vm10165_vm14, %v7348_v16, %v7349_v35  ;;  %v7036_v31 = vrot.slane %v7034_v26, 4  ;;  %v7353_v10 = vrot.slane %v12218_v17, 5  ;;  %v7356_v2 = vrot.slane %v6671_v9, 5 }
 0x326   : > { %9178 = vmatprep.subr.bf16.mxu1 %v9509_v48  ;;  %v6995_v1 = vsel %vm9957_vm11, %v12442_v51, %v12424_v58  ;;  %v8232_v3 = vcombine.low %v7347_v47, %v7350_v52  ;;  %v7003_v63 = vor.u32 %v7002_v20, %v6999_v43  ;;  %v7014_v22 = vrot.slane %v7013_v27, 4 }
 0x327   : > { %v8226_v56 = vrot.slane %v12228_v34, 9  ;;  %v7037_v15 = vor.u32 %v7036_v31, %v12474_v25  ;;  %v7355_v58 = vrot.slane %v7353_v10, 4  ;;  %v7360_v28 = vrot.slane %v12230_v19, 5 }
 0x328   : > { %9131 = vmatmul.mubr.bf16.gmra.mxu1 %v8178_v36  ;;  %v7021_v36 = vshrl.u32 %v12190_v50, 16  ;;  %v7004_v44 = vrot.slane %v7003_v63, 4  ;;  %v7363_v62 = vrot.slane %v6674_v55, 5  ;;  %v7045_v32 = vshrl.u32 %v12204_v57, 16 }
 0x329   : > { %9179 = vmatpush3.bf16.msra.mxu1 %v9509_v48  ;;  %9182 = vmatprep.mubr.bf16.mxu1 %v12375_v24  ;;  %v7024_v24 = vshll.u32 %v12190_v50, 16  ;;  %v8225_v48 = vrot.slane %v12204_v57, 9  ;;  %v7040_v50 = vshll.u32 %v12422_v12, 16  ;;  %v7019_v12 = vsel %vm9957_vm11, %v7014_v22, %v7018_v46 }
 0x32a   : > { %9180 = vmatprep.subr.bf16.mxu1 %v9511_v21  ;;  %v7023_v45 = vrot.slane %v7021_v36, 4  ;;  %9219 = vmatmul.mubr.bf16.gmra.mxu0 %v8230_v42  ;;  %v7009_v41 = vsel %vm9957_vm11, %v7004_v44, %v7008_v59  ;;  %v7038_v0 = vrot.slane %v7037_v15, 4  ;;  %v8206_v29 = vcombine.low %v6985_v53, %v6995_v1 }
 0x32b   : > { %v7026_v54 = vrot.slane %v7024_v24, 5  ;;  %9222 = vmatprep.mubr.bf16.mxu0 %v8231_v4  ;;  %v7354_v60 = vsel %vm10165_vm14, %v8225_v48, %v7353_v10  ;;  %v7042_v30 = vrot.slane %v7040_v50, 5  ;;  %v8207_v23 = vcombine.low %v7009_v41, %v7019_v12 }
 0x32c   : > { %v7361_v51 = vsel %vm10165_vm14, %v8226_v56, %v7360_v28  ;;  %v7047_v6 = vrot.slane %v7045_v32, 4  ;;  %v7048_v40 = vshll.u32 %v12204_v57, 16  ;;  %v7054_v61 = vshll.u32 %v12218_v17, 16 }
 0x32d   : > { %9181 = vmatpush3.bf16.msra.mxu1 %v9511_v21  ;;  %v7027_v13 = vor.u32 %v7026_v54, %v7023_v45  ;;  %v7362_v21 = vrot.slane %v7360_v28, 4  ;;  %v7058_v53 = vshrl.u32 %v12218_v17, 16  ;;  %v7064_v16 = vshll.u32 %v6671_v9, 16 }
 0x32e   : > { %v7043_v47 = vsel %vm9957_vm11, %v7038_v0, %v7042_v30  ;;  %v7050_v43 = vrot.slane %v7048_v40, 5  ;;  %v7056_v8 = vrot.slane %v7054_v61, 5  ;;  %v7069_v57 = vshrl.u32 %v12228_v34, 16 }
 0x32f   : > { %v7028_v5 = vrot.slane %v7027_v13, 4  ;;  %v7060_v4 = vrot.slane %v7058_v53, 4  ;;  %v7072_v52 = vshll.u32 %v12228_v34, 16  ;;  %v7078_v14 = vshll.u32 %v12230_v19, 16 }
 0x330   : > { %9183 = vmatmul.mubr.bf16.vlgmr.msra.gmra.mxu1 %v12398_v37  ;;  %v7357_v37 = vsel %vm10165_vm14, %v7355_v58, %v7356_v2  ;;  %v7051_v38 = vor.u32 %v7050_v43, %v7047_v6  ;;  %v7066_v11 = vrot.slane %v7064_v16, 5  ;;  %v7071_v1 = vrot.slane %v7069_v57, 4 }
 0x331   : > { %9186 = vmatprep.mubr.bf16.mxu1 %v8205_v7  ;;  %v8233_v35 = vcombine.low %v7354_v60, %v7357_v37  ;;  %v7033_v42 = vsel %vm9957_vm11, %v7028_v5, %v12474_v25  ;;  %v7364_v7 = vsel %vm10165_vm14, %v7362_v21, %v7363_v62  ;;  %v7082_v17 = vshrl.u32 %v12230_v19, 16 }
 0x332   : > { %9223 = vmatmul.mubr.bf16.gmra.mxu0 %v8232_v3  ;;  %v8234_v39 = vcombine.low %v7361_v51, %v7364_v7  ;;  %v7061_v20 = vor.u32 %v7060_v4, %v7056_v8  ;;  %v7074_v59 = vrot.slane %v7072_v52, 5  ;;  %v7080_v36 = vrot.slane %v7078_v14, 5 }
 0x333   : > { %9226 = vmatprep.mubr.bf16.mxu0 %v8233_v35  ;;  %v7088_v3 = vshll.u32 %v6674_v55, 16  ;;  %v7052_v49 = vrot.slane %v7051_v38, 4  ;;  %v7084_v24 = vrot.slane %v7082_v17, 4  ;;  %v8208_v46 = vcombine.low %v7033_v42, %v7043_v47 }
 0x334   : > { %v7062_v33 = vrot.slane %v7061_v20, 4  ;;  %v7075_v63 = vor.u32 %v7074_v59, %v7071_v1 }
 0x335   : > { %v7057_v34 = vsel %vm9957_vm11, %v7052_v49, %v7056_v8  ;;  %v7085_v45 = vor.u32 %v7084_v24, %v7080_v36  ;;  %v7090_v19 = vrot.slane %v7088_v3, 5 }
 0x336   : > { %v7067_v26 = vsel %vm9957_vm11, %v7062_v33, %v7066_v11  ;;  %v7076_v9 = vrot.slane %v7075_v63, 4 }
 0x337   : > { %v8209_v27 = vcombine.low %v7057_v34, %v7067_v26  ;;  %v7086_v54 = vrot.slane %v7085_v45, 4 }
 0x338   : > { %9187 = vmatmul.mubr.bf16.gmra.mxu1 %v8206_v29  ;;  %v7081_v25 = vsel %vm9957_vm11, %v7076_v9, %v7080_v36 }
 0x339   : > { %9190 = vmatprep.mubr.bf16.mxu1 %v8207_v23  ;;  %v7091_v48 = vsel %vm9957_vm11, %v7086_v54, %v7090_v19 }
 0x33a   : > { %9227 = vmatmul.mubr.bf16.gmra.mxu0 %v8234_v39  ;;  %v8210_v44 = vcombine.low %v7081_v25, %v7091_v48 }
 0x340   : > { %9191 = vmatmul.mubr.bf16.gmra.mxu1 %v8208_v46 }
 0x341   : > { %9194 = vmatprep.mubr.bf16.mxu1 %v8209_v27 }
 0x348   : > { %9195 = vmatmul.mubr.bf16.gmra.mxu1 %v8210_v44 }
 0x370   : > { %v8960_v31 = vpop.f32.mrf.mxu1 }
 0x372   : > { %v5197_v50 = vpop.f32.mrf.mxu1 }
 0x374   : > { %v8961_v10 = vpop.f32.mrf.mxu1 }
 0x376   : > { %v5200_v55 = vpop.f32.mrf.mxu1 }
 0x378   : > { %v8964_v22 = vpop.f32.mrf.mxu1 }
 0x37a   : > { %v5213_v13 = vpop.f32.mrf.mxu1 }
 0x37c   : > { %v8965_v2 = vpop.f32.mrf.mxu1 }
 0x37e   : > { %v5216_v56 = vpop.f32.mrf.mxu1 }
 0x380   : > { %v8968_v41 = vpop.f32.mrf.mxu1 }
 0x382   : > { %v5229_v15 = vpop.f32.mrf.mxu1  ;;  %v9024_v58 = vpop.f32.mrf.mxu0 }
 0x384   : > { %v8969_v60 = vpop.f32.mrf.mxu1  ;;  %v5647_v5 = vpop.f32.mrf.mxu0 }
 0x386   : > { %v5232_v12 = vpop.f32.mrf.mxu1  ;;  %v9025_v62 = vpop.f32.mrf.mxu0 }
 0x388   : > { %v8972_v28 = vpop.f32.mrf.mxu1  ;;  %v5650_v0 = vpop.f32.mrf.mxu0 }
 0x38a   : > { %v5245_v18 = vpop.f32.mrf.mxu1  ;;  %v9028_v37 = vpop.f32.mrf.mxu0 }
 0x38c   : > { %v8973_v30 = vpop.f32.mrf.mxu1  ;;  %v5663_v29 = vpop.f32.mrf.mxu0 }
 0x38e   : > { %v5248_v32 = vpop.f32.mrf.mxu1  ;;  %v9029_v35 = vpop.f32.mrf.mxu0 }
 0x390   : > { %v8992_v23 = vpop.f32.mrf.mxu1  ;;  %v5666_v6 = vpop.f32.mrf.mxu0 }
 0x391   : > { %v5399_v21 = vadd.f32 %v8992_v23, %v8960_v31 }
 0x392   : > { %v5390_v51 = vpop.f32.mrf.mxu1  ;;  %v9032_v7 = vpop.f32.mrf.mxu0 }
 0x393   : > { %v5391_v40 = vadd.f32 %v5390_v51, %v5197_v50  ;;  %v12516_v61 = vadd.f32 %v9024_v58, %v5399_v21 }
 0x394   : > { %v8993_v42 = vpop.f32.mrf.mxu1  ;;  %v5679_v43 = vpop.f32.mrf.mxu0 }
 0x395   : > { %v5402_v53 = vadd.f32 %v8993_v42, %v8961_v10  ;;  %v12518_v16 = vadd.f32 %v5647_v5, %v5391_v40 }
 0x396   : > { %v5393_v47 = vpop.f32.mrf.mxu1  ;;  %v9033_v4 = vpop.f32.mrf.mxu0 }
 0x397   : > { %v5394_v8 = vadd.f32 %v5393_v47, %v5200_v55  ;;  %v12520_v57 = vadd.f32 %v9025_v62, %v5402_v53 }
 0x398   : > { %v8996_v39 = vpop.f32.mrf.mxu1  ;;  %v5682_v11 = vpop.f32.mrf.mxu0 }
 0x399   : > { %v5415_v52 = vadd.f32 %v8996_v39, %v8964_v22  ;;  %v12522_v14 = vadd.f32 %v5650_v0, %v5394_v8 }
 0x39a   : > { %v5406_v38 = vpop.f32.mrf.mxu1  ;;  %v9036_v59 = vpop.f32.mrf.mxu0 }
 0x39b   : > { %v5407_v1 = vadd.f32 %v5406_v38, %v5213_v13  ;;  %v12524_v17 = vadd.f32 %v9028_v37, %v5415_v52 }
 0x39c   : > { %v8997_v20 = vpop.f32.mrf.mxu1  ;;  %v5695_v24 = vpop.f32.mrf.mxu0 }
 0x39d   : > { %v5418_v36 = vadd.f32 %v8997_v20, %v8965_v2  ;;  %v12526_v3 = vadd.f32 %v5663_v29, %v5407_v1 }
 0x39e   : > { %v5409_v49 = vpop.f32.mrf.mxu1  ;;  %v9037_v34 = vpop.f32.mrf.mxu0 }
 0x39f   : > { %v5410_v33 = vadd.f32 %v5409_v49, %v5216_v56  ;;  %v12528_v63 = vadd.f32 %v9029_v35, %v5418_v36 }
 0x3a0   : > { %v9000_v46 = vpop.f32.mrf.mxu1  ;;  %v5698_v19 = vpop.f32.mrf.mxu0 }
 0x3a1   : > { %v5431_v45 = vadd.f32 %v9000_v46, %v8968_v41  ;;  %v12530_v26 = vadd.f32 %v5666_v6, %v5410_v33 }
 0x3a2   : > { %v5422_v9 = vpop.f32.mrf.mxu1  ;;  %v12534_v44 = vpop.f32.mrf.mxu0 }
 0x3a3   : > { %v5423_v27 = vadd.f32 %v5422_v9, %v5229_v15  ;;  %v12532_v54 = vadd.f32 %v9032_v7, %v5431_v45 }
 0x3a4   : > { %v9001_v25 = vpop.f32.mrf.mxu1  ;;  %v12538_v55 = vpop.f32.mrf.mxu0 }
 0x3a5   : > { %v5434_v48 = vadd.f32 %v9001_v25, %v8969_v60  ;;  %v12536_v31 = vadd.f32 %v5679_v43, %v5423_v27 }
 0x3a6   : > { %v5425_v50 = vpop.f32.mrf.mxu1  ;;  %v12542_v56 = vpop.f32.mrf.mxu0 }
 0x3a7   : > { %v5426_v10 = vadd.f32 %v5425_v50, %v5232_v12  ;;  %v12540_v22 = vadd.f32 %v9033_v4, %v5434_v48 }
 0x3a8   : > { %v9004_v13 = vpop.f32.mrf.mxu1  ;;  %v12546_v5 = vpop.f32.mrf.mxu0 }
 0x3a9   : > { %v5447_v2 = vadd.f32 %v9004_v13, %v8972_v28  ;;  %v12544_v41 = vadd.f32 %v5682_v11, %v5426_v10 }
 0x3aa   : > { %v5438_v15 = vpop.f32.mrf.mxu1  ;;  %v12550_v37 = vpop.f32.mrf.mxu0 }
 0x3ab   : > { %v5439_v58 = vadd.f32 %v5438_v15, %v5245_v18  ;;  %v12548_v60 = vadd.f32 %v9036_v59, %v5447_v2 }
 0x3ac   : > { %v9005_v62 = vpop.f32.mrf.mxu1  ;;  %v12554_v35 = vpop.f32.mrf.mxu0 }
 0x3ad   : > { %v5450_v0 = vadd.f32 %v9005_v62, %v8973_v30  ;;  %v12552_v12 = vadd.f32 %v5695_v24, %v5439_v58 }
 0x3ae   : > { %v5441_v29 = vpop.f32.mrf.mxu1  ;;  %v12558_v51 = vpop.f32.mrf.mxu0 }
 0x3af   : > { %12963 = vst [vmem:[#allocation9_spill] sm:$0xff] %v12552_v12  ;;  %v5442_v23 = vadd.f32 %v5441_v29, %v5248_v32  ;;  %v12556_v28 = vadd.f32 %v9037_v34, %v5450_v0 }
 0x3b0   : > { %v9056_v21 = vpop.f32.mrf.mxu1  ;;  %v12562_v40 = vpop.f32.mrf.mxu0 }
 0x3b1   : > { %12964 = vst [vmem:[#allocation10_spill] sm:$0xff] %v12556_v28  ;;  %v12560_v18 = vadd.f32 %v5698_v19, %v5442_v23 }
 0x3b2   : > { %v5897_v6 = vpop.f32.mrf.mxu1  ;;  %v12564_v30 = vpop.f32.mrf.mxu0 }
 0x3b3   : > { %12965 = vst [vmem:[#allocation11_spill] sm:$0xff] %v12560_v18 }
 0x3b4   : > { %v9057_v42 = vpop.f32.mrf.mxu1  ;;  %v12566_v53 = vpop.f32.mrf.mxu0 }
 0x3b6   : > { %v5900_v7 = vpop.f32.mrf.mxu1  ;;  %v12570_v32 = vpop.f32.mrf.mxu0 }
 0x3b8   : > { %v12568_v47 = vpop.f32.mrf.mxu1  ;;  %v12574_v8 = vpop.f32.mrf.mxu0 }
 0x3ba   : > { %v12572_v43 = vpop.f32.mrf.mxu1  ;;  %v12578_v4 = vpop.f32.mrf.mxu0 }
 0x3bb   : > { %12966 = vst [vmem:[#allocation12_spill] sm:$0xff] %v12578_v4 }
 0x3bc   : > { %v12576_v39 = vpop.f32.mrf.mxu1  ;;  %v12582_v38 = vpop.f32.mrf.mxu0 }
 0x3bd   : > { %12967 = vst [vmem:[#allocation13_spill] sm:$0xff] %v12582_v38  ;;  %v5967_v12 = vadd.f32 %v12576_v39, %v12528_v63 }
 0x3be   : > { %v12580_v52 = vpop.f32.mrf.mxu1  ;;  %v12586_v1 = vpop.f32.mrf.mxu0 }
 0x3bf   : > { %12968 = vst [vmem:[#allocation14_spill] sm:$0xff] %v12586_v1 }
 0x3c0   : > { %v12584_v11 = vpop.f32.mrf.mxu1  ;;  %v12590_v59 = vpop.f32.mrf.mxu0 }
 0x3c1   : > { %12969 = vst [vmem:[#allocation5_spill] sm:$0xff] %v12590_v59 }
 0x3c2   : > { %v12588_v20 = vpop.f32.mrf.mxu1  ;;  %v12594_v49 = vpop.f32.mrf.mxu0 }
 0x3c4   : > { %v12592_v36 = vpop.f32.mrf.mxu1  ;;  %v12598_v33 = vpop.f32.mrf.mxu0 }
 0x3c6   : > { %v12596_v24 = vpop.f32.mrf.mxu1  ;;  %v12602_v34 = vpop.f32.mrf.mxu0 }
 0x3c8   : > { %v12600_v46 = vpop.f32.mrf.mxu1  ;;  %v12606_v9 = vpop.f32.mrf.mxu0 }
 0x3ca   : > { %v12604_v45 = vpop.f32.mrf.mxu1  ;;  %v12610_v27 = vpop.f32.mrf.mxu0 }
 0x3cb   : > { %12970 = vst [vmem:[#allocation6_spill] sm:$0xff] %v12604_v45  ;;  %v12661_v45 = vld [vmem:[%s9725_s27 + $0x8] sm:$0xff]  }
 0x3cc   : > { %v12608_v19 = vpop.f32.mrf.mxu1  ;;  %v12614_v48 = vpop.f32.mrf.mxu0 }
 0x3cd   : > { %12971 = vst [vmem:[#allocation4_spill] sm:$0xff] %v12608_v19  ;;  %v5962_v19 = vadd.f32 %v9056_v21, %v12516_v61  ;;  %v12671_v21 = vld [vmem:[%s9725_s27 + $0x18] sm:$0xff]  }
 0x3ce   : > { %v12612_v25 = vpop.f32.mrf.mxu1  ;;  %v12616_v10 = vpop.f32.mrf.mxu0 }
 0x3cf   : > { %12972 = vst [vmem:[#allocation7_spill] sm:$0xff] %v12612_v25  ;;  %12973 = vst [vmem:[#allocation8_spill] sm:$0xff] %v12616_v10 }
 0x3d0   : > { %v9120_v50 = vpop.f32.mrf.mxu1  ;;  %v12618_v2 = vpop.f32.mrf.mxu0 }
 0x3d1   : > { %12974 = vst [vmem:[#allocation15_spill] sm:$0xff] %v12618_v2 }
 0x3d2   : > { %v6571_v13 = vpop.f32.mrf.mxu1  ;;  %v12620_v58 = vpop.f32.mrf.mxu0 }
 0x3d3   : > { %12975 = vst [vmem:[#allocation16_spill] sm:$0xff] %v12620_v58 }
 0x3d4   : > { %v9121_v15 = vpop.f32.mrf.mxu1  ;;  %v12622_v0 = vpop.f32.mrf.mxu0 }
 0x3d5   : > { %12976 = vst [vmem:[#allocation17_spill] sm:$0xff] %v12622_v0 }
 0x3d6   : > { %v6574_v62 = vpop.f32.mrf.mxu1  ;;  %v12626_v23 = vpop.f32.mrf.mxu0 }
 0x3d7   : > { %12977 = vst [vmem:[#allocation18_spill] sm:$0xff] %v12626_v23 }
 0x3d8   : > { %v12624_v29 = vpop.f32.mrf.mxu1  ;;  %v12630_v1 = vpop.f32.mrf.mxu0 }
 0x3d9   : > { %12978 = vst [vmem:[#allocation19_spill] sm:$0xff] %v12630_v1 }
 0x3da   : > { %v12628_v59 = vpop.f32.mrf.mxu1  ;;  %v12634_v25 = vpop.f32.mrf.mxu0 }
 0x3db   : > { %12979 = vst [vmem:[#allocation20_spill] sm:$0xff] %v12634_v25 }
 0x3dc   : > { %v12632_v38 = vpop.f32.mrf.mxu1  ;;  %v12638_v2 = vpop.f32.mrf.mxu0 }
 0x3dd   : > { %12980 = vst [vmem:[#allocation21_spill] sm:$0xff] %v12638_v2  ;;  %v5960_v2 = vadd.f32 %v5897_v6, %v12518_v16  ;;  %v5961_v16 = vadd.f32 %v5900_v7, %v12522_v14  ;;  %v5966_v14 = vadd.f32 %v12568_v47, %v12524_v17  ;;  %v5965_v47 = vadd.f32 %v12580_v52, %v12530_v26 }
 0x3de   : > { %v12636_v18 = vpop.f32.mrf.mxu1  ;;  %v12642_v0 = vpop.f32.mrf.mxu0 }
 0x3df   : > { %12982 = vst [vmem:[#allocation23_spill] sm:$0xff] %v12642_v0  ;;  %v5963_v0 = vadd.f32 %v9057_v42, %v12520_v57  ;;  %v6367_v26 = vadd.f32 %v12550_v37, %v5966_v14 }
 0x3e0   : > { %v12640_v58 = vpop.f32.mrf.mxu1  ;;  %v12646_v4 = vpop.f32.mrf.mxu0 }
 0x3e1   : > { %12981 = vst [vmem:[#allocation22_spill] sm:$0xff] %v12640_v58  ;;  %12984 = vst [vmem:[#allocation25_spill] sm:$0xff] %v12646_v4 }
 0x3e2   : > { %v12644_v23 = vpop.f32.mrf.mxu1  ;;  %v9216_v25 = vpop.f32.mrf.mxu0 }
 0x3e3   : > { %12983 = vst [vmem:[#allocation24_spill] sm:$0xff] %v12644_v23  ;;  %v6363_v23 = vadd.f32 %v12534_v44, %v5962_v19  ;;  %v12678_v44 = vld [vmem:[%s9725_s27 + $0x10] sm:$0xff]   ;;  %v8279_v19 = vunpack.c.l.bf16 %v12661_v45 }
 0x3e4   : > { %v12648_v1 = vpop.f32.mrf.mxu1  ;;  %v12654_v10 = vpop.f32.mrf.mxu0 }
 0x3e5   : > { %12985 = vst [vmem:[#allocation26_spill] sm:$0xff] %v12648_v1  ;;  %v12666_v1 = vld [vmem:[%s9725_s27] sm:$0xff]   ;;  %v6636_v6 = vadd.f32 %v9120_v50, %v6363_v23  ;;  %v12693_v23 = vld [vmem:[%s9725_s27 + $0x28] sm:$0xff]  }
 0x3e6   : > { %v12651_v28 = vpop.f32.mrf.mxu1  ;;  %v12663_v4 = vpop.f32.mrf.mxu0  ;;  %v8295_v39 = vunpack.c.l.bf16 %v12693_v23 }
 0x3e7   : > { %12986 = vst [vmem:[#allocation27_spill] sm:$0xff] %v12651_v28  ;;  %v5964_v28 = vadd.f32 %v12572_v43, %v12526_v3  ;;  %v5970_v3 = vadd.f32 %v12584_v11, %v12532_v54  ;;  %v8284_v43 = vunpack.c.h.bf16 %v12678_v44  ;;  %v5971_v54 = vadd.f32 %v12592_v36, %v12540_v22 }
 0x3e8   : > { %v12656_v58 = vpop.f32.mrf.mxu1  ;;  %v12675_v57 = vpop.f32.mrf.mxu0  ;;  %v5969_v22 = vadd.f32 %v12596_v24, %v12544_v41 }
 0x3e9   : > { %12987 = vst [vmem:[#allocation28_spill] sm:$0xff] %v12656_v58  ;;  %v6361_v58 = vadd.f32 %v12538_v55, %v5960_v2  ;;  %v6364_v55 = vadd.f32 %v12542_v56, %v5963_v0  ;;  %v6886_v0 = vadd.f32 %v12594_v49, %v6636_v6  ;;  %v5968_v49 = vadd.f32 %v12588_v20, %v12536_v31 }
 0x3ea   : > { %v12668_v61 = vpop.f32.mrf.mxu1  ;;  %v12689_v50 = vpop.f32.mrf.mxu0  ;;  %v6365_v11 = vadd.f32 %v12554_v35, %v5964_v28  ;;  %v6640_v35 = vadd.f32 %v12624_v29, %v6367_v26  ;;  %v6371_v28 = vadd.f32 %v12564_v30, %v5970_v3  ;;  %v6372_v29 = vadd.f32 %v12570_v32, %v5971_v54 }
 0x3eb   : > { %12988 = vst [vmem:[#allocation29_spill] sm:$0xff] %v12668_v61  ;;  %v6634_v7 = vadd.f32 %v6571_v13, %v6361_v58  ;;  %v6637_v13 = vadd.f32 %v9121_v15, %v6364_v55  ;;  %v6362_v58 = vadd.f32 %v12546_v5, %v5961_v16  ;;  %v6368_v16 = vadd.f32 %v12558_v51, %v5967_v12  ;;  %v12744_v51 = vld [vmem:[%s12892_s8] ss:$0 sm:$0xff] }
 0x3ec   : > { %v12680_v42 = vpop.f32.mrf.mxu1  ;;  %v12710_v2 = vpop.f32.mrf.mxu0  ;;  %v6638_v12 = vadd.f32 %v12628_v59, %v6365_v11  ;;  %v5974_v59 = vadd.f32 %v12600_v46, %v12548_v60  ;;  %v6369_v24 = vadd.f32 %v12566_v53, %v5968_v49  ;;  %v6890_v60 = vadd.f32 %v12610_v27, %v6640_v35 }
 0x3ed   : > { %12989 = vst [vmem:[#allocation30_spill] sm:$0xff] %v12680_v42  ;;  %v12696_v42 = vld [vmem:[%s9725_s27 + $0x20] sm:$0xff]   ;;  %v6635_v17 = vadd.f32 %v6574_v62, %v6362_v58  ;;  %v6884_v5 = vadd.f32 %v12598_v33, %v6634_v7  ;;  %v6366_v33 = vadd.f32 %v12562_v40, %v5965_v47  ;;  %v6887_v7 = vadd.f32 %v12602_v34, %v6637_v13 }
 0x3ee   : > { %v12702_v61 = vpop.f32.mrf.mxu1  ;;  %v8291_v56 = vunpack.c.l.bf16 %v12696_v42  ;;  %v12719_v15 = vpop.f32.mrf.mxu0  ;;  %v12730_v62 = vld [vmem:[%s12891_s7] ss:$0 sm:$0xff]  ;;  %v6641_v30 = vadd.f32 %v12632_v38, %v6368_v16  ;;  %v6888_v53 = vadd.f32 %v12614_v48, %v6638_v12  ;;  %v12993_v48 = vld [vmem:[#allocation8_spill] sm:$0xff]  ;;  %v12994_v54 = vunpack.c.l.bf16 %v12666_v1 }
 0x3ef   : > { %v12998_v12 = vld [vmem:[#allocation15_spill] sm:$0xff] }
 0x3f0   : > { %v9184_v63 = vpop.f32.mrf.mxu1  ;;  %v12734_v31 = vpop.f32.mrf.mxu0  ;;  %v6891_v49 = vadd.f32 %v12993_v48, %v6641_v30  ;;  %v13008_v48 = vld [vmem:[#allocation28_spill] sm:$0xff] }
 0x3f1   : > { %v7287_v52 = vadd.f32 %v9184_v63, %v6886_v0  ;;  %v12990_v63 = vld [vmem:[#allocation9_spill] sm:$0xff] }
 0x3f2   : > { %v7222_v37 = vpop.f32.mrf.mxu1  ;;  %v12749_v41 = vpop.f32.mrf.mxu0 }
 0x3f3   : > { %v7560_v6 = vadd.f32 %v9216_v25, %v7287_v52  ;;  %v7285_v14 = vadd.f32 %v7222_v37, %v6884_v5  ;;  %v6885_v25 = vadd.f32 %v12606_v9, %v6635_v17  ;;  %v6639_v9 = vadd.f32 %v12636_v18, %v6366_v33  ;;  %v12991_v18 = vld [vmem:[#allocation6_spill] sm:$0xff]  ;;  %v12996_v33 = vld [vmem:[#allocation4_spill] sm:$0xff] }
 0x3f4   : > { %v9185_v40 = vpop.f32.mrf.mxu1  ;;  %v6370_v17 = vadd.f32 %v12574_v8, %v5969_v22  ;;  %v12763_v46 = vpop.f32.mrf.mxu0  ;;  %v5972_v26 = vadd.f32 %v12991_v18, %v12990_v63  ;;  %v12992_v8 = vld [vmem:[#allocation22_spill] sm:$0xff] }
 0x3f5   : > { %v7583_v20 = vmul.f32 %v12730_v62, %v7560_v6  ;;  %v7558_v36 = vadd.f32 %v12654_v10, %v7285_v14  ;;  %v7288_v34 = vadd.f32 %v9185_v40, %v6887_v7  ;;  %v6644_v27 = vadd.f32 %v12992_v8, %v6371_v28  ;;  %v12997_v14 = vld [vmem:[#allocation12_spill] sm:$0xff] }
 0x3f6   : > { %v7225_v55 = vpop.f32.mrf.mxu1  ;;  %v6375_v7 = vadd.f32 %v12997_v14, %v5974_v59  ;;  %v6889_v28 = vadd.f32 %v12998_v12, %v6639_v9  ;;  %v9225_v40 = vpop.f32.mrf.mxu0 }
 0x3f7   : > { %v7606_v47 = vadd.f32 %v12744_v51, %v7583_v20  ;;  %v7581_v13 = vmul.f32 %v12730_v62, %v7558_v36  ;;  %v7561_v10 = vadd.f32 %v12663_v4, %v7288_v34  ;;  %v7286_v58 = vadd.f32 %v7225_v55, %v6885_v25  ;;  %v13000_v55 = vld [vmem:[#allocation24_spill] sm:$0xff] }
 0x3f8   : > { %v9188_v38 = vpop.f32.mrf.mxu1  ;;  %v12999_v20 = vunpack.c.h.bf16 %v12661_v45 }
 0x3f9   : > { %v7654_v32 = vadd.f32 %v8279_v19, %v7606_v47  ;;  %v7604_v0 = vadd.f32 %v12744_v51, %v7581_v13  ;;  %v7584_v4 = vmul.f32 %v12730_v62, %v7561_v10  ;;  %v7559_v3 = vadd.f32 %v12675_v57, %v7286_v58  ;;  %v12995_v57 = vld [vmem:[#allocation10_spill] sm:$0xff]  ;;  %v13002_v58 = vld [vmem:[#allocation16_spill] sm:$0xff] }
 0x3fa   : > { %v7291_v52 = vadd.f32 %v9188_v38, %v6890_v60  ;;  %v7238_v5 = vpop.f32.mrf.mxu1  ;;  %v5975_v6 = vadd.f32 %v12996_v33, %v12995_v57  ;;  %v6642_v47 = vadd.f32 %v13000_v55, %v6369_v24  ;;  %v13001_v13 = vld [vmem:[#allocation26_spill] sm:$0xff]  ;;  %v6894_v9 = vadd.f32 %v13002_v58, %v6644_v27  ;;  %v7530_v27 = vpop.f32.mrf.mxu0 }
 0x3fb   : > { %7670 = vst [vmem:[%s9748_s20 + $0x10] sm:$0xff] %v7654_v32  ;;  %v7652_v19 = vadd.f32 %v12994_v54, %v7604_v0  ;;  %v7607_v11 = vadd.f32 %v12744_v51, %v7584_v4  ;;  %v7582_v16 = vmul.f32 %v12730_v62, %v7559_v3  ;;  %v7289_v37 = vadd.f32 %v7238_v5, %v6888_v53  ;;  %v13004_v32 = vld [vmem:[#allocation11_spill] sm:$0xff] }
 0x3fc   : > { %v7564_v22 = vadd.f32 %v12689_v50, %v7291_v52  ;;  %v9189_v35 = vpop.f32.mrf.mxu1  ;;  %v6645_v59 = vadd.f32 %v13001_v13, %v6372_v29  ;;  %v13003_v60 = vunpack.c.h.bf16 %v12666_v1  ;;  %v13005_v0 = vld [vmem:[#allocation7_spill] sm:$0xff]  ;;  %v13007_v29 = vld [vmem:[#allocation13_spill] sm:$0xff]  ;;  %v13009_v54 = vunpack.c.l.bf16 %v12671_v21 }
 0x3fd   : > { %7668 = vst [vmem:[%s9748_s20] sm:$0xff] %v7652_v19  ;;  %v7655_v36 = vadd.f32 %v12999_v20, %v7607_v11  ;;  %v7605_v34 = vadd.f32 %v12744_v51, %v7582_v16  ;;  %v7562_v25 = vadd.f32 %v12710_v2, %v7289_v37  ;;  %v7292_v30 = vadd.f32 %v9189_v35, %v6891_v49  ;;  %v13006_v4 = vld [vmem:[#allocation27_spill] sm:$0xff]  ;;  %v13011_v16 = vld [vmem:[#allocation18_spill] sm:$0xff]  ;;  %v13013_v35 = vld [vmem:[#allocation29_spill] sm:$0xff] }
 0x3fe   : > { %v7587_v50 = vmul.f32 %v12730_v62, %v7564_v22  ;;  %v7241_v10 = vpop.f32.mrf.mxu1  ;;  %v5973_v24 = vadd.f32 %v13005_v0, %v13004_v32  ;;  %v6643_v3 = vadd.f32 %v13006_v4, %v6370_v17  ;;  %v6373_v63 = vadd.f32 %v13007_v29, %v5972_v26  ;;  %v13010_v26 = vld [vmem:[#allocation17_spill] sm:$0xff]  ;;  %v13019_v0 = vld [vmem:[#allocation30_spill] sm:$0xff] }
 0x3ff   : > { %7671 = vst [vmem:[%s9748_s20 + $0x18] sm:$0xff] %v7655_v36  ;;  %v7653_v45 = vadd.f32 %v13003_v60, %v7605_v34  ;;  %v7585_v38 = vmul.f32 %v12730_v62, %v7562_v25  ;;  %v7565_v53 = vadd.f32 %v12719_v15, %v7292_v30  ;;  %v7290_v2 = vadd.f32 %v7241_v10, %v6889_v28  ;;  %v9228_v36 = vpop.f32.mrf.mxu0  ;;  %v13014_v34 = vld [vmem:[#allocation19_spill] sm:$0xff]  ;;  %v13017_v10 = vld [vmem:[#allocation5_spill] sm:$0xff] }
 0x400   : > { %v7610_v18 = vadd.f32 %v12744_v51, %v7587_v50  ;;  %v9192_v8 = vpop.f32.mrf.mxu1  ;;  %v6648_v49 = vadd.f32 %v13008_v48, %v6375_v7  ;;  %v6892_v19 = vadd.f32 %v13010_v26, %v6642_v47  ;;  %v6895_v37 = vadd.f32 %v13011_v16, %v6645_v59  ;;  %v13016_v59 = vld [vmem:[#allocation14_spill] sm:$0xff]  ;;  %v13020_v29 = vld [vmem:[#allocation21_spill] sm:$0xff] }
 0x401   : > { %7669 = vst [vmem:[%s9748_s20 + $0x8] sm:$0xff] %v7653_v45  ;;  %v7608_v1 = vadd.f32 %v12744_v51, %v7585_v38  ;;  %v7588_v52 = vmul.f32 %v12730_v62, %v7565_v53  ;;  %v7563_v15 = vadd.f32 %v12734_v31, %v7290_v2  ;;  %v7295_v5 = vadd.f32 %v9192_v8, %v6894_v9  ;;  %v13018_v45 = vld [vmem:[#allocation20_spill] sm:$0xff]  ;;  %v8311_v8 = vld [vmem:[%s9725_s27 + $0x38] sm:$0xff]  }
 0x402   : > { %v7658_v17 = vadd.f32 %v13009_v54, %v7610_v18  ;;  %v7254_v11 = vpop.f32.mrf.mxu1  ;;  %v13012_v57 = vunpack.c.l.bf16 %v12678_v44  ;;  %v6646_v7 = vadd.f32 %v13013_v35, %v6373_v63  ;;  %v8296_v20 = vunpack.c.h.bf16 %v12693_v23  ;;  %v8310_v23 = vld [vmem:[%s9725_s27 + $0x30] sm:$0xff]  }
 0x403   : > { %v7611_v14 = vadd.f32 %v12744_v51, %v7588_v52  ;;  %v7586_v22 = vmul.f32 %v12730_v62, %v7563_v15  ;;  %v7568_v31 = vadd.f32 %v12749_v41, %v7295_v5  ;;  %v7293_v12 = vadd.f32 %v7254_v11, %v6892_v19  ;;  %v13022_v11 = vld [vmem:[#allocation25_spill] sm:$0xff] }
 0x404   : > { %v7656_v33 = vadd.f32 %v13012_v57, %v7608_v1  ;;  %7674 = vst [vmem:[%s9748_s20 + $0x30] sm:$0xff] %v7658_v17  ;;  %v9193_v28 = vpop.f32.mrf.mxu1  ;;  %v6893_v25 = vadd.f32 %v13014_v34, %v6643_v3  ;;  %v13015_v30 = vunpack.c.h.bf16 %v12671_v21  ;;  %v6376_v50 = vadd.f32 %v13016_v59, %v5975_v6  ;;  %v13021_v17 = vld [vmem:[#allocation23_spill] sm:$0xff] }
 0x405   : > { %v7609_v47 = vadd.f32 %v12744_v51, %v7586_v22  ;;  %v7591_v13 = vmul.f32 %v12730_v62, %v7568_v31  ;;  %v7296_v41 = vadd.f32 %v9193_v28, %v6895_v37  ;;  %v6374_v58 = vadd.f32 %v13017_v10, %v5973_v24 }
 0x406   : > { %7672 = vst [vmem:[%s9748_s20 + $0x20] sm:$0xff] %v7656_v33  ;;  %v7659_v55 = vadd.f32 %v13015_v30, %v7611_v14  ;;  %v7566_v9 = vadd.f32 %v12763_v46, %v7293_v12  ;;  %v7257_v60 = vpop.f32.mrf.mxu1  ;;  %v6898_v38 = vadd.f32 %v13018_v45, %v6648_v49  ;;  %v6649_v6 = vadd.f32 %v13019_v0, %v6376_v50  ;;  %v7543_v46 = vpop.f32.mrf.mxu0 }
 0x407   : > { %v7657_v21 = vadd.f32 %v8284_v43, %v7609_v47  ;;  %v7614_v53 = vadd.f32 %v12744_v51, %v7591_v13  ;;  %v7569_v2 = vadd.f32 %v9225_v40, %v7296_v41  ;;  %v7294_v32 = vadd.f32 %v7257_v60, %v6893_v25 }
 0x408   : > { %7675 = vst [vmem:[%s9748_s20 + $0x38] sm:$0xff] %v7659_v55  ;;  %v6647_v4 = vadd.f32 %v12702_v61, %v6374_v58  ;;  %v7589_v24 = vmul.f32 %v12730_v62, %v7566_v9  ;;  %v9196_v3 = vpop.f32.mrf.mxu1  ;;  %v6896_v63 = vadd.f32 %v13020_v29, %v6646_v7  ;;  %v8292_v61 = vunpack.c.h.bf16 %v12696_v42  ;;  %v9229_v54 = vpop.f32.mrf.mxu0 }
 0x409   : > { %7673 = vst [vmem:[%s9748_s20 + $0x28] sm:$0xff] %v7657_v21  ;;  %v7662_v44 = vadd.f32 %v8295_v39, %v7614_v53  ;;  %v7592_v43 = vmul.f32 %v12730_v62, %v7569_v2  ;;  %v7567_v40 = vadd.f32 %v7530_v27, %v7294_v32  ;;  %v7299_v18 = vadd.f32 %v9196_v3, %v6898_v38 }
 0x40a   : > { %v7612_v1 = vadd.f32 %v12744_v51, %v7589_v24  ;;  %v7270_v52 = vpop.f32.mrf.mxu1  ;;  %v8303_v27 = vunpack.c.l.bf16 %v8311_v8  ;;  %v6899_v26 = vadd.f32 %v13021_v17, %v6649_v6  ;;  %v6897_v16 = vadd.f32 %v13022_v11, %v6647_v4  ;;  %v7546_v28 = vpop.f32.mrf.mxu0 }
 0x40b   : > { %7678 = vst [vmem:[%s9748_s20 + $0x50] sm:$0xff] %v7662_v44  ;;  %v7615_v15 = vadd.f32 %v12744_v51, %v7592_v43  ;;  %v7590_v5 = vmul.f32 %v12730_v62, %v7567_v40  ;;  %v7572_v48 = vadd.f32 %v9228_v36, %v7299_v18  ;;  %v7297_v49 = vadd.f32 %v7270_v52, %v6896_v63 }
 0x40c   : > { %v7660_v39 = vadd.f32 %v8291_v56, %v7612_v1  ;;  %v9197_v19 = vpop.f32.mrf.mxu1  ;;  %v8299_v22 = vunpack.c.l.bf16 %v8310_v23  ;;  %v8304_v55 = vunpack.c.h.bf16 %v8311_v8  ;;  %v8300_v41 = vunpack.c.h.bf16 %v8310_v23 }
 0x40d   : > { %v7663_v37 = vadd.f32 %v8296_v20, %v7615_v15  ;;  %v7613_v57 = vadd.f32 %v12744_v51, %v7590_v5  ;;  %v7595_v33 = vmul.f32 %v12730_v62, %v7572_v48  ;;  %v7570_v14 = vadd.f32 %v7543_v46, %v7297_v49 }
 0x40e   : > { %7676 = vst [vmem:[%s9748_s20 + $0x40] sm:$0xff] %v7660_v39  ;;  %v7300_v31 = vadd.f32 %v9197_v19, %v6899_v26  ;;  %v7273_v42 = vpop.f32.mrf.mxu1 }
 0x40f   : > { %7679 = vst [vmem:[%s9748_s20 + $0x58] sm:$0xff] %v7663_v37  ;;  %v7661_v56 = vadd.f32 %v8292_v61, %v7613_v57  ;;  %v7618_v35 = vadd.f32 %v12744_v51, %v7595_v33  ;;  %v7593_v7 = vmul.f32 %v12730_v62, %v7570_v14  ;;  %v7298_v12 = vadd.f32 %v7273_v42, %v6897_v16 }
 0x410   : > { %v7573_v20 = vadd.f32 %v9229_v54, %v7300_v31 }
 0x411   : > { %7677 = vst [vmem:[%s9748_s20 + $0x48] sm:$0xff] %v7661_v56  ;;  %v7666_v36 = vadd.f32 %v8303_v27, %v7618_v35  ;;  %v7616_v34 = vadd.f32 %v12744_v51, %v7593_v7  ;;  %v7571_v25 = vadd.f32 %v7546_v28, %v7298_v12 }
 0x412   : > { %v7596_v30 = vmul.f32 %v12730_v62, %v7573_v20 }
 0x413   : > { %7682 = vst [vmem:[%s9748_s20 + $0x70] sm:$0xff] %v7666_v36  ;;  %v7664_v47 = vadd.f32 %v8299_v22, %v7616_v34  ;;  %v7594_v13 = vmul.f32 %v12730_v62, %v7571_v25 }
 0x414   : > { %v7619_v59 = vadd.f32 %v12744_v51, %v7596_v30 }
 0x415   : > { %7680 = vst [vmem:[%s9748_s20 + $0x60] sm:$0xff] %v7664_v47  ;;  %v7617_v50 = vadd.f32 %v12744_v51, %v7594_v13 }
 0x416   : > { %v7667_v10 = vadd.f32 %v8304_v55, %v7619_v59 }
 0x417   : > { %v7665_v58 = vadd.f32 %v8300_v41, %v7617_v50 }
 0x418   : > { %7683 = vst [vmem:[%s9748_s20 + $0x78] sm:$0xff] %v7667_v10 }
 0x419   : > { %7681 = vst [vmem:[%s9748_s20 + $0x68] sm:$0xff] %v7665_v58 }
 0x41a PF: > { %s19_s13 = sadd.s32 1, %s9550_s13   ;;  %s13023_s30 = smov %s9542_s11 }
 0x41b   : > { %p16_p1 = scmp.ge.s32.totalorder %s19_s13, 6   ;;  %s13024_s10 = smov %s9546_s12 }
 0x41c   : > { %s13025_s11 = smov %s13028_s14  ;;  %s13026_s12 = smov %s13032_s15 }
 0x41d   :  { %18 = sbr.rel (!%p16_p1) target bundleno = 3 (0x3), region = 123 }

</bundles_post_ra>
